<compile_context>
chip_gen: v5e
topology: v5e:2x2
jax: 0.10.0
libtpu: 0.0.40
codegen_flags: <defaults>
</compile_context>

<pallas_src>
import functools
import math

import jax
import jax.numpy as jnp
from jax.experimental import pallas as pl
from jax.experimental.pallas import tpu as pltpu

# ----------------- small config, structurally consistent with DistilBERT -----------------
VOCAB = 1000
MAX_POS = 64
HIDDEN = 128          # distilbert hidden_size (768) scaled down
N_LAYERS = 2          # distilbert has 6; scaled down
N_HEADS = 2
HEAD_DIM = HIDDEN // N_HEADS
FFN = 256             # distilbert ffn (3072) scaled down
CLS_H1 = 512          # classifier: Linear(hidden, 512)
CLS_H2 = 256          # classifier: Linear(512, 256)
NUM_LABELS = 4
LN_EPS = 1e-12

_VMEM = pl.BlockSpec(memory_space=pltpu.MemorySpace.VMEM)


# ----------------- one fused kernel for the whole forward pass -----------------
def _model_kernel(emb_ref, maskb_ref, vec_ref, wbias_ref, wa_ref, w2_ref,
                  wc1_ref, wc2_ref, wc3_ref, clsb_ref, out_ref,
                  *, n_layers, batch, seq):
    B, S, H, Dh = batch, seq, HIDDEN, HEAD_DIM
    scale = 1.0 / math.sqrt(Dh)

    def mm(x, w):
        # bf16 MXU inputs (weights already bf16), fp32 accumulation.
        return jnp.dot(x.astype(jnp.bfloat16), w, preferred_element_type=jnp.float32)

    def ln(x, g, b):
        mu = jnp.mean(x, axis=-1, keepdims=True)
        var = jnp.mean(jnp.square(x - mu), axis=-1, keepdims=True)
        return (x - mu) * jax.lax.rsqrt(var + LN_EPS) * g + b

    mask_bias = maskb_ref[...]                                  # (B, 1, S) additive key mask

    # Embedding LayerNorm (vec rows 0/1 = gamma/beta).
    x = ln(emb_ref[...], vec_ref[0:1, :], vec_ref[1:2, :])      # (B*S, H) fp32, VMEM-resident

    for l in range(n_layers):
        r = 2 + 6 * l                                           # vec-slab base row for layer l
        wa_l = wa_ref.at[l]                                     # (H, 768) bf16 view: [Wqkv|Wo|W1]
        wqkv = wa_l[:, 0:3 * H]
        wo = wa_l[:, 3 * H:4 * H]
        w1 = wa_l[:, 4 * H:4 * H + FFN]
        w2 = w2_ref[l]                                          # (FFN, H) bf16
        bqkv = wbias_ref[l:l + 1, 0:3 * H]                      # (1, 3H) fp32
        b1 = wbias_ref[l:l + 1, 3 * H:3 * H + FFN]              # (1, FFN) fp32

        # Fused QKV projection; one bf16 cast shared by all heads.
        qkv = mm(x, wqkv) + bqkv                                # (B*S, 3H) fp32
        qkv_bf = qkv.astype(jnp.bfloat16)
        q = qkv_bf[:, 0:H].reshape(B, S, H)
        k = qkv_bf[:, H:2 * H].reshape(B, S, H)
        v = qkv_bf[:, 2 * H:3 * H].reshape(B, S, H)

        # Per-head scores/softmax/context (fp32 softmax), then ONE full-K output projection.
        ctx_heads = []
        for hd in range(N_HEADS):
            sl = slice(hd * Dh, (hd + 1) * Dh)
            sc = jnp.einsum("bqd,bkd->bqk", q[:, :, sl], k[:, :, sl],
                            preferred_element_type=jnp.float32) * scale
            sc = sc + mask_bias                                 # == masked_fill(mask==0, finfo.min)
            sc = sc - jnp.max(sc, axis=-1, keepdims=True)
            p = jnp.exp(sc)
            p = p * pl.reciprocal(jnp.sum(p, axis=-1, keepdims=True), approx=True)
            ctx = jnp.einsum("bqk,bkd->bqd", p.astype(jnp.bfloat16), v[:, :, sl],
                             preferred_element_type=jnp.float32)        # (B, S, Dh)
            ctx_heads.append(ctx.reshape(B * S, Dh))
        ctx_all = jnp.concatenate(ctx_heads, axis=-1)           # (B*S, H)
        attn = mm(ctx_all, wo) + vec_ref[r + 0:r + 1, :]        # bias bo
        x = ln(attn + x, vec_ref[r + 1:r + 2, :], vec_ref[r + 2:r + 3, :])

        # FFN.
        # TODO(synk): HF DistilBERT uses exact erf-GELU; tanh-approximate GELU used here.
        h1 = jax.nn.gelu(mm(x, w1) + b1, approximate=True)
        h2 = mm(h1, w2) + vec_ref[r + 3:r + 4, :]               # bias b2
        x = ln(h2 + x, vec_ref[r + 4:r + 5, :], vec_ref[r + 5:r + 6, :])

    # Classifier head on the CLS token (dropout = identity at inference).
    cls = x.reshape(B, S, H)[:, 0:1, :].reshape(B, H)           # last_hidden_state[:, 0, :]
    c = jnp.maximum(mm(cls, wc1_ref[...]) + clsb_ref[0:1, :], 0.0)
    c = jnp.maximum(mm(c, wc2_ref[...]) + clsb_ref[1:2, 0:CLS_H2], 0.0)
    bc3_row = 2 + 6 * n_layers
    logits = mm(c, wc3_ref[...]) + vec_ref[bc3_row:bc3_row + 1, :]   # (B, 128) lane-dense
    out_ref[...] = logits.astype(out_ref.dtype)


# ----------------- parameters (deterministic init, mirrors the nn.Module layout) -----------------
def init_params(key):
    keys = iter(jax.random.split(key, 128))

    def norm(shape, scale=0.02):
        return scale * jax.random.normal(next(keys), shape, jnp.float32)

    def layer():
        return dict(
            Wq=norm((HIDDEN, HIDDEN)), bq=jnp.zeros((HIDDEN,), jnp.float32),
            Wk=norm((HIDDEN, HIDDEN)), bk=jnp.zeros((HIDDEN,), jnp.float32),
            Wv=norm((HIDDEN, HIDDEN)), bv=jnp.zeros((HIDDEN,), jnp.float32),
            Wo=norm((HIDDEN, HIDDEN)), bo=jnp.zeros((HIDDEN,), jnp.float32),
            sa_ln_g=jnp.ones((HIDDEN,), jnp.float32), sa_ln_b=jnp.zeros((HIDDEN,), jnp.float32),
            W1=norm((HIDDEN, FFN)), b1=jnp.zeros((FFN,), jnp.float32),
            W2=norm((FFN, HIDDEN)), b2=jnp.zeros((HIDDEN,), jnp.float32),
            ffn_ln_g=jnp.ones((HIDDEN,), jnp.float32), ffn_ln_b=jnp.zeros((HIDDEN,), jnp.float32),
        )

    return dict(
        word_emb=norm((VOCAB, HIDDEN)),
        pos_emb=norm((MAX_POS, HIDDEN)),
        emb_ln_g=jnp.ones((HIDDEN,), jnp.float32),
        emb_ln_b=jnp.zeros((HIDDEN,), jnp.float32),
        layers=[layer() for _ in range(N_LAYERS)],
        Wc1=norm((HIDDEN, CLS_H1)), bc1=jnp.zeros((CLS_H1,), jnp.float32),
        Wc2=norm((CLS_H1, CLS_H2)), bc2=jnp.zeros((CLS_H2,), jnp.float32),
        Wc3=norm((CLS_H2, NUM_LABELS)), bc3=jnp.zeros((NUM_LABELS,), jnp.float32),
    )


# ----------------- one-time packing / casting (runs OUTSIDE the jitted forward) -----------------
def prepare_params(params):
    bf = jnp.bfloat16
    vec_rows = [params["emb_ln_g"], params["emb_ln_b"]]        # rows 0,1
    wide_rows, wa_rows, w2_rows = [], [], []
    for lp in params["layers"]:
        vec_rows += [lp["bo"], lp["sa_ln_g"], lp["sa_ln_b"],
                     lp["b2"], lp["ffn_ln_g"], lp["ffn_ln_b"]]  # rows 2+6l .. 2+6l+5
        wide_rows.append(jnp.concatenate([lp["bq"], lp["bk"], lp["bv"], lp["b1"]]))   # (640,)
        wa_rows.append(jnp.concatenate(
            [jnp.concatenate([lp["Wq"], lp["Wk"], lp["Wv"]], axis=1),
             lp["Wo"], lp["W1"]], axis=1))                                            # (128, 768)
        w2_rows.append(lp["W2"])                                                       # (256, 128)
    bc3_pad = jnp.zeros((HIDDEN,), jnp.float32).at[:NUM_LABELS].set(params["bc3"])
    vec_rows.append(bc3_pad)                                   # row 2 + 6*L

    wc3_pad = jnp.zeros((CLS_H2, HIDDEN), jnp.float32).at[:, :NUM_LABELS].set(params["Wc3"])
    clsb = jnp.zeros((2, CLS_H1), jnp.float32)
    clsb = clsb.at[0, :].set(params["bc1"]).at[1, :CLS_H2].set(params["bc2"])

    return dict(
        word_emb=params["word_emb"], pos_emb=params["pos_emb"],          # fp32, gathered in XLA
        vec_slab=jnp.stack(vec_rows, axis=0),                            # (3+6L, 128) fp32
        wide_slab=jnp.stack(wide_rows, axis=0),                          # (L, 640) fp32
        wa_slab=jnp.stack(wa_rows, axis=0).astype(bf),                   # (L, 128, 768) bf16
        w2_slab=jnp.stack(w2_rows, axis=0).astype(bf),                   # (L, 256, 128) bf16
        wc1=params["Wc1"].astype(bf), wc2=params["Wc2"].astype(bf),
        wc3=wc3_pad.astype(bf),                                          # (256, 128) bf16
        clsb=clsb,                                                       # (2, 512) fp32
    )


# ----------------- forward pass -----------------
def custom_distilbert_forward(packed, input_ids, attention_mask, labels=None):
    B, S = input_ids.shape
    n_layers = packed["wa_slab"].shape[0]

    # Embedding gather stays in XLA on purpose (16 KB gathered slab << 512 KB table DMA).
    emb = packed["word_emb"][input_ids] + packed["pos_emb"][jnp.arange(S)][None, :, :]
    emb2d = emb.reshape(B * S, HIDDEN).astype(jnp.float32)
    # Additive key-side mask bias, computed once (== masked_fill(mask==0, finfo.min)).
    mask_bias = jnp.where(attention_mask > 0, 0.0,
                          jnp.finfo(jnp.float32).min).astype(jnp.float32).reshape(B, 1, S)

    inputs = (emb2d, mask_bias, packed["vec_slab"], packed["wide_slab"],
              packed["wa_slab"], packed["w2_slab"],
              packed["wc1"], packed["wc2"], packed["wc3"], packed["clsb"])

    logits_pad = pl.pallas_call(
        functools.partial(_model_kernel, n_layers=n_layers, batch=B, seq=S),
        out_shape=jax.ShapeDtypeStruct((B, HIDDEN), jnp.float32),        # lane-dense output
        in_specs=[_VMEM] * len(inputs),
        out_specs=_VMEM,
    )(*inputs)
    logits = logits_pad[:, :NUM_LABELS]

    loss = None
    if labels is not None:
        # CrossEntropyLoss (mean) — tiny scalar reduction, plain JAX glue.
        logp = jax.nn.log_softmax(logits, axis=-1)
        loss = -jnp.mean(jnp.take_along_axis(logp, labels[:, None], axis=-1))
    return {"loss": loss, "logits": logits}


if __name__ == "__main__":
    key = jax.random.PRNGKey(0)
    pkey, ikey = jax.random.split(key)
    params = init_params(pkey)
    packed = prepare_params(params)      # one-time pack + bf16 cast (not re-done per call)

    B, S = 2, 16
    input_ids = jax.random.randint(ikey, (B, S), 0, VOCAB, dtype=jnp.int32)
    attention_mask = jnp.concatenate(
        [jnp.ones((B, S - 4), jnp.int32), jnp.zeros((B, 4), jnp.int32)], axis=1)

    fwd = jax.jit(custom_distilbert_forward)
    out = fwd(packed, input_ids, attention_mask)
    logits = jax.block_until_ready(out["logits"])
    assert logits.shape == (B, NUM_LABELS)
    assert bool(jnp.all(jnp.isfinite(logits)))
    print("KERNEL_OK")
</pallas_src>

<mosaic_0001>
module attributes {stable_mosaic.version = 11 : i64} {
  func.func @_model_kernel(%arg0: memref<32x128xf32, #tpu.memory_space<vmem>>, %arg1: memref<2x1x16xf32, #tpu.memory_space<vmem>>, %arg2: memref<15x128xf32, #tpu.memory_space<vmem>>, %arg3: memref<2x640xf32, #tpu.memory_space<vmem>>, %arg4: memref<2x128x768xbf16, #tpu.memory_space<vmem>>, %arg5: memref<2x256x128xbf16, #tpu.memory_space<vmem>>, %arg6: memref<128x512xbf16, #tpu.memory_space<vmem>>, %arg7: memref<512x256xbf16, #tpu.memory_space<vmem>>, %arg8: memref<256x128xbf16, #tpu.memory_space<vmem>>, %arg9: memref<2x512xf32, #tpu.memory_space<vmem>>, %arg10: memref<2x128xf32, #tpu.memory_space<vmem>>) attributes {dimension_semantics = [], scalar_prefetch = 0 : i64, scratch_operands = 0 : i64, tpu.core_type = #tpu.core_type<tc>} {
    %c0 = arith.constant 0 : index
    %c0_0 = arith.constant 0 : index
    %c0_1 = arith.constant 0 : index
    %0 = vector.load %arg1[%c0, %c0_0, %c0_1] : memref<2x1x16xf32, #tpu.memory_space<vmem>>, vector<2x1x16xf32>
    %c0_2 = arith.constant 0 : index
    %c0_3 = arith.constant 0 : index
    %1 = vector.load %arg0[%c0_2, %c0_3] : memref<32x128xf32, #tpu.memory_space<vmem>>, vector<32x128xf32>
    %c0_4 = arith.constant 0 : index
    %c0_5 = arith.constant 0 : index
    %2 = vector.load %arg2[%c0_4, %c0_5] : memref<15x128xf32, #tpu.memory_space<vmem>>, vector<1x128xf32>
    %c1 = arith.constant 1 : index
    %c0_6 = arith.constant 0 : index
    %3 = vector.load %arg2[%c1, %c0_6] : memref<15x128xf32, #tpu.memory_space<vmem>>, vector<1x128xf32>
    %cst = arith.constant dense<0.000000e+00> : vector<32xf32>
    %4 = vector.multi_reduction <add>, %1, %cst [1] : vector<32x128xf32> to vector<32xf32>
    %5 = vector.shape_cast %4 : vector<32xf32> to vector<32x1xf32>
    %cst_7 = arith.constant 1.280000e+02 : f32
    %6 = vector.broadcast %cst_7 : f32 to vector<32x1xf32>
    %7 = arith.divf %5, %6 : vector<32x1xf32>
    %8 = vector.broadcast %7 : vector<32x1xf32> to vector<32x128xf32>
    %9 = arith.subf %1, %8 : vector<32x128xf32>
    %10 = arith.mulf %9, %9 : vector<32x128xf32>
    %cst_8 = arith.constant dense<0.000000e+00> : vector<32xf32>
    %11 = vector.multi_reduction <add>, %10, %cst_8 [1] : vector<32x128xf32> to vector<32xf32>
    %12 = vector.shape_cast %11 : vector<32xf32> to vector<32x1xf32>
    %cst_9 = arith.constant 1.280000e+02 : f32
    %13 = vector.broadcast %cst_9 : f32 to vector<32x1xf32>
    %14 = arith.divf %12, %13 : vector<32x1xf32>
    %15 = vector.broadcast %7 : vector<32x1xf32> to vector<32x128xf32>
    %16 = arith.subf %1, %15 : vector<32x128xf32>
    %cst_10 = arith.constant 9.99999996E-13 : f32
    %17 = vector.broadcast %cst_10 : f32 to vector<32x1xf32>
    %18 = arith.addf %14, %17 : vector<32x1xf32>
    %19 = math.rsqrt %18 : vector<32x1xf32>
    %20 = vector.broadcast %19 : vector<32x1xf32> to vector<32x128xf32>
    %21 = arith.mulf %16, %20 : vector<32x128xf32>
    %22 = vector.broadcast %2 : vector<1x128xf32> to vector<32x128xf32>
    %23 = arith.mulf %21, %22 : vector<32x128xf32>
    %24 = vector.broadcast %3 : vector<1x128xf32> to vector<32x128xf32>
    %25 = arith.addf %23, %24 : vector<32x128xf32>
    %c0_i32 = arith.constant 0 : i32
    %c0_i32_11 = arith.constant 0 : i32
    %c0_i32_12 = arith.constant 0 : i32
    %26 = tpu.memref_slice %arg4[%c0_i32, %c0_i32_11, %c0_i32_12] : memref<2x128x768xbf16, #tpu.memory_space<vmem>> -> memref<1x128x768xbf16, #tpu.memory_space<vmem>>
    %27 = tpu.memref_squeeze %26 : memref<1x128x768xbf16, #tpu.memory_space<vmem>> -> memref<128x768xbf16, #tpu.memory_space<vmem>>
    %c0_13 = arith.constant 0 : index
    %c0_14 = arith.constant 0 : index
    %28 = vector.load %27[%c0_13, %c0_14] : memref<128x768xbf16, #tpu.memory_space<vmem>>, vector<128x384xbf16>
    %c0_i32_15 = arith.constant 0 : i32
    %c0_i32_16 = arith.constant 0 : i32
    %c0_i32_17 = arith.constant 0 : i32
    %29 = tpu.memref_slice %arg4[%c0_i32_15, %c0_i32_16, %c0_i32_17] : memref<2x128x768xbf16, #tpu.memory_space<vmem>> -> memref<1x128x768xbf16, #tpu.memory_space<vmem>>
    %30 = tpu.memref_squeeze %29 : memref<1x128x768xbf16, #tpu.memory_space<vmem>> -> memref<128x768xbf16, #tpu.memory_space<vmem>>
    %c0_18 = arith.constant 0 : index
    %c384 = arith.constant 384 : index
    %31 = vector.load %30[%c0_18, %c384] : memref<128x768xbf16, #tpu.memory_space<vmem>>, vector<128x128xbf16>
    %c0_i32_19 = arith.constant 0 : i32
    %c0_i32_20 = arith.constant 0 : i32
    %c0_i32_21 = arith.constant 0 : i32
    %32 = tpu.memref_slice %arg4[%c0_i32_19, %c0_i32_20, %c0_i32_21] : memref<2x128x768xbf16, #tpu.memory_space<vmem>> -> memref<1x128x768xbf16, #tpu.memory_space<vmem>>
    %33 = tpu.memref_squeeze %32 : memref<1x128x768xbf16, #tpu.memory_space<vmem>> -> memref<128x768xbf16, #tpu.memory_space<vmem>>
    %c0_22 = arith.constant 0 : index
    %c512 = arith.constant 512 : index
    %34 = vector.load %33[%c0_22, %c512] : memref<128x768xbf16, #tpu.memory_space<vmem>>, vector<128x256xbf16>
    %c0_23 = arith.constant 0 : index
    %c0_24 = arith.constant 0 : index
    %c0_25 = arith.constant 0 : index
    %35 = vector.load %arg5[%c0_23, %c0_24, %c0_25] : memref<2x256x128xbf16, #tpu.memory_space<vmem>>, vector<1x256x128xbf16>
    %36 = vector.shape_cast %35 : vector<1x256x128xbf16> to vector<256x128xbf16>
    %c0_26 = arith.constant 0 : index
    %c0_27 = arith.constant 0 : index
    %37 = vector.load %arg3[%c0_26, %c0_27] : memref<2x640xf32, #tpu.memory_space<vmem>>, vector<1x384xf32>
    %c0_28 = arith.constant 0 : index
    %c384_29 = arith.constant 384 : index
    %38 = vector.load %arg3[%c0_28, %c384_29] : memref<2x640xf32, #tpu.memory_space<vmem>>, vector<1x256xf32>
    %39 = arith.truncf %25 : vector<32x128xf32> to vector<32x128xbf16>
    %cst_30 = arith.constant dense<0.000000e+00> : vector<32x384xf32>
    %40 = tpu.matmul %39, %28, %cst_30 {dimension_numbers = #tpu.dot_dimension_numbers<[1], [0], [0], [1], [0, 0, 1, 1], [], []>} : vector<32x128xbf16>, vector<128x384xbf16>, vector<32x384xf32> -> vector<32x384xf32>
    %41 = vector.broadcast %37 : vector<1x384xf32> to vector<32x384xf32>
    %42 = arith.addf %40, %41 : vector<32x384xf32>
    %43 = arith.truncf %42 : vector<32x384xf32> to vector<32x384xbf16>
    %44 = vector.extract_strided_slice %43 {offsets = [0, 0], sizes = [32, 128], strides = [1, 1]} : vector<32x384xbf16> to vector<32x128xbf16>
    %45 = vector.shape_cast %44 : vector<32x128xbf16> to vector<2x16x128xbf16>
    %46 = vector.extract_strided_slice %43 {offsets = [0, 128], sizes = [32, 128], strides = [1, 1]} : vector<32x384xbf16> to vector<32x128xbf16>
    %47 = vector.shape_cast %46 : vector<32x128xbf16> to vector<2x16x128xbf16>
    %48 = vector.extract_strided_slice %43 {offsets = [0, 256], sizes = [32, 128], strides = [1, 1]} : vector<32x384xbf16> to vector<32x128xbf16>
    %49 = vector.shape_cast %48 : vector<32x128xbf16> to vector<2x16x128xbf16>
    %50 = vector.extract_strided_slice %45 {offsets = [0, 0, 0], sizes = [2, 16, 64], strides = [1, 1, 1]} : vector<2x16x128xbf16> to vector<2x16x64xbf16>
    %51 = vector.extract_strided_slice %47 {offsets = [0, 0, 0], sizes = [2, 16, 64], strides = [1, 1, 1]} : vector<2x16x128xbf16> to vector<2x16x64xbf16>
    "tpu.trace_start"() <{level = 10 : i32, message = "bqd,bkd->bqk"}> : () -> ()
    %cst_31 = arith.constant dense<0.000000e+00> : vector<2x16x16xf32>
    %52 = tpu.matmul %50, %51, %cst_31 {dimension_numbers = #tpu.dot_dimension_numbers<[2], [2], [1], [1], [0, 0, 0, 1, 1, 1], [0], [0]>} : vector<2x16x64xbf16>, vector<2x16x64xbf16>, vector<2x16x16xf32> -> vector<2x16x16xf32>
    "tpu.trace_stop"() : () -> ()
    %cst_32 = arith.constant 1.250000e-01 : f32
    %53 = vector.broadcast %cst_32 : f32 to vector<2x16x16xf32>
    %54 = arith.mulf %52, %53 : vector<2x16x16xf32>
    %55 = vector.broadcast %0 : vector<2x1x16xf32> to vector<2x16x16xf32>
    %56 = arith.addf %54, %55 : vector<2x16x16xf32>
    %cst_33 = arith.constant dense<0xFF800000> : vector<2x16xf32>
    %57 = vector.multi_reduction <maximumf>, %56, %cst_33 [2] : vector<2x16x16xf32> to vector<2x16xf32>
    %58 = vector.shape_cast %57 : vector<2x16xf32> to vector<2x16x1xf32>
    %59 = vector.broadcast %58 : vector<2x16x1xf32> to vector<2x16x16xf32>
    %60 = arith.subf %56, %59 : vector<2x16x16xf32>
    %61 = math.exp %60 : vector<2x16x16xf32>
    %cst_34 = arith.constant dense<0.000000e+00> : vector<2x16xf32>
    %62 = vector.multi_reduction <add>, %61, %cst_34 [2] : vector<2x16x16xf32> to vector<2x16xf32>
    %63 = vector.shape_cast %62 : vector<2x16xf32> to vector<2x16x1xf32>
    %64 = tpu.reciprocal %63 {approx = true} : vector<2x16x1xf32> -> vector<2x16x1xf32>
    %65 = vector.broadcast %64 : vector<2x16x1xf32> to vector<2x16x16xf32>
    %66 = arith.mulf %61, %65 : vector<2x16x16xf32>
    %67 = arith.truncf %66 : vector<2x16x16xf32> to vector<2x16x16xbf16>
    %68 = vector.extract_strided_slice %49 {offsets = [0, 0, 0], sizes = [2, 16, 64], strides = [1, 1, 1]} : vector<2x16x128xbf16> to vector<2x16x64xbf16>
    "tpu.trace_start"() <{level = 10 : i32, message = "bqk,bkd->bqd"}> : () -> ()
    %cst_35 = arith.constant dense<0.000000e+00> : vector<2x16x64xf32>
    %69 = tpu.matmul %67, %68, %cst_35 {dimension_numbers = #tpu.dot_dimension_numbers<[2], [1], [1], [2], [0, 0, 0, 1, 1, 2], [0], [0]>} : vector<2x16x16xbf16>, vector<2x16x64xbf16>, vector<2x16x64xf32> -> vector<2x16x64xf32>
    "tpu.trace_stop"() : () -> ()
    %70 = vector.shape_cast %69 : vector<2x16x64xf32> to vector<32x64xf32>
    %71 = vector.extract_strided_slice %45 {offsets = [0, 0, 64], sizes = [2, 16, 64], strides = [1, 1, 1]} : vector<2x16x128xbf16> to vector<2x16x64xbf16>
    %72 = vector.extract_strided_slice %47 {offsets = [0, 0, 64], sizes = [2, 16, 64], strides = [1, 1, 1]} : vector<2x16x128xbf16> to vector<2x16x64xbf16>
    "tpu.trace_start"() <{level = 10 : i32, message = "bqd,bkd->bqk"}> : () -> ()
    %cst_36 = arith.constant dense<0.000000e+00> : vector<2x16x16xf32>
    %73 = tpu.matmul %71, %72, %cst_36 {dimension_numbers = #tpu.dot_dimension_numbers<[2], [2], [1], [1], [0, 0, 0, 1, 1, 1], [0], [0]>} : vector<2x16x64xbf16>, vector<2x16x64xbf16>, vector<2x16x16xf32> -> vector<2x16x16xf32>
    "tpu.trace_stop"() : () -> ()
    %cst_37 = arith.constant 1.250000e-01 : f32
    %74 = vector.broadcast %cst_37 : f32 to vector<2x16x16xf32>
    %75 = arith.mulf %73, %74 : vector<2x16x16xf32>
    %76 = vector.broadcast %0 : vector<2x1x16xf32> to vector<2x16x16xf32>
    %77 = arith.addf %75, %76 : vector<2x16x16xf32>
    %cst_38 = arith.constant dense<0xFF800000> : vector<2x16xf32>
    %78 = vector.multi_reduction <maximumf>, %77, %cst_38 [2] : vector<2x16x16xf32> to vector<2x16xf32>
    %79 = vector.shape_cast %78 : vector<2x16xf32> to vector<2x16x1xf32>
    %80 = vector.broadcast %79 : vector<2x16x1xf32> to vector<2x16x16xf32>
    %81 = arith.subf %77, %80 : vector<2x16x16xf32>
    %82 = math.exp %81 : vector<2x16x16xf32>
    %cst_39 = arith.constant dense<0.000000e+00> : vector<2x16xf32>
    %83 = vector.multi_reduction <add>, %82, %cst_39 [2] : vector<2x16x16xf32> to vector<2x16xf32>
    %84 = vector.shape_cast %83 : vector<2x16xf32> to vector<2x16x1xf32>
    %85 = tpu.reciprocal %84 {approx = true} : vector<2x16x1xf32> -> vector<2x16x1xf32>
    %86 = vector.broadcast %85 : vector<2x16x1xf32> to vector<2x16x16xf32>
    %87 = arith.mulf %82, %86 : vector<2x16x16xf32>
    %88 = arith.truncf %87 : vector<2x16x16xf32> to vector<2x16x16xbf16>
    %89 = vector.extract_strided_slice %49 {offsets = [0, 0, 64], sizes = [2, 16, 64], strides = [1, 1, 1]} : vector<2x16x128xbf16> to vector<2x16x64xbf16>
    "tpu.trace_start"() <{level = 10 : i32, message = "bqk,bkd->bqd"}> : () -> ()
    %cst_40 = arith.constant dense<0.000000e+00> : vector<2x16x64xf32>
    %90 = tpu.matmul %88, %89, %cst_40 {dimension_numbers = #tpu.dot_dimension_numbers<[2], [1], [1], [2], [0, 0, 0, 1, 1, 2], [0], [0]>} : vector<2x16x16xbf16>, vector<2x16x64xbf16>, vector<2x16x64xf32> -> vector<2x16x64xf32>
    "tpu.trace_stop"() : () -> ()
    %91 = vector.shape_cast %90 : vector<2x16x64xf32> to vector<32x64xf32>
    %92 = tpu.concatenate %70, %91 in 1 : vector<32x64xf32>, vector<32x64xf32> -> vector<32x128xf32>
    %93 = arith.truncf %92 : vector<32x128xf32> to vector<32x128xbf16>
    %cst_41 = arith.constant dense<0.000000e+00> : vector<32x128xf32>
    %94 = tpu.matmul %93, %31, %cst_41 {dimension_numbers = #tpu.dot_dimension_numbers<[1], [0], [0], [1], [0, 0, 1, 1], [], []>} : vector<32x128xbf16>, vector<128x128xbf16>, vector<32x128xf32> -> vector<32x128xf32>
    %c2 = arith.constant 2 : index
    %c0_42 = arith.constant 0 : index
    %95 = vector.load %arg2[%c2, %c0_42] : memref<15x128xf32, #tpu.memory_space<vmem>>, vector<1x128xf32>
    %96 = vector.broadcast %95 : vector<1x128xf32> to vector<32x128xf32>
    %97 = arith.addf %94, %96 : vector<32x128xf32>
    %98 = arith.addf %97, %25 : vector<32x128xf32>
    %c3 = arith.constant 3 : index
    %c0_43 = arith.constant 0 : index
    %99 = vector.load %arg2[%c3, %c0_43] : memref<15x128xf32, #tpu.memory_space<vmem>>, vector<1x128xf32>
    %c4 = arith.constant 4 : index
    %c0_44 = arith.constant 0 : index
    %100 = vector.load %arg2[%c4, %c0_44] : memref<15x128xf32, #tpu.memory_space<vmem>>, vector<1x128xf32>
    %cst_45 = arith.constant dense<0.000000e+00> : vector<32xf32>
    %101 = vector.multi_reduction <add>, %98, %cst_45 [1] : vector<32x128xf32> to vector<32xf32>
    %102 = vector.shape_cast %101 : vector<32xf32> to vector<32x1xf32>
    %cst_46 = arith.constant 1.280000e+02 : f32
    %103 = vector.broadcast %cst_46 : f32 to vector<32x1xf32>
    %104 = arith.divf %102, %103 : vector<32x1xf32>
    %105 = vector.broadcast %104 : vector<32x1xf32> to vector<32x128xf32>
    %106 = arith.subf %98, %105 : vector<32x128xf32>
    %107 = arith.mulf %106, %106 : vector<32x128xf32>
    %cst_47 = arith.constant dense<0.000000e+00> : vector<32xf32>
    %108 = vector.multi_reduction <add>, %107, %cst_47 [1] : vector<32x128xf32> to vector<32xf32>
    %109 = vector.shape_cast %108 : vector<32xf32> to vector<32x1xf32>
    %cst_48 = arith.constant 1.280000e+02 : f32
    %110 = vector.broadcast %cst_48 : f32 to vector<32x1xf32>
    %111 = arith.divf %109, %110 : vector<32x1xf32>
    %112 = vector.broadcast %104 : vector<32x1xf32> to vector<32x128xf32>
    %113 = arith.subf %98, %112 : vector<32x128xf32>
    %cst_49 = arith.constant 9.99999996E-13 : f32
    %114 = vector.broadcast %cst_49 : f32 to vector<32x1xf32>
    %115 = arith.addf %111, %114 : vector<32x1xf32>
    %116 = math.rsqrt %115 : vector<32x1xf32>
    %117 = vector.broadcast %116 : vector<32x1xf32> to vector<32x128xf32>
    %118 = arith.mulf %113, %117 : vector<32x128xf32>
    %119 = vector.broadcast %99 : vector<1x128xf32> to vector<32x128xf32>
    %120 = arith.mulf %118, %119 : vector<32x128xf32>
    %121 = vector.broadcast %100 : vector<1x128xf32> to vector<32x128xf32>
    %122 = arith.addf %120, %121 : vector<32x128xf32>
    %123 = arith.truncf %122 : vector<32x128xf32> to vector<32x128xbf16>
    %cst_50 = arith.constant dense<0.000000e+00> : vector<32x256xf32>
    %124 = tpu.matmul %123, %34, %cst_50 {dimension_numbers = #tpu.dot_dimension_numbers<[1], [0], [0], [1], [0, 0, 1, 1], [], []>} : vector<32x128xbf16>, vector<128x256xbf16>, vector<32x256xf32> -> vector<32x256xf32>
    %125 = vector.broadcast %38 : vector<1x256xf32> to vector<32x256xf32>
    %126 = arith.addf %124, %125 : vector<32x256xf32>
    %127 = arith.mulf %126, %126 : vector<32x256xf32>
    %128 = arith.mulf %126, %127 : vector<32x256xf32>
    %cst_51 = arith.constant 4.471500e-02 : f32
    %129 = vector.broadcast %cst_51 : f32 to vector<32x256xf32>
    %130 = arith.mulf %129, %128 : vector<32x256xf32>
    %131 = arith.addf %126, %130 : vector<32x256xf32>
    %cst_52 = arith.constant 0.797884583 : f32
    %132 = vector.broadcast %cst_52 : f32 to vector<32x256xf32>
    %133 = arith.mulf %132, %131 : vector<32x256xf32>
    %134 = math.tanh %133 : vector<32x256xf32>
    %cst_53 = arith.constant 1.000000e+00 : f32
    %135 = vector.broadcast %cst_53 : f32 to vector<32x256xf32>
    %136 = arith.addf %135, %134 : vector<32x256xf32>
    %cst_54 = arith.constant 5.000000e-01 : f32
    %137 = vector.broadcast %cst_54 : f32 to vector<32x256xf32>
    %138 = arith.mulf %137, %136 : vector<32x256xf32>
    %139 = arith.mulf %126, %138 : vector<32x256xf32>
    %140 = arith.truncf %139 : vector<32x256xf32> to vector<32x256xbf16>
    %cst_55 = arith.constant dense<0.000000e+00> : vector<32x128xf32>
    %141 = tpu.matmul %140, %36, %cst_55 {dimension_numbers = #tpu.dot_dimension_numbers<[1], [0], [0], [1], [0, 0, 1, 1], [], []>} : vector<32x256xbf16>, vector<256x128xbf16>, vector<32x128xf32> -> vector<32x128xf32>
    %c5 = arith.constant 5 : index
    %c0_56 = arith.constant 0 : index
    %142 = vector.load %arg2[%c5, %c0_56] : memref<15x128xf32, #tpu.memory_space<vmem>>, vector<1x128xf32>
    %143 = vector.broadcast %142 : vector<1x128xf32> to vector<32x128xf32>
    %144 = arith.addf %141, %143 : vector<32x128xf32>
    %145 = arith.addf %144, %122 : vector<32x128xf32>
    %c6 = arith.constant 6 : index
    %c0_57 = arith.constant 0 : index
    %146 = vector.load %arg2[%c6, %c0_57] : memref<15x128xf32, #tpu.memory_space<vmem>>, vector<1x128xf32>
    %c7 = arith.constant 7 : index
    %c0_58 = arith.constant 0 : index
    %147 = vector.load %arg2[%c7, %c0_58] : memref<15x128xf32, #tpu.memory_space<vmem>>, vector<1x128xf32>
    %cst_59 = arith.constant dense<0.000000e+00> : vector<32xf32>
    %148 = vector.multi_reduction <add>, %145, %cst_59 [1] : vector<32x128xf32> to vector<32xf32>
    %149 = vector.shape_cast %148 : vector<32xf32> to vector<32x1xf32>
    %cst_60 = arith.constant 1.280000e+02 : f32
    %150 = vector.broadcast %cst_60 : f32 to vector<32x1xf32>
    %151 = arith.divf %149, %150 : vector<32x1xf32>
    %152 = vector.broadcast %151 : vector<32x1xf32> to vector<32x128xf32>
    %153 = arith.subf %145, %152 : vector<32x128xf32>
    %154 = arith.mulf %153, %153 : vector<32x128xf32>
    %cst_61 = arith.constant dense<0.000000e+00> : vector<32xf32>
    %155 = vector.multi_reduction <add>, %154, %cst_61 [1] : vector<32x128xf32> to vector<32xf32>
    %156 = vector.shape_cast %155 : vector<32xf32> to vector<32x1xf32>
    %cst_62 = arith.constant 1.280000e+02 : f32
    %157 = vector.broadcast %cst_62 : f32 to vector<32x1xf32>
    %158 = arith.divf %156, %157 : vector<32x1xf32>
    %159 = vector.broadcast %151 : vector<32x1xf32> to vector<32x128xf32>
    %160 = arith.subf %145, %159 : vector<32x128xf32>
    %cst_63 = arith.constant 9.99999996E-13 : f32
    %161 = vector.broadcast %cst_63 : f32 to vector<32x1xf32>
    %162 = arith.addf %158, %161 : vector<32x1xf32>
    %163 = math.rsqrt %162 : vector<32x1xf32>
    %164 = vector.broadcast %163 : vector<32x1xf32> to vector<32x128xf32>
    %165 = arith.mulf %160, %164 : vector<32x128xf32>
    %166 = vector.broadcast %146 : vector<1x128xf32> to vector<32x128xf32>
    %167 = arith.mulf %165, %166 : vector<32x128xf32>
    %168 = vector.broadcast %147 : vector<1x128xf32> to vector<32x128xf32>
    %169 = arith.addf %167, %168 : vector<32x128xf32>
    %c1_i32 = arith.constant 1 : i32
    %c0_i32_64 = arith.constant 0 : i32
    %c0_i32_65 = arith.constant 0 : i32
    %170 = tpu.memref_slice %arg4[%c1_i32, %c0_i32_64, %c0_i32_65] : memref<2x128x768xbf16, #tpu.memory_space<vmem>> -> memref<1x128x768xbf16, #tpu.memory_space<vmem>>
    %171 = tpu.memref_squeeze %170 : memref<1x128x768xbf16, #tpu.memory_space<vmem>> -> memref<128x768xbf16, #tpu.memory_space<vmem>>
    %c0_66 = arith.constant 0 : index
    %c0_67 = arith.constant 0 : index
    %172 = vector.load %171[%c0_66, %c0_67] : memref<128x768xbf16, #tpu.memory_space<vmem>>, vector<128x384xbf16>
    %c1_i32_68 = arith.constant 1 : i32
    %c0_i32_69 = arith.constant 0 : i32
    %c0_i32_70 = arith.constant 0 : i32
    %173 = tpu.memref_slice %arg4[%c1_i32_68, %c0_i32_69, %c0_i32_70] : memref<2x128x768xbf16, #tpu.memory_space<vmem>> -> memref<1x128x768xbf16, #tpu.memory_space<vmem>>
    %174 = tpu.memref_squeeze %173 : memref<1x128x768xbf16, #tpu.memory_space<vmem>> -> memref<128x768xbf16, #tpu.memory_space<vmem>>
    %c0_71 = arith.constant 0 : index
    %c384_72 = arith.constant 384 : index
    %175 = vector.load %174[%c0_71, %c384_72] : memref<128x768xbf16, #tpu.memory_space<vmem>>, vector<128x128xbf16>
    %c1_i32_73 = arith.constant 1 : i32
    %c0_i32_74 = arith.constant 0 : i32
    %c0_i32_75 = arith.constant 0 : i32
    %176 = tpu.memref_slice %arg4[%c1_i32_73, %c0_i32_74, %c0_i32_75] : memref<2x128x768xbf16, #tpu.memory_space<vmem>> -> memref<1x128x768xbf16, #tpu.memory_space<vmem>>
    %177 = tpu.memref_squeeze %176 : memref<1x128x768xbf16, #tpu.memory_space<vmem>> -> memref<128x768xbf16, #tpu.memory_space<vmem>>
    %c0_76 = arith.constant 0 : index
    %c512_77 = arith.constant 512 : index
    %178 = vector.load %177[%c0_76, %c512_77] : memref<128x768xbf16, #tpu.memory_space<vmem>>, vector<128x256xbf16>
    %c1_78 = arith.constant 1 : index
    %c0_79 = arith.constant 0 : index
    %c0_80 = arith.constant 0 : index
    %179 = vector.load %arg5[%c1_78, %c0_79, %c0_80] : memref<2x256x128xbf16, #tpu.memory_space<vmem>>, vector<1x256x128xbf16>
    %180 = vector.shape_cast %179 : vector<1x256x128xbf16> to vector<256x128xbf16>
    %c1_81 = arith.constant 1 : index
    %c0_82 = arith.constant 0 : index
    %181 = vector.load %arg3[%c1_81, %c0_82] : memref<2x640xf32, #tpu.memory_space<vmem>>, vector<1x384xf32>
    %c1_83 = arith.constant 1 : index
    %c384_84 = arith.constant 384 : index
    %182 = vector.load %arg3[%c1_83, %c384_84] : memref<2x640xf32, #tpu.memory_space<vmem>>, vector<1x256xf32>
    %183 = arith.truncf %169 : vector<32x128xf32> to vector<32x128xbf16>
    %cst_85 = arith.constant dense<0.000000e+00> : vector<32x384xf32>
    %184 = tpu.matmul %183, %172, %cst_85 {dimension_numbers = #tpu.dot_dimension_numbers<[1], [0], [0], [1], [0, 0, 1, 1], [], []>} : vector<32x128xbf16>, vector<128x384xbf16>, vector<32x384xf32> -> vector<32x384xf32>
    %185 = vector.broadcast %181 : vector<1x384xf32> to vector<32x384xf32>
    %186 = arith.addf %184, %185 : vector<32x384xf32>
    %187 = arith.truncf %186 : vector<32x384xf32> to vector<32x384xbf16>
    %188 = vector.extract_strided_slice %187 {offsets = [0, 0], sizes = [32, 128], strides = [1, 1]} : vector<32x384xbf16> to vector<32x128xbf16>
    %189 = vector.shape_cast %188 : vector<32x128xbf16> to vector<2x16x128xbf16>
    %190 = vector.extract_strided_slice %187 {offsets = [0, 128], sizes = [32, 128], strides = [1, 1]} : vector<32x384xbf16> to vector<32x128xbf16>
    %191 = vector.shape_cast %190 : vector<32x128xbf16> to vector<2x16x128xbf16>
    %192 = vector.extract_strided_slice %187 {offsets = [0, 256], sizes = [32, 128], strides = [1, 1]} : vector<32x384xbf16> to vector<32x128xbf16>
    %193 = vector.shape_cast %192 : vector<32x128xbf16> to vector<2x16x128xbf16>
    %194 = vector.extract_strided_slice %189 {offsets = [0, 0, 0], sizes = [2, 16, 64], strides = [1, 1, 1]} : vector<2x16x128xbf16> to vector<2x16x64xbf16>
    %195 = vector.extract_strided_slice %191 {offsets = [0, 0, 0], sizes = [2, 16, 64], strides = [1, 1, 1]} : vector<2x16x128xbf16> to vector<2x16x64xbf16>
    "tpu.trace_start"() <{level = 10 : i32, message = "bqd,bkd->bqk"}> : () -> ()
    %cst_86 = arith.constant dense<0.000000e+00> : vector<2x16x16xf32>
    %196 = tpu.matmul %194, %195, %cst_86 {dimension_numbers = #tpu.dot_dimension_numbers<[2], [2], [1], [1], [0, 0, 0, 1, 1, 1], [0], [0]>} : vector<2x16x64xbf16>, vector<2x16x64xbf16>, vector<2x16x16xf32> -> vector<2x16x16xf32>
    "tpu.trace_stop"() : () -> ()
    %cst_87 = arith.constant 1.250000e-01 : f32
    %197 = vector.broadcast %cst_87 : f32 to vector<2x16x16xf32>
    %198 = arith.mulf %196, %197 : vector<2x16x16xf32>
    %199 = vector.broadcast %0 : vector<2x1x16xf32> to vector<2x16x16xf32>
    %200 = arith.addf %198, %199 : vector<2x16x16xf32>
    %cst_88 = arith.constant dense<0xFF800000> : vector<2x16xf32>
    %201 = vector.multi_reduction <maximumf>, %200, %cst_88 [2] : vector<2x16x16xf32> to vector<2x16xf32>
    %202 = vector.shape_cast %201 : vector<2x16xf32> to vector<2x16x1xf32>
    %203 = vector.broadcast %202 : vector<2x16x1xf32> to vector<2x16x16xf32>
    %204 = arith.subf %200, %203 : vector<2x16x16xf32>
    %205 = math.exp %204 : vector<2x16x16xf32>
    %cst_89 = arith.constant dense<0.000000e+00> : vector<2x16xf32>
    %206 = vector.multi_reduction <add>, %205, %cst_89 [2] : vector<2x16x16xf32> to vector<2x16xf32>
    %207 = vector.shape_cast %206 : vector<2x16xf32> to vector<2x16x1xf32>
    %208 = tpu.reciprocal %207 {approx = true} : vector<2x16x1xf32> -> vector<2x16x1xf32>
    %209 = vector.broadcast %208 : vector<2x16x1xf32> to vector<2x16x16xf32>
    %210 = arith.mulf %205, %209 : vector<2x16x16xf32>
    %211 = arith.truncf %210 : vector<2x16x16xf32> to vector<2x16x16xbf16>
    %212 = vector.extract_strided_slice %193 {offsets = [0, 0, 0], sizes = [2, 16, 64], strides = [1, 1, 1]} : vector<2x16x128xbf16> to vector<2x16x64xbf16>
    "tpu.trace_start"() <{level = 10 : i32, message = "bqk,bkd->bqd"}> : () -> ()
    %cst_90 = arith.constant dense<0.000000e+00> : vector<2x16x64xf32>
    %213 = tpu.matmul %211, %212, %cst_90 {dimension_numbers = #tpu.dot_dimension_numbers<[2], [1], [1], [2], [0, 0, 0, 1, 1, 2], [0], [0]>} : vector<2x16x16xbf16>, vector<2x16x64xbf16>, vector<2x16x64xf32> -> vector<2x16x64xf32>
    "tpu.trace_stop"() : () -> ()
    %214 = vector.shape_cast %213 : vector<2x16x64xf32> to vector<32x64xf32>
    %215 = vector.extract_strided_slice %189 {offsets = [0, 0, 64], sizes = [2, 16, 64], strides = [1, 1, 1]} : vector<2x16x128xbf16> to vector<2x16x64xbf16>
    %216 = vector.extract_strided_slice %191 {offsets = [0, 0, 64], sizes = [2, 16, 64], strides = [1, 1, 1]} : vector<2x16x128xbf16> to vector<2x16x64xbf16>
    "tpu.trace_start"() <{level = 10 : i32, message = "bqd,bkd->bqk"}> : () -> ()
    %cst_91 = arith.constant dense<0.000000e+00> : vector<2x16x16xf32>
    %217 = tpu.matmul %215, %216, %cst_91 {dimension_numbers = #tpu.dot_dimension_numbers<[2], [2], [1], [1], [0, 0, 0, 1, 1, 1], [0], [0]>} : vector<2x16x64xbf16>, vector<2x16x64xbf16>, vector<2x16x16xf32> -> vector<2x16x16xf32>
    "tpu.trace_stop"() : () -> ()
    %cst_92 = arith.constant 1.250000e-01 : f32
    %218 = vector.broadcast %cst_92 : f32 to vector<2x16x16xf32>
    %219 = arith.mulf %217, %218 : vector<2x16x16xf32>
    %220 = vector.broadcast %0 : vector<2x1x16xf32> to vector<2x16x16xf32>
    %221 = arith.addf %219, %220 : vector<2x16x16xf32>
    %cst_93 = arith.constant dense<0xFF800000> : vector<2x16xf32>
    %222 = vector.multi_reduction <maximumf>, %221, %cst_93 [2] : vector<2x16x16xf32> to vector<2x16xf32>
    %223 = vector.shape_cast %222 : vector<2x16xf32> to vector<2x16x1xf32>
    %224 = vector.broadcast %223 : vector<2x16x1xf32> to vector<2x16x16xf32>
    %225 = arith.subf %221, %224 : vector<2x16x16xf32>
    %226 = math.exp %225 : vector<2x16x16xf32>
    %cst_94 = arith.constant dense<0.000000e+00> : vector<2x16xf32>
    %227 = vector.multi_reduction <add>, %226, %cst_94 [2] : vector<2x16x16xf32> to vector<2x16xf32>
    %228 = vector.shape_cast %227 : vector<2x16xf32> to vector<2x16x1xf32>
    %229 = tpu.reciprocal %228 {approx = true} : vector<2x16x1xf32> -> vector<2x16x1xf32>
    %230 = vector.broadcast %229 : vector<2x16x1xf32> to vector<2x16x16xf32>
    %231 = arith.mulf %226, %230 : vector<2x16x16xf32>
    %232 = arith.truncf %231 : vector<2x16x16xf32> to vector<2x16x16xbf16>
    %233 = vector.extract_strided_slice %193 {offsets = [0, 0, 64], sizes = [2, 16, 64], strides = [1, 1, 1]} : vector<2x16x128xbf16> to vector<2x16x64xbf16>
    "tpu.trace_start"() <{level = 10 : i32, message = "bqk,bkd->bqd"}> : () -> ()
    %cst_95 = arith.constant dense<0.000000e+00> : vector<2x16x64xf32>
    %234 = tpu.matmul %232, %233, %cst_95 {dimension_numbers = #tpu.dot_dimension_numbers<[2], [1], [1], [2], [0, 0, 0, 1, 1, 2], [0], [0]>} : vector<2x16x16xbf16>, vector<2x16x64xbf16>, vector<2x16x64xf32> -> vector<2x16x64xf32>
    "tpu.trace_stop"() : () -> ()
    %235 = vector.shape_cast %234 : vector<2x16x64xf32> to vector<32x64xf32>
    %236 = tpu.concatenate %214, %235 in 1 : vector<32x64xf32>, vector<32x64xf32> -> vector<32x128xf32>
    %237 = arith.truncf %236 : vector<32x128xf32> to vector<32x128xbf16>
    %cst_96 = arith.constant dense<0.000000e+00> : vector<32x128xf32>
    %238 = tpu.matmul %237, %175, %cst_96 {dimension_numbers = #tpu.dot_dimension_numbers<[1], [0], [0], [1], [0, 0, 1, 1], [], []>} : vector<32x128xbf16>, vector<128x128xbf16>, vector<32x128xf32> -> vector<32x128xf32>
    %c8 = arith.constant 8 : index
    %c0_97 = arith.constant 0 : index
    %239 = vector.load %arg2[%c8, %c0_97] : memref<15x128xf32, #tpu.memory_space<vmem>>, vector<1x128xf32>
    %240 = vector.broadcast %239 : vector<1x128xf32> to vector<32x128xf32>
    %241 = arith.addf %238, %240 : vector<32x128xf32>
    %242 = arith.addf %241, %169 : vector<32x128xf32>
    %c9 = arith.constant 9 : index
    %c0_98 = arith.constant 0 : index
    %243 = vector.load %arg2[%c9, %c0_98] : memref<15x128xf32, #tpu.memory_space<vmem>>, vector<1x128xf32>
    %c10 = arith.constant 10 : index
    %c0_99 = arith.constant 0 : index
    %244 = vector.load %arg2[%c10, %c0_99] : memref<15x128xf32, #tpu.memory_space<vmem>>, vector<1x128xf32>
    %cst_100 = arith.constant dense<0.000000e+00> : vector<32xf32>
    %245 = vector.multi_reduction <add>, %242, %cst_100 [1] : vector<32x128xf32> to vector<32xf32>
    %246 = vector.shape_cast %245 : vector<32xf32> to vector<32x1xf32>
    %cst_101 = arith.constant 1.280000e+02 : f32
    %247 = vector.broadcast %cst_101 : f32 to vector<32x1xf32>
    %248 = arith.divf %246, %247 : vector<32x1xf32>
    %249 = vector.broadcast %248 : vector<32x1xf32> to vector<32x128xf32>
    %250 = arith.subf %242, %249 : vector<32x128xf32>
    %251 = arith.mulf %250, %250 : vector<32x128xf32>
    %cst_102 = arith.constant dense<0.000000e+00> : vector<32xf32>
    %252 = vector.multi_reduction <add>, %251, %cst_102 [1] : vector<32x128xf32> to vector<32xf32>
    %253 = vector.shape_cast %252 : vector<32xf32> to vector<32x1xf32>
    %cst_103 = arith.constant 1.280000e+02 : f32
    %254 = vector.broadcast %cst_103 : f32 to vector<32x1xf32>
    %255 = arith.divf %253, %254 : vector<32x1xf32>
    %256 = vector.broadcast %248 : vector<32x1xf32> to vector<32x128xf32>
    %257 = arith.subf %242, %256 : vector<32x128xf32>
    %cst_104 = arith.constant 9.99999996E-13 : f32
    %258 = vector.broadcast %cst_104 : f32 to vector<32x1xf32>
    %259 = arith.addf %255, %258 : vector<32x1xf32>
    %260 = math.rsqrt %259 : vector<32x1xf32>
    %261 = vector.broadcast %260 : vector<32x1xf32> to vector<32x128xf32>
    %262 = arith.mulf %257, %261 : vector<32x128xf32>
    %263 = vector.broadcast %243 : vector<1x128xf32> to vector<32x128xf32>
    %264 = arith.mulf %262, %263 : vector<32x128xf32>
    %265 = vector.broadcast %244 : vector<1x128xf32> to vector<32x128xf32>
    %266 = arith.addf %264, %265 : vector<32x128xf32>
    %267 = arith.truncf %266 : vector<32x128xf32> to vector<32x128xbf16>
    %cst_105 = arith.constant dense<0.000000e+00> : vector<32x256xf32>
    %268 = tpu.matmul %267, %178, %cst_105 {dimension_numbers = #tpu.dot_dimension_numbers<[1], [0], [0], [1], [0, 0, 1, 1], [], []>} : vector<32x128xbf16>, vector<128x256xbf16>, vector<32x256xf32> -> vector<32x256xf32>
    %269 = vector.broadcast %182 : vector<1x256xf32> to vector<32x256xf32>
    %270 = arith.addf %268, %269 : vector<32x256xf32>
    %271 = arith.mulf %270, %270 : vector<32x256xf32>
    %272 = arith.mulf %270, %271 : vector<32x256xf32>
    %cst_106 = arith.constant 4.471500e-02 : f32
    %273 = vector.broadcast %cst_106 : f32 to vector<32x256xf32>
    %274 = arith.mulf %273, %272 : vector<32x256xf32>
    %275 = arith.addf %270, %274 : vector<32x256xf32>
    %cst_107 = arith.constant 0.797884583 : f32
    %276 = vector.broadcast %cst_107 : f32 to vector<32x256xf32>
    %277 = arith.mulf %276, %275 : vector<32x256xf32>
    %278 = math.tanh %277 : vector<32x256xf32>
    %cst_108 = arith.constant 1.000000e+00 : f32
    %279 = vector.broadcast %cst_108 : f32 to vector<32x256xf32>
    %280 = arith.addf %279, %278 : vector<32x256xf32>
    %cst_109 = arith.constant 5.000000e-01 : f32
    %281 = vector.broadcast %cst_109 : f32 to vector<32x256xf32>
    %282 = arith.mulf %281, %280 : vector<32x256xf32>
    %283 = arith.mulf %270, %282 : vector<32x256xf32>
    %284 = arith.truncf %283 : vector<32x256xf32> to vector<32x256xbf16>
    %cst_110 = arith.constant dense<0.000000e+00> : vector<32x128xf32>
    %285 = tpu.matmul %284, %180, %cst_110 {dimension_numbers = #tpu.dot_dimension_numbers<[1], [0], [0], [1], [0, 0, 1, 1], [], []>} : vector<32x256xbf16>, vector<256x128xbf16>, vector<32x128xf32> -> vector<32x128xf32>
    %c11 = arith.constant 11 : index
    %c0_111 = arith.constant 0 : index
    %286 = vector.load %arg2[%c11, %c0_111] : memref<15x128xf32, #tpu.memory_space<vmem>>, vector<1x128xf32>
    %287 = vector.broadcast %286 : vector<1x128xf32> to vector<32x128xf32>
    %288 = arith.addf %285, %287 : vector<32x128xf32>
    %289 = arith.addf %288, %266 : vector<32x128xf32>
    %c12 = arith.constant 12 : index
    %c0_112 = arith.constant 0 : index
    %290 = vector.load %arg2[%c12, %c0_112] : memref<15x128xf32, #tpu.memory_space<vmem>>, vector<1x128xf32>
    %c13 = arith.constant 13 : index
    %c0_113 = arith.constant 0 : index
    %291 = vector.load %arg2[%c13, %c0_113] : memref<15x128xf32, #tpu.memory_space<vmem>>, vector<1x128xf32>
    %cst_114 = arith.constant dense<0.000000e+00> : vector<32xf32>
    %292 = vector.multi_reduction <add>, %289, %cst_114 [1] : vector<32x128xf32> to vector<32xf32>
    %293 = vector.shape_cast %292 : vector<32xf32> to vector<32x1xf32>
    %cst_115 = arith.constant 1.280000e+02 : f32
    %294 = vector.broadcast %cst_115 : f32 to vector<32x1xf32>
    %295 = arith.divf %293, %294 : vector<32x1xf32>
    %296 = vector.broadcast %295 : vector<32x1xf32> to vector<32x128xf32>
    %297 = arith.subf %289, %296 : vector<32x128xf32>
    %298 = arith.mulf %297, %297 : vector<32x128xf32>
    %cst_116 = arith.constant dense<0.000000e+00> : vector<32xf32>
    %299 = vector.multi_reduction <add>, %298, %cst_116 [1] : vector<32x128xf32> to vector<32xf32>
    %300 = vector.shape_cast %299 : vector<32xf32> to vector<32x1xf32>
    %cst_117 = arith.constant 1.280000e+02 : f32
    %301 = vector.broadcast %cst_117 : f32 to vector<32x1xf32>
    %302 = arith.divf %300, %301 : vector<32x1xf32>
    %303 = vector.broadcast %295 : vector<32x1xf32> to vector<32x128xf32>
    %304 = arith.subf %289, %303 : vector<32x128xf32>
    %cst_118 = arith.constant 9.99999996E-13 : f32
    %305 = vector.broadcast %cst_118 : f32 to vector<32x1xf32>
    %306 = arith.addf %302, %305 : vector<32x1xf32>
    %307 = math.rsqrt %306 : vector<32x1xf32>
    %308 = vector.broadcast %307 : vector<32x1xf32> to vector<32x128xf32>
    %309 = arith.mulf %304, %308 : vector<32x128xf32>
    %310 = vector.broadcast %290 : vector<1x128xf32> to vector<32x128xf32>
    %311 = arith.mulf %309, %310 : vector<32x128xf32>
    %312 = vector.broadcast %291 : vector<1x128xf32> to vector<32x128xf32>
    %313 = arith.addf %311, %312 : vector<32x128xf32>
    %314 = vector.shape_cast %313 : vector<32x128xf32> to vector<2x16x128xf32>
    %315 = vector.extract_strided_slice %314 {offsets = [0, 0, 0], sizes = [2, 1, 128], strides = [1, 1, 1]} : vector<2x16x128xf32> to vector<2x1x128xf32>
    %316 = vector.shape_cast %315 : vector<2x1x128xf32> to vector<2x128xf32>
    %c0_119 = arith.constant 0 : index
    %c0_120 = arith.constant 0 : index
    %317 = vector.load %arg6[%c0_119, %c0_120] : memref<128x512xbf16, #tpu.memory_space<vmem>>, vector<128x512xbf16>
    %318 = arith.truncf %316 : vector<2x128xf32> to vector<2x128xbf16>
    %cst_121 = arith.constant dense<0.000000e+00> : vector<2x512xf32>
    %319 = tpu.matmul %318, %317, %cst_121 {dimension_numbers = #tpu.dot_dimension_numbers<[1], [0], [0], [1], [0, 0, 1, 1], [], []>} : vector<2x128xbf16>, vector<128x512xbf16>, vector<2x512xf32> -> vector<2x512xf32>
    %c0_122 = arith.constant 0 : index
    %c0_123 = arith.constant 0 : index
    %320 = vector.load %arg9[%c0_122, %c0_123] : memref<2x512xf32, #tpu.memory_space<vmem>>, vector<1x512xf32>
    %321 = vector.broadcast %320 : vector<1x512xf32> to vector<2x512xf32>
    %322 = arith.addf %319, %321 : vector<2x512xf32>
    %cst_124 = arith.constant 0.000000e+00 : f32
    %323 = vector.broadcast %cst_124 : f32 to vector<2x512xf32>
    %324 = arith.maximumf %322, %323 : vector<2x512xf32>
    %c0_125 = arith.constant 0 : index
    %c0_126 = arith.constant 0 : index
    %325 = vector.load %arg7[%c0_125, %c0_126] : memref<512x256xbf16, #tpu.memory_space<vmem>>, vector<512x256xbf16>
    %326 = arith.truncf %324 : vector<2x512xf32> to vector<2x512xbf16>
    %cst_127 = arith.constant dense<0.000000e+00> : vector<2x256xf32>
    %327 = tpu.matmul %326, %325, %cst_127 {dimension_numbers = #tpu.dot_dimension_numbers<[1], [0], [0], [1], [0, 0, 1, 1], [], []>} : vector<2x512xbf16>, vector<512x256xbf16>, vector<2x256xf32> -> vector<2x256xf32>
    %c1_128 = arith.constant 1 : index
    %c0_129 = arith.constant 0 : index
    %328 = vector.load %arg9[%c1_128, %c0_129] : memref<2x512xf32, #tpu.memory_space<vmem>>, vector<1x256xf32>
    %329 = vector.broadcast %328 : vector<1x256xf32> to vector<2x256xf32>
    %330 = arith.addf %327, %329 : vector<2x256xf32>
    %cst_130 = arith.constant 0.000000e+00 : f32
    %331 = vector.broadcast %cst_130 : f32 to vector<2x256xf32>
    %332 = arith.maximumf %330, %331 : vector<2x256xf32>
    %c0_131 = arith.constant 0 : index
    %c0_132 = arith.constant 0 : index
    %333 = vector.load %arg8[%c0_131, %c0_132] : memref<256x128xbf16, #tpu.memory_space<vmem>>, vector<256x128xbf16>
    %334 = arith.truncf %332 : vector<2x256xf32> to vector<2x256xbf16>
    %cst_133 = arith.constant dense<0.000000e+00> : vector<2x128xf32>
    %335 = tpu.matmul %334, %333, %cst_133 {dimension_numbers = #tpu.dot_dimension_numbers<[1], [0], [0], [1], [0, 0, 1, 1], [], []>} : vector<2x256xbf16>, vector<256x128xbf16>, vector<2x128xf32> -> vector<2x128xf32>
    %c14 = arith.constant 14 : index
    %c0_134 = arith.constant 0 : index
    %336 = vector.load %arg2[%c14, %c0_134] : memref<15x128xf32, #tpu.memory_space<vmem>>, vector<1x128xf32>
    %337 = vector.broadcast %336 : vector<1x128xf32> to vector<2x128xf32>
    %338 = arith.addf %335, %337 : vector<2x128xf32>
    %c0_135 = arith.constant 0 : index
    %c0_136 = arith.constant 0 : index
    %339 = vector.load %arg10[%c0_135, %c0_136] : memref<2x128xf32, #tpu.memory_space<vmem>>, vector<2x128xf32>
    tpu.vector_store %arg10[%c0_135, %c0_136], %338 {strides = array<i32>} : memref<2x128xf32, #tpu.memory_space<vmem>>, vector<2x128xf32>,
    return
  }
}

</mosaic_0001>

<bundles_post_ra>
// kernel: custom_distilbert_forward.1
= control target key start
LH: loop header
LB: loop body
LE: loop exit
PB: predicated region body
PF: predicated region fallthrough
CT: control target
= control target key end

     0   :  { %15 = vsyncpa [#allocation3], 0  ;;  %s5821_s0 = inlined_call_operand.vmem [shape: f32[32,128], index: 0, kind: input, shape index: {}]   ;;  %s5822_s1 = inlined_call_operand.vmem [shape: f32[2,1,16], index: 1, kind: input, shape index: {}]   ;;  %s5823_s2 = inlined_call_operand.vmem [shape: f32[15,128], index: 2, kind: input, shape index: {}]   ;;  %s5824_s3 = inlined_call_operand.vmem [shape: f32[2,640], index: 3, kind: input, shape index: {}]   ;;  %s5825_s4 = inlined_call_operand.hbm [shape: bf16[2,128,768], index: 4, kind: input, shape index: {}]   ;;  %s5826_s5 = inlined_call_operand.vmem [shape: bf16[2,256,128], index: 5, kind: input, shape index: {}]   ;;  %s5827_s6 = inlined_call_operand.hbm [shape: bf16[128,512], index: 6, kind: input, shape index: {}]   ;;  %s5828_s7 = inlined_call_operand.hbm [shape: bf16[512,256], index: 7, kind: input, shape index: {}]   ;;  %s5829_s8 = inlined_call_operand.vmem [shape: bf16[256,128], index: 8, kind: input, shape index: {}]   ;;  %s5830_s9 = inlined_call_operand.vmem [shape: f32[2,512], index: 9, kind: input, shape index: {}]   ;;  %s5831_s10 = inlined_call_operand.hbm [shape: f32[2,128], index: 10, kind: output, shape index: {}]  }
   0x1   :  { %16 = vsyncpa [#allocation6], 0  ;;  %s45_s15 = sshll.u32 %s5827_s6, 4  ;;  %s46_s15 = int_to_ptr.hbm [resolvable:$true] %s45_s15 }
   0x2   :  { %17 = vsyncpa [#allocation4], 0  ;;  %s5138_s16 = smov [#allocation5]   ;;  %s30_s20 = sshll.u32 %s5825_s4, 4  ;;  %s31_s20 = int_to_ptr.hbm [resolvable:$true] %s30_s20 }
   0x3   :  { %s47_s17 = sshll.u32 %s5138_s16, 4  ;;  %s5139_s21 = smov 256   ;;  %s48_s17 = int_to_ptr.vmem [resolvable:$true] %s47_s17 }
   0x4   :  { %s5140_s22 = smov 16   ;;  %s5141_s23 = smov [#allocation2]  }
   0x5   :  { %53 = dma.hbm_to_vmem [thread:$0]  %s46_s15, 4096, %s48_s17, [#allocation6], %s5139_s21, %s5139_s21, %s5140_s22  }
   0x6   :  { %s32_s24 = sshll.u32 %s5141_s23, 4  ;;  %s5142_s25 = smov 384   ;;  %s33_s24 = int_to_ptr.vmem [resolvable:$true] %s32_s24 }
   0x7   :  { %s5143_s26 = smov 24   ;;  %s58_s28 = sshll.u32 %s5828_s7, 4  ;;  %s59_s28 = int_to_ptr.hbm [resolvable:$true] %s58_s28 }
   0x8   :  { %38 = dma.hbm_to_vmem [thread:$0]  %s31_s20, 12288, %s33_s24, [#allocation3], %s5142_s25, %s5142_s25, %s5143_s26  }
   0x9   :  { %s5144_s29 = smov [#allocation7]   ;;  %s5145_s11 = smov 128  }
   0xa   :  { %s60_s30 = sshll.u32 %s5144_s29, 4  ;;  %s5146_s4 = smov 8   ;;  %s61_s30 = int_to_ptr.vmem [resolvable:$true] %s60_s30 }
   0xb   :  { %66 = dma.hbm_to_vmem [thread:$0]  %s59_s28, 8192, %s61_s30, [#allocation6], %s5145_s11, %s5145_s11, %s5146_s4  }
   0xc   :  { %5132 = dma.done.wait [#allocation3], 12288  }
   0xd   :  { %5133 = vsyncadd [#allocation3], 4294955008 }
   0xe   :  { %5134 = dma.done.wait [#allocation6], 12288  }
   0xf   :  { %5135 = vsyncadd [#allocation6], 4294955008  ;;  %v88_v0 = vld [vmem:[%s5821_s0 + $0x10] sm:$0xff]  ;;  %v86_v1 = vld [vmem:[%s5821_s0] sm:$0xff]  ;;  %v5147_v4 = vmov 128.0   ;;  %vm504_vm13 = vcmask 523264  }
  0x10   :  { %96 = vadd.xlane.f32.xlu1 %v88_v0  ;;  %92 = vadd.xlane.f32.xlu0 %v86_v1  ;;  %v89_v2 = vld [vmem:[%s5821_s0 + $0x18] sm:$0xff]  ;;  %v87_v3 = vld [vmem:[%s5821_s0 + $0x8] sm:$0xff]  ;;  %4900 = vrcp.f32 %v5147_v4  ;;  %v3678_v27 = vld [vmem:[#allocation2 + $0x150] sm:$0xf]  ;;  %vm565_vm14 = vcmask 130048   ;;  %s5148_s27 = smov 64  }
  0x11   :  { %v4625_v28 = vld [vmem:[#allocation2 + $0x164] sm:$0xf0]  ;;  %v4624_v29 = vld [vmem:[#allocation2 + $0x154] sm:$0xf]  ;;  %v3680_v31 = vld [vmem:[#allocation2 + $0x168] sm:$0xf0] }
  0x12   :  { %v3679_v30 = vor.u32 %v4625_v28, %v3678_v27  ;;  %v3686_v32 = vld [vmem:[#allocation2 + $0x158] sm:$0xf]  ;;  %v4626_v33 = vld [vmem:[#allocation2 + $0x16c] sm:$0xf0]  ;;  %v3683_v34 = vor.u32 %v4624_v29, %v3680_v31  ;;  %v3666_v36 = vld [vmem:[#allocation2 + $0x120] sm:$0xf] }
  0x13   :  { %v3687_v35 = vor.u32 %v4626_v33, %v3686_v32  ;;  %v4622_v37 = vld [vmem:[#allocation2 + $0x134] sm:$0xf0]  ;;  %v4621_v38 = vld [vmem:[#allocation2 + $0x124] sm:$0xf]  ;;  %v3668_v40 = vld [vmem:[#allocation2 + $0x138] sm:$0xf0] }
  0x14   :  { %425 = vmatpush.bf16.msra.mxu0 %v3679_v30  ;;  %444 = vmatpush.bf16.msra.mxu1 %v3683_v34  ;;  %v3667_v39 = vor.u32 %v4622_v37, %v3666_v36  ;;  %v3674_v41 = vld [vmem:[#allocation2 + $0x128] sm:$0xf]  ;;  %v4623_v42 = vld [vmem:[#allocation2 + $0x13c] sm:$0xf0]  ;;  %v3671_v43 = vor.u32 %v4621_v38, %v3668_v40  ;;  %v3654_v45 = vld [vmem:[#allocation2 + $0xf0] sm:$0xf] }
  0x15   :  { %463 = vmatpush.bf16.msra.mxu2 %v3687_v35  ;;  %v3675_v44 = vor.u32 %v4623_v42, %v3674_v41  ;;  %v4619_v46 = vld [vmem:[#allocation2 + $0x104] sm:$0xf0]  ;;  %v4618_v47 = vld [vmem:[#allocation2 + $0xf4] sm:$0xf]  ;;  %v3656_v49 = vld [vmem:[#allocation2 + $0x108] sm:$0xf0] }
  0x16   :  { %v4901_v5 = vpop.eup %4900  ;;  %v3655_v48 = vor.u32 %v4619_v46, %v3654_v45  ;;  %v3662_v50 = vld [vmem:[#allocation2 + $0xf8] sm:$0xf]  ;;  %v4620_v51 = vld [vmem:[#allocation2 + $0x10c] sm:$0xf0]  ;;  %v3659_v52 = vor.u32 %v4618_v47, %v3656_v49  ;;  %v3642_v54 = vld [vmem:[#allocation2 + $0xc0] sm:$0xf] }
  0x17   :  { %v101_v6 = vmul.f32 128.0, %v4901_v5  ;;  %vm105_vm0 = vweird.f32 %v4901_v5  ;;  %v3663_v53 = vor.u32 %v4620_v51, %v3662_v50  ;;  %v4616_v55 = vld [vmem:[#allocation2 + $0xd4] sm:$0xf0]  ;;  %v4615_v56 = vld [vmem:[#allocation2 + $0xc4] sm:$0xf]  ;;  %s5149_s14 = smov [#allocation8]  }
  0x18   :  { %98 = vadd.xlane.f32.xlu1 %v89_v2  ;;  %94 = vadd.xlane.f32.xlu0 %v87_v3  ;;  %v3643_v57 = vor.u32 %v4616_v55, %v3642_v54  ;;  %v3644_v58 = vld [vmem:[#allocation2 + $0xd8] sm:$0xf0]  ;;  %v3650_v59 = vld [vmem:[#allocation2 + $0xc8] sm:$0xf]  ;;  %v4617_v60 = vld [vmem:[#allocation2 + $0xdc] sm:$0xf0] }
  0x19   :  { %v102_v7 = vsub.f32 1.0, %v101_v6  ;;  %426 = vmatpush.bf16.msra.mxu0 %v3667_v39  ;;  %445 = vmatpush.bf16.msra.mxu1 %v3671_v43  ;;  %v3647_v61 = vor.u32 %v4615_v56, %v3644_v58  ;;  %v3651_v62 = vor.u32 %v4617_v60, %v3650_v59  ;;  %v3630_v63 = vld [vmem:[#allocation2 + $0x90] sm:$0xf]  ;;  %v3638_v4 = vld [vmem:[#allocation2 + $0x98] sm:$0xf]  ;;  %s3578_s15 = sshll.u32 %s5149_s14, 4  ;;  %s3579_s15 = int_to_ptr.vmem [resolvable:$true] %s3578_s15 }
  0x1a   :  { %464 = vmatpush.bf16.msra.mxu2 %v3675_v44  ;;  %v3614_v27 = vld [vmem:[#allocation2 + $0x38] sm:$0xf]  ;;  %v4608_v28 = vld [vmem:[#allocation2 + $0x4c] sm:$0xf0]  ;;  %v3594_v32 = vld [vmem:[#allocation2] sm:$0xf] }
  0x1b   :  { %v103_v8 = vmul.f32 %v4901_v5, %v102_v7  ;;  %v3615_v31 = vor.u32 %v4608_v28, %v3614_v27  ;;  %v4604_v33 = vld [vmem:[#allocation2 + $0x14] sm:$0xf0]  ;;  %v4603_v34 = vld [vmem:[#allocation2 + $0x4] sm:$0xf]  ;;  %v3596_v38 = vld [vmem:[#allocation2 + $0x18] sm:$0xf0] }
  0x1c   :  { %v3595_v37 = vor.u32 %v4604_v33, %v3594_v32  ;;  %v3602_v39 = vld [vmem:[#allocation2 + $0x8] sm:$0xf]  ;;  %v4605_v40 = vld [vmem:[#allocation2 + $0x1c] sm:$0xf0]  ;;  %v3599_v41 = vor.u32 %v4603_v34, %v3596_v38  ;;  %s3580_s17 = sshll.u32 %s5831_s10, 4  ;;  %s3581_s17 = int_to_ptr.hbm [resolvable:$true] %s3580_s17 }
  0x1d   :  { %v104_v9 = vadd.f32 %v4901_v5, %v103_v8  ;;  %427 = vmatpush.bf16.msra.mxu0 %v3655_v48  ;;  %446 = vmatpush.bf16.msra.mxu1 %v3659_v52  ;;  %v3618_v8 = vld [vmem:[#allocation2 + $0x60] sm:$0xf]  ;;  %v3603_v42 = vor.u32 %v4605_v40, %v3602_v39 }
  0x1e   :  { %465 = vmatpush.bf16.msra.mxu2 %v3663_v53 }
  0x1f   :  { %v5226_v10 = vsel %vm105_vm0, %v4901_v5, %v104_v9  ;;  %v4614_v5 = vld [vmem:[#allocation2 + $0xac] sm:$0xf0]  ;;  %v4610_v9 = vld [vmem:[#allocation2 + $0x74] sm:$0xf0] }
  0x20   :  { %v3639_v7 = vor.u32 %v4614_v5, %v3638_v4 }
  0x21   :  { %428 = vmatpush.bf16.msra.mxu0 %v3643_v57  ;;  %447 = vmatpush.bf16.msra.mxu1 %v3647_v61 }
  0x22   :  { %466 = vmatpush.bf16.msra.mxu2 %v3651_v62 }
  0x26   :  { %467 = vmatpush.bf16.msra.mxu2 %v3639_v7 }
  0x83   :  { %v97_v11 = vpop.xlane.xlu1 %96  ;;  %v93_v12 = vpop.xlane.xlu0 %92 }
  0x84   :  { %v109_v13 = vmul.f32 %v5226_v10, %v97_v11  ;;  %v107_v14 = vmul.f32 %v5226_v10, %v93_v12  ;;  %v4609_v11 = vld [vmem:[#allocation2 + $0x64] sm:$0xf]  ;;  %v3619_v12 = vor.u32 %v4610_v9, %v3618_v8  ;;  %v4883_v8 = vld [vmem:[%s5823_s2] ss:$0 sm:$0xff] }
  0x86   :  { %v5230_v15 = vsub.f32 %v88_v0, %v109_v13  ;;  %v5232_v16 = vsub.f32 %v86_v1, %v107_v14  ;;  %v4613_v0 = vld [vmem:[#allocation2 + $0xa4] sm:$0xf0]  ;;  %v4612_v1 = vld [vmem:[#allocation2 + $0x94] sm:$0xf]  ;;  %v3620_v13 = vld [vmem:[#allocation2 + $0x78] sm:$0xf0] }
  0x87   :  { %v3626_v14 = vld [vmem:[#allocation2 + $0x68] sm:$0xf] }
  0x88   :  { %v117_v17 = vmul.f32 %v5230_v15, %v5230_v15  ;;  %v115_v18 = vmul.f32 %v5232_v16, %v5232_v16 }
  0x8a   :  { %123 = vadd.xlane.f32.xlu0 %v117_v17  ;;  %119 = vadd.xlane.f32.xlu2 %v115_v18  ;;  %v4611_v17 = vld [vmem:[#allocation2 + $0x7c] sm:$0xf0]  ;;  %v3623_v18 = vor.u32 %v4609_v11, %v3620_v13 }
  0x8b   :  { %v99_v19 = vpop.xlane.xlu1 %98  ;;  %v95_v20 = vpop.xlane.xlu0 %94 }
  0x8c   :  { %v110_v21 = vmul.f32 %v5226_v10, %v99_v19  ;;  %v108_v22 = vmul.f32 %v5226_v10, %v95_v20  ;;  %v3627_v19 = vor.u32 %v4611_v17, %v3626_v14  ;;  %v3606_v20 = vld [vmem:[#allocation2 + $0x30] sm:$0xf] }
  0x8e   :  { %v5240_v23 = vsub.f32 %v89_v2, %v110_v21  ;;  %v5242_v24 = vsub.f32 %v87_v3, %v108_v22  ;;  %v3631_v2 = vor.u32 %v4613_v0, %v3630_v63  ;;  %v3632_v3 = vld [vmem:[#allocation2 + $0xa8] sm:$0xf0]  ;;  %468 = vmatpush.bf16.msra.mxu2 %v3627_v19  ;;  %v4607_v21 = vld [vmem:[#allocation2 + $0x44] sm:$0xf0]  ;;  %v4606_v22 = vld [vmem:[#allocation2 + $0x34] sm:$0xf] }
  0x8f   :  { %v3635_v6 = vor.u32 %v4612_v1, %v3632_v3 }
  0x90   :  { %v118_v25 = vmul.f32 %v5240_v23, %v5240_v23  ;;  %v116_v26 = vmul.f32 %v5242_v24, %v5242_v24  ;;  %429 = vmatpush.bf16.msra.mxu0 %v3631_v2 }
  0x91   :  { %448 = vmatpush.bf16.msra.mxu1 %v3635_v6 }
  0x92   :  { %125 = vadd.xlane.f32.xlu1 %v118_v25  ;;  %121 = vadd.xlane.f32.xlu2 %v116_v26  ;;  %v3607_v25 = vor.u32 %v4607_v21, %v3606_v20  ;;  %v3608_v26 = vld [vmem:[#allocation2 + $0x48] sm:$0xf0] }
  0x93   :  { %v3611_v30 = vor.u32 %v4606_v22, %v3608_v26  ;;  %469 = vmatpush.bf16.msra.mxu2 %v3615_v31 }
  0x94   :  { %430 = vmatpush.bf16.msra.mxu0 %v3619_v12 }
  0x95   :  { %449 = vmatpush.bf16.msra.mxu1 %v3623_v18  ;;  %v4884_v18 = vld [vmem:[%s5823_s2 + $0x1] ss:$0 sm:$0xff] }
  0x97   :  { %470 = vmatpush.bf16.msra.mxu2 %v3603_v42 }
  0x98   :  { %431 = vmatpush.bf16.msra.mxu0 %v3607_v25 }
  0x99   :  { %450 = vmatpush.bf16.msra.mxu1 %v3611_v30 }
  0x9c   :  { %432 = vmatpush.bf16.msra.mxu0 %v3595_v37 }
  0x9d   :  { %451 = vmatpush.bf16.msra.mxu1 %v3599_v41 }
  0xfd   :  { %v120_v29 = vpop.xlane.xlu2 %119  ;;  %v124_v36 = vpop.xlane.xlu0 %123 }
  0xfe   :  { %v127_v35 = vmul.f32 %v120_v29, %v5226_v10  ;;  %v129_v44 = vmul.f32 %v124_v36, %v5226_v10 }
 0x100   :  { %v131_v43 = vadd.f32 1e-12, %v127_v35  ;;  %v133_v45 = vadd.f32 1e-12, %v129_v44 }
 0x101   :  { %v285_v35 = vld [vmem:[%s5824_s3] ss:$2 sm:$0x7] }
 0x102   :  { %4902 = vrsqrt.f32 %v131_v43  ;;  %vm141_vm2 = vweird.f32 %v131_v43  ;;  %vm161_vm9 = vweird.f32 %v133_v45  ;;  %v291_v36 = vperm.slane %v285_v35, 0 }
 0x103   :  { %4904 = vrsqrt.f32 %v133_v45 }
 0x105   :  { %v126_v46 = vpop.xlane.xlu1 %125  ;;  %v122_v47 = vpop.xlane.xlu2 %121 }
 0x106   :  { %v130_v48 = vmul.f32 %v126_v46, %v5226_v10  ;;  %v128_v49 = vmul.f32 %v122_v47, %v5226_v10 }
 0x108   :  { %v4903_v50 = vpop.eup %4902  ;;  %v134_v51 = vadd.f32 1e-12, %v130_v48  ;;  %v132_v52 = vadd.f32 1e-12, %v128_v49 }
 0x109   :  { %v136_v53 = vmul.f32 %v4903_v50, %v131_v43  ;;  %v4905_v56 = vpop.eup %4904  ;;  %vm142_vm1 = vweird.f32 %v4903_v50 }
 0x10a   :  { %4906 = vrsqrt.f32 %v134_v51  ;;  %v156_v62 = vmul.f32 %v4905_v56, %v133_v45  ;;  %vm143_vm3 = vmor %vm141_vm2, %vm142_vm1  ;;  %vm151_vm5 = vweird.f32 %v132_v52  ;;  %vm171_vm7 = vweird.f32 %v134_v51 }
 0x10b   :  { %v137_v54 = vmul.f32 %v4903_v50, %v136_v53  ;;  %4908 = vrsqrt.f32 %v132_v52  ;;  %vm162_vm10 = vweird.f32 %v4905_v56 }
 0x10c   :  { %v157_v3 = vmul.f32 %v4905_v56, %v156_v62  ;;  %vm163_vm12 = vmor %vm161_vm9, %vm162_vm10 }
 0x10d   :  { %v138_v55 = vmul.f32 0.5, %v137_v54 }
 0x10e   :  { %v158_v9 = vmul.f32 0.5, %v157_v3 }
 0x10f   :  { %v139_v57 = vsub.f32 1.5, %v138_v55 }
 0x110   :  { %v4907_v58 = vpop.eup %4906  ;;  %v159_v19 = vsub.f32 1.5, %v158_v9 }
 0x111   :  { %v4909_v59 = vpop.eup %4908  ;;  %v166_v60 = vmul.f32 %v4907_v58, %v134_v51  ;;  %v140_v61 = vmul.f32 %v4903_v50, %v139_v57  ;;  %vm172_vm8 = vweird.f32 %v4907_v58 }
 0x112   :  { %v146_v63 = vmul.f32 %v4909_v59, %v132_v52  ;;  %vm152_vm4 = vweird.f32 %v4909_v59  ;;  %vm173_vm11 = vmor %vm171_vm7, %vm172_vm8  ;;  %v160_v25 = vmul.f32 %v4905_v56, %v159_v19 }
 0x113   :  { %v167_v0 = vmul.f32 %v4907_v58, %v166_v60  ;;  %v144_v2 = vsel %vm143_vm3, %v4903_v50, %v140_v61  ;;  %vm153_vm6 = vmor %vm151_vm5, %vm152_vm4 }
 0x114   :  { %v147_v1 = vmul.f32 %v4909_v59, %v146_v63  ;;  %v175_v7 = vmul.f32 %v144_v2, %v5232_v16  ;;  %v164_v27 = vsel %vm163_vm12, %v4905_v56, %v160_v25 }
 0x115   :  { %v168_v5 = vmul.f32 0.5, %v167_v0  ;;  %v177_v29 = vmul.f32 %v164_v27, %v5230_v15 }
 0x116   :  { %v148_v4 = vmul.f32 0.5, %v147_v1  ;;  %v180_v17 = vmul.f32 %v4883_v8, %v175_v7 }
 0x117   :  { %v169_v12 = vsub.f32 1.5, %v168_v5  ;;  %v182_v31 = vmul.f32 %v4883_v8, %v177_v29 }
 0x118   :  { %v149_v6 = vsub.f32 1.5, %v148_v4  ;;  %v5260_v21 = vadd.f32 %v4884_v18, %v180_v17 }
 0x119   :  { %v170_v20 = vmul.f32 %v4907_v58, %v169_v12  ;;  %v5270_v33 = vadd.f32 %v4884_v18, %v182_v31 }
 0x11a   :  { %v150_v11 = vmul.f32 %v4909_v59, %v149_v6 }
 0x11b   :  { %v174_v26 = vsel %vm173_vm11, %v4907_v58, %v170_v20  ;;  %v293_v58 = vperm.slane %v285_v35, 2 }
 0x11c   :  { %v154_v13 = vsel %vm153_vm6, %v4909_v59, %v150_v11  ;;  %v178_v28 = vmul.f32 %v174_v26, %v5240_v23  ;;  %v292_v23 = vperm.slane %v285_v35, 1 }
 0x11d   :  { %v176_v14 = vmul.f32 %v154_v13, %v5242_v24 }
 0x11e   :  { %v183_v30 = vmul.f32 %v4883_v8, %v178_v28 }
 0x11f   :  { %v181_v16 = vmul.f32 %v4883_v8, %v176_v14 }
 0x120   :  { %v5268_v32 = vadd.f32 %v4884_v18, %v183_v30 }
 0x121   :  { %v5262_v22 = vadd.f32 %v4884_v18, %v181_v16 }
 0x122   :  { %v289_v34 = vpack.c.bf16 %v5268_v32, %v5270_v33 }
 0x123   :  { %v288_v24 = vpack.c.bf16 %v5262_v22, %v5260_v21 }
 0x125   :  { %433 = vmatmul.bf16.vlgmr.msra.gmra.mxu0 %v288_v24  ;;  %452 = vmatmul.bf16.vlgmr.msra.gmra.mxu1 %v288_v24 }
 0x126   :  { %471 = vmatmul.bf16.vlgmr.msra.gmra.mxu2 %v288_v24 }
 0x135   :  { %438 = vmatmul.bf16.gmra.mxu0 %v289_v34  ;;  %457 = vmatmul.bf16.gmra.mxu1 %v289_v34 }
 0x136   :  { %476 = vmatmul.bf16.gmra.mxu2 %v289_v34 }
 0x1a2   :  { %v434_v37 = vpop.f32.mrf.mxu0  ;;  %v453_v15 = vpop.f32.mrf.mxu1 }
 0x1a3   :  { %v435_v38 = vadd.f32 %v434_v37, %v291_v36  ;;  %v454_v39 = vadd.f32 %v453_v15, %v292_v23 }
 0x1a5   :  { %v482_v40 = vpack.c.bf16 %v454_v39, %v435_v38 }
 0x1a7   :  { %v494_v47 = vrot.slane %v482_v40, 4  ;;  %v498_v60 = vunpack.c.l.b16 %v482_v40 }
 0x1a9   :  { %v472_v41 = vpop.f32.mrf.mxu2  ;;  %v501_v50 = vunpack.c.l.b16 %v494_v47 }
 0x1aa   :  { %v436_v42 = vpop.f32.mrf.mxu0  ;;  %v455_v43 = vpop.f32.mrf.mxu1  ;;  %v473_v2 = vadd.f32 %v472_v41, %v293_v58 }
 0x1ab   :  { %v437_v44 = vadd.f32 %v436_v42, %v291_v36  ;;  %v456_v45 = vadd.f32 %v455_v43, %v292_v23  ;;  %v5308_v43 = vld [vmem:[%s5822_s1 + $0x1] ss:$0 sm:$0xff] }
 0x1ac   :  { %v483_v9 = vpack.c.bf16 %v473_v2, %v473_v2 }
 0x1ad   :  { %v484_v46 = vpack.c.bf16 %v456_v45, %v437_v44 }
 0x1ae   :  { %v621_v16 = vunpack.c.l.b16 %v483_v9 }
 0x1af   :  { %v495_v48 = vrot.slane %v484_v46, 4  ;;  %v499_v59 = vunpack.c.l.b16 %v484_v46 }
 0x1b1   :  { %v474_v49 = vpop.f32.mrf.mxu2  ;;  %v502_v51 = vunpack.c.l.b16 %v495_v48  ;;  %v5281_v5 = vpack.c.b16 %v499_v59, %v498_v60 }
 0x1b2   :  { %v439_v52 = vpop.f32.mrf.mxu0  ;;  %v458_v53 = vpop.f32.mrf.mxu1  ;;  %v475_v61 = vadd.f32 %v474_v49, %v293_v58 }
 0x1b3   :  { %v5277_v54 = vpack.c.b16 %v502_v51, %v501_v50  ;;  %v440_v55 = vadd.f32 %v439_v52, %v291_v36  ;;  %v459_v56 = vadd.f32 %v458_v53, %v292_v23 }
 0x1b4   :  { %v485_v6 = vpack.c.bf16 %v475_v61, %v475_v61 }
 0x1b5   :  { %v509_v57 = vsel %vm504_vm13, %v5277_v54, 0  ;;  %v486_v62 = vpack.c.bf16 %v459_v56, %v440_v55 }
 0x1b6   :  { %518 = vmatpush.bf16.xpose.msra.mxu3 %v509_v57  ;;  %v622_v12 = vunpack.c.l.b16 %v485_v6 }
 0x1b7   :  { %v496_v7 = vrot.slane %v486_v62, 4  ;;  %v525_v30 = vunpack.c.l.b16 %v486_v62 }
 0x1b8   :  { %v5287_v24 = vpack.c.b16 %v622_v12, %v621_v16 }
 0x1b9   :  { %v477_v63 = vpop.f32.mrf.mxu2  ;;  %v528_v14 = vunpack.c.l.b16 %v496_v7 }
 0x1ba   :  { %v441_v0 = vpop.f32.mrf.mxu0  ;;  %v460_v1 = vpop.f32.mrf.mxu1  ;;  %v478_v18 = vadd.f32 %v477_v63, %v293_v58 }
 0x1bb   :  { %v442_v3 = vadd.f32 %v441_v0, %v291_v36  ;;  %v461_v4 = vadd.f32 %v460_v1, %v292_v23  ;;  %v5299_v36 = vld [vmem:[%s5822_s1] ss:$0 sm:$0xff] }
 0x1bc   :  { %v487_v27 = vpack.c.bf16 %v478_v18, %v478_v18 }
 0x1bd   :  { %v488_v8 = vpack.c.bf16 %v461_v4, %v442_v3  ;;  %3688 = vmatmul.msk.bf16.vlgmr.msra.gmra.mxu3 %vm504_vm13, %v5281_v5 }
 0x1be   :  { %v649_v31 = vunpack.c.l.b16 %v487_v27 }
 0x1bf   :  { %v497_v11 = vrot.slane %v488_v8, 4  ;;  %v526_v28 = vunpack.c.l.b16 %v488_v8 }
 0x1c1   :  { %v479_v13 = vpop.f32.mrf.mxu2  ;;  %v529_v17 = vunpack.c.l.b16 %v497_v11  ;;  %v527_v34 = vpack.c.b16 %v526_v28, %v525_v30 }
 0x1c2   :  { %v480_v19 = vadd.f32 %v479_v13, %v293_v58 }
 0x1c3   :  { %v5285_v20 = vpack.c.b16 %v529_v17, %v528_v14 }
 0x1c4   :  { %v489_v25 = vpack.c.bf16 %v480_v19, %v480_v19 }
 0x1c5   :  { %v535_v26 = vsel %vm504_vm13, %v5285_v20, 0 }
 0x1c6   :  { %544 = vmatpush.bf16.xpose.msrb.mxu3 %v535_v26  ;;  %v650_v29 = vunpack.c.l.b16 %v489_v25 }
 0x1c8   :  { %v5292_v35 = vpack.c.b16 %v650_v29, %v649_v31 }
 0x1cd   :  { %3689 = vmatmul.msk.bf16.vlgmr.msrb.gmra.mxu3 %vm504_vm13, %v527_v34 }
 0x1ce   :  { %635 = vmatpush.bf16.msra.mxu3 %v5287_v24 }
 0x1d2   :  { %663 = vmatpush.bf16.msrb.mxu3 %v5292_v35 }
 0x240   :  { %v520_v23 = vpop.f32.mrf.mxu3 }
 0x241   :  { %v551_v37 = vmul.f32 0.125, %v520_v23 }
 0x243   :  { %v561_v15 = vadd.f32 %v5299_v36, %v551_v37 }
 0x245   :  { %v566_v38 = vsel %vm565_vm14, %v561_v15, -inf }
 0x246   :  { %567 = vmax.xlane.f32.xlu2 %v566_v38 }
 0x248   :  { %v522_v39 = vpop.f32.mrf.mxu3 }
 0x249   :  { %v552_v40 = vmul.f32 0.125, %v522_v39 }
 0x24b   :  { %v562_v41 = vadd.f32 %v5299_v36, %v552_v40 }
 0x24d   :  { %v569_v42 = vsel %vm565_vm14, %v562_v41, -inf }
 0x24e   :  { %570 = vmax.xlane.f32.xlu0 %v569_v42 }
 0x250   :  { %v546_v44 = vpop.f32.mrf.mxu3 }
 0x251   :  { %v553_v45 = vmul.f32 0.125, %v546_v44 }
 0x253   :  { %v563_v46 = vadd.f32 %v5308_v43, %v553_v45 }
 0x255   :  { %v572_v47 = vsel %vm565_vm14, %v563_v46, -inf }
 0x256   :  { %573 = vmax.xlane.f32.xlu1 %v572_v47 }
 0x258   :  { %v548_v48 = vpop.f32.mrf.mxu3 }
 0x259   :  { %v554_v49 = vmul.f32 0.125, %v548_v48 }
 0x25b   :  { %v564_v50 = vadd.f32 %v5308_v43, %v554_v49 }
 0x25d   :  { %v575_v51 = vsel %vm565_vm14, %v564_v50, -inf }
 0x25e   :  { %576 = vmax.xlane.f32.xlu2 %v575_v51 }
 0x2b9   :  { %v568_v52 = vpop.xlane.xlu2 %567 }
 0x2ba   :  { %v578_v53 = vsub.f32 %v561_v15, %v568_v52 }
 0x2bc   :  { %v582_v55 = vmul.f32 1.442695, %v578_v53 }
 0x2be   :  { %4910 = vpow2.f32 %v582_v55 }
 0x2c1   :  { %v571_v56 = vpop.xlane.xlu0 %570 }
 0x2c2   :  { %v579_v57 = vsub.f32 %v562_v41, %v571_v56 }
 0x2c4   :  { %v4911_v58 = vpop.eup %4910  ;;  %v584_v59 = vmul.f32 1.442695, %v579_v57 }
 0x2c5   :  { %v590_v60 = vsel %vm565_vm14, %v4911_v58, 0.0 }
 0x2c6   :  { %4912 = vpow2.f32 %v584_v59  ;;  %591 = vadd.xlane.f32.xlu0 %v590_v60 }
 0x2c9   :  { %v574_v61 = vpop.xlane.xlu1 %573 }
 0x2ca   :  { %v580_v62 = vsub.f32 %v563_v46, %v574_v61 }
 0x2cc   :  { %v4913_v63 = vpop.eup %4912  ;;  %v586_v0 = vmul.f32 1.442695, %v580_v62 }
 0x2cd   :  { %v593_v1 = vsel %vm565_vm14, %v4913_v63, 0.0 }
 0x2ce   :  { %4914 = vpow2.f32 %v586_v0  ;;  %594 = vadd.xlane.f32.xlu1 %v593_v1 }
 0x2d1   :  { %v577_v2 = vpop.xlane.xlu2 %576 }
 0x2d2   :  { %v581_v3 = vsub.f32 %v564_v50, %v577_v2 }
 0x2d4   :  { %v4915_v4 = vpop.eup %4914  ;;  %v588_v6 = vmul.f32 1.442695, %v581_v3 }
 0x2d5   :  { %v596_v7 = vsel %vm565_vm14, %v4915_v4, 0.0 }
 0x2d6   :  { %4916 = vpow2.f32 %v588_v6  ;;  %597 = vadd.xlane.f32.xlu2 %v596_v7 }
 0x2dc   :  { %v4917_v8 = vpop.eup %4916 }
 0x2dd   :  { %v599_v9 = vsel %vm565_vm14, %v4917_v8, 0.0 }
 0x2de   :  { %600 = vadd.xlane.f32.xlu0 %v599_v9 }
 0x2e7   :  { %672 = vrot.lane.b32.xlu1 %v5277_v54, %s5148_s27 }
 0x2ee   :  { %670 = vrot.lane.b32.xlu2 %v5281_v5, %s5148_s27 }
 0x2f2   :  { %696 = vrot.lane.b32.xlu0 %v5285_v20, %s5148_s27 }
 0x2f6   :  { %694 = vrot.lane.b32.xlu2 %v527_v34, %s5148_s27 }
 0x339   :  { %v592_v11 = vpop.xlane.xlu0 %591 }
 0x33a   :  { %4918 = vrcp.f32 %v592_v11 }
 0x340   :  { %v4919_v13 = vpop.eup %4918 }
 0x341   :  { %v595_v12 = vpop.xlane.xlu1 %594  ;;  %v606_v14 = vmul.f32 %v4919_v13, %v4911_v58 }
 0x342   :  { %4920 = vrcp.f32 %v595_v12 }
 0x343   :  { %v610_v18 = vpack.c.bf16 %v606_v14, %v606_v14 }
 0x345   :  { %v616_v54 = vunpack.c.l.b16 %v610_v18 }
 0x348   :  { %v4921_v17 = vpop.eup %4920 }
 0x349   :  { %v607_v19 = vmul.f32 %v4921_v17, %v4913_v63  ;;  %v598_v16 = vpop.xlane.xlu2 %597 }
 0x34a   :  { %4922 = vrcp.f32 %v598_v16 }
 0x34b   :  { %v611_v25 = vpack.c.bf16 %v607_v19, %v607_v19 }
 0x34d   :  { %v617_v26 = vunpack.c.l.b16 %v611_v25 }
 0x34f   :  { %v618_v5 = vpack.c.b16 %v617_v26, %v616_v54 }
 0x350   :  { %v4923_v27 = vpop.eup %4922 }
 0x351   :  { %3690 = vmatmul.msk.bf16.vlgmr.msra.gmra.mxu3 %vm565_vm14, %v618_v5  ;;  %v601_v20 = vpop.xlane.xlu0 %600  ;;  %v608_v28 = vmul.f32 %v4923_v27, %v4915_v4  ;;  %v671_v40 = vpop.permute.xlu2 %670 }
 0x352   :  { %4924 = vrcp.f32 %v601_v20 }
 0x353   :  { %v612_v30 = vpack.c.bf16 %v608_v28, %v608_v28 }
 0x355   :  { %v644_v15 = vunpack.c.l.b16 %v612_v30 }
 0x358   :  { %v4925_v29 = vpop.eup %4924 }
 0x359   :  { %v609_v31 = vmul.f32 %v4925_v29, %v4917_v8  ;;  %v673_v34 = vpop.permute.xlu1 %672  ;;  %v695_v44 = vpop.permute.xlu2 %694 }
 0x35a   :  { %v678_v23 = vsel %vm504_vm13, %v673_v34, 0 }
 0x35b   :  { %v613_v37 = vpack.c.bf16 %v609_v31, %v609_v31  ;;  %687 = vmatpush.bf16.xpose.msra.mxu3 %v678_v23 }
 0x35d   :  { %v645_v38 = vunpack.c.l.b16 %v613_v37 }
 0x35f   :  { %v646_v39 = vpack.c.b16 %v645_v38, %v644_v15 }
 0x361   :  { %3691 = vmatmul.msk.bf16.vlgmr.msrb.gmra.mxu3 %vm565_vm14, %v646_v39 }
 0x364   :  { %v697_v41 = vpop.permute.xlu0 %696 }
 0x365   :  { %v702_v42 = vsel %vm504_vm13, %v697_v41, 0 }
 0x366   :  { %711 = vmatpush.bf16.xpose.msrb.mxu1 %v702_v42 }
 0x36d   :  { %3693 = vmatmul.msk.bf16.vlgmr.msrb.gmra.mxu1 %vm504_vm13, %v695_v44 }
 0x371   :  { %3692 = vmatmul.msk.bf16.vlgmr.msra.gmra.mxu3 %vm504_vm13, %v671_v40 }
 0x3d4   :  { %v5331_v45 = vpop.f32.mrf.mxu3 }
 0x3dc   :  { %v5333_v46 = vpop.f32.mrf.mxu3 }
 0x3e4   :  { %v5335_v47 = vpop.f32.mrf.mxu3 }
 0x3ea   :  { %v713_v48 = vpop.f32.mrf.mxu1 }
 0x3eb   :  { %v720_v49 = vmul.f32 0.125, %v713_v48 }
 0x3ec   :  { %v5337_v50 = vpop.f32.mrf.mxu3 }
 0x3ed   :  { %v724_v51 = vadd.f32 %v5308_v43, %v720_v49 }
 0x3ef   :  { %v732_v52 = vsel %vm565_vm14, %v724_v51, -inf }
 0x3f0   :  { %733 = vmax.xlane.f32.xlu2 %v732_v52 }
 0x3f2   :  { %v715_v56 = vpop.f32.mrf.mxu1 }
 0x3f3   :  { %v721_v58 = vmul.f32 0.125, %v715_v56  ;;  %v4634_v56 = vld [vmem:[#allocation2 + $0x170] sm:$0xf0] }
 0x3f4   :  { %v689_v53 = vpop.f32.mrf.mxu3 }
 0x3f5   :  { %v718_v55 = vmul.f32 0.125, %v689_v53  ;;  %v725_v62 = vadd.f32 %v5308_v43, %v721_v58 }
 0x3f7   :  { %v722_v57 = vadd.f32 %v5299_v36, %v718_v55  ;;  %v735_v1 = vsel %vm565_vm14, %v725_v62, -inf  ;;  %v3726_v55 = vld [vmem:[#allocation2 + $0x15c] sm:$0xf] }
 0x3f8   :  { %v3727_v58 = vor.u32 %v4634_v56, %v3726_v55 }
 0x3f9   :  { %v726_v59 = vsel %vm565_vm14, %v722_v57, -inf }
 0x3fa   :  { %727 = vmax.xlane.f32.xlu1 %v726_v59  ;;  %v4633_v59 = vld [vmem:[#allocation2 + $0x140] sm:$0xf0]  ;;  %896 = vmatpush.bf16.msrb.mxu0 %v3727_v58 }
 0x3fc   :  { %v691_v60 = vpop.f32.mrf.mxu3 }
 0x3fd   :  { %v719_v61 = vmul.f32 0.125, %v691_v60 }
 0x3ff   :  { %v723_v63 = vadd.f32 %v5299_v36, %v719_v61  ;;  %v3718_v61 = vld [vmem:[#allocation2 + $0xfc] sm:$0xf] }
 0x401   :  { %v729_v0 = vsel %vm565_vm14, %v723_v63, -inf }
 0x402   :  { %730 = vmax.xlane.f32.xlu0 %v729_v0  ;;  %736 = vmax.xlane.f32.xlu1 %v735_v1  ;;  %v3714_v0 = vld [vmem:[#allocation2 + $0xcc] sm:$0xf]  ;;  %v4631_v1 = vld [vmem:[#allocation2 + $0xe0] sm:$0xf0] }
 0x41b   :  { %779 = vrot.lane.b32.xlu1 %v5287_v24, %s5148_s27 }
 0x463   :  { %v734_v2 = vpop.xlane.xlu2 %733 }
 0x464   :  { %v740_v6 = vsub.f32 %v724_v51, %v734_v2  ;;  %v3715_v2 = vor.u32 %v4631_v1, %v3714_v0  ;;  %v4650_v0 = vld [vmem:[#allocation2 + $0x174] sm:$0xf0]  ;;  %v4649_v1 = vld [vmem:[#allocation2 + $0x164] sm:$0xf] }
 0x466   :  { %v746_v8 = vmul.f32 1.442695, %v740_v6 }
 0x46d   :  { %v728_v3 = vpop.xlane.xlu1 %727 }
 0x46e   :  { %v738_v4 = vsub.f32 %v722_v57, %v728_v3  ;;  %v3722_v57 = vld [vmem:[#allocation2 + $0x12c] sm:$0xf]  ;;  %v3710_v3 = vld [vmem:[#allocation2 + $0x9c] sm:$0xf] }
 0x46f   :  { %v3723_v60 = vor.u32 %v4633_v59, %v3722_v57 }
 0x470   :  { %v742_v7 = vmul.f32 1.442695, %v738_v4  ;;  %v4630_v4 = vld [vmem:[#allocation2 + $0xb0] sm:$0xf0] }
 0x471   :  { %897 = vmatpush.bf16.msrb.mxu0 %v3723_v60 }
 0x472   :  { %4926 = vpow2.f32 %v742_v7  ;;  %v3711_v7 = vor.u32 %v4630_v4, %v3710_v3  ;;  %v3788_v3 = vld [vmem:[#allocation2 + $0x178] sm:$0xf0] }
 0x473   :  { %4928 = vpow2.f32 %v746_v8  ;;  %v3706_v8 = vld [vmem:[#allocation2 + $0x6c] sm:$0xf]  ;;  %v3791_v4 = vor.u32 %v4649_v1, %v3788_v3 }
 0x475   :  { %v731_v9 = vpop.xlane.xlu0 %730  ;;  %v737_v43 = vpop.xlane.xlu1 %736 }
 0x476   :  { %v739_v11 = vsub.f32 %v723_v63, %v731_v9  ;;  %v741_v13 = vsub.f32 %v725_v62, %v737_v43  ;;  %v4632_v62 = vld [vmem:[#allocation2 + $0x110] sm:$0xf0]  ;;  %v4629_v9 = vld [vmem:[#allocation2 + $0x80] sm:$0xf0] }
 0x477   :  { %v3719_v63 = vor.u32 %v4632_v62, %v3718_v61  ;;  %v3707_v43 = vor.u32 %v4629_v9, %v3706_v8  ;;  %v4647_v8 = vld [vmem:[#allocation2 + $0x134] sm:$0xf] }
 0x478   :  { %v4927_v36 = vpop.eup %4926  ;;  %v744_v12 = vmul.f32 1.442695, %v739_v11  ;;  %v748_v17 = vmul.f32 1.442695, %v741_v13  ;;  %v3702_v11 = vld [vmem:[#allocation2 + $0x3c] sm:$0xf] }
 0x479   :  { %v750_v14 = vsel %vm565_vm14, %v4927_v36, 0.0  ;;  %v4929_v24 = vpop.eup %4928  ;;  %898 = vmatpush.bf16.msrb.mxu0 %v3719_v63  ;;  %v3786_v63 = vld [vmem:[#allocation2 + $0x160] sm:$0xf] }
 0x47a   :  { %4930 = vpow2.f32 %v744_v12  ;;  %751 = vadd.xlane.f32.xlu0 %v750_v14  ;;  %v756_v16 = vsel %vm565_vm14, %v4929_v24, 0.0 }
 0x47b   :  { %4932 = vpow2.f32 %v748_v17 }
 0x47d   :  { %899 = vmatpush.bf16.msrb.mxu0 %v3715_v2  ;;  %v3787_v2 = vor.u32 %v4650_v0, %v3786_v63 }
 0x47f   :  { %1098 = vmatpush.bf16.msra.mxu1 %v3787_v2 }
 0x480   :  { %v4931_v18 = vpop.eup %4930 }
 0x481   :  { %v753_v19 = vsel %vm565_vm14, %v4931_v18, 0.0  ;;  %v4933_v25 = vpop.eup %4932  ;;  %900 = vmatpush.bf16.msrb.mxu0 %v3711_v7  ;;  %v4648_v7 = vld [vmem:[#allocation2 + $0x144] sm:$0xf0] }
 0x482   :  { %754 = vadd.xlane.f32.xlu2 %v753_v19  ;;  %757 = vadd.xlane.f32.xlu0 %v756_v16  ;;  %v759_v54 = vsel %vm565_vm14, %v4933_v25, 0.0  ;;  %v3698_v19 = vld [vmem:[#allocation2 + $0xc] sm:$0xf]  ;;  %v4627_v16 = vld [vmem:[#allocation2 + $0x20] sm:$0xf0] }
 0x485   :  { %901 = vmatpush.bf16.msrb.mxu0 %v3707_v43  ;;  %v3780_v43 = vld [vmem:[#allocation2 + $0x148] sm:$0xf0] }
 0x48a   :  { %760 = vadd.xlane.f32.xlu2 %v759_v54 }
 0x48d   :  { %v780_v26 = vpop.permute.xlu1 %779 }
 0x48e   :  { %792 = vmatpush.bf16.msrb.mxu2 %v780_v26 }
 0x492   :  { %1117 = vmatpush.bf16.msra.mxu2 %v3791_v4 }
 0x496   :  { %804 = vrot.lane.b32.xlu0 %v5292_v35, %s5148_s27 }
 0x4ed   :  { %v752_v5 = vpop.xlane.xlu0 %751 }
 0x4ee   :  { %4934 = vrcp.f32 %v752_v5 }
 0x4f4   :  { %v4935_v28 = vpop.eup %4934 }
 0x4f5   :  { %v758_v20 = vpop.xlane.xlu0 %757  ;;  %v755_v27 = vpop.xlane.xlu2 %754  ;;  %v766_v29 = vmul.f32 %v4935_v28, %v4927_v36  ;;  %v4628_v36 = vld [vmem:[#allocation2 + $0x50] sm:$0xf0] }
 0x4f6   :  { %4936 = vrcp.f32 %v755_v27  ;;  %v3703_v17 = vor.u32 %v4628_v36, %v3702_v11  ;;  %v3783_v11 = vor.u32 %v4647_v8, %v3780_v43  ;;  %v3770_v36 = vld [vmem:[#allocation2 + $0x100] sm:$0xf] }
 0x4f7   :  { %4938 = vrcp.f32 %v758_v20  ;;  %v770_v23 = vpack.c.bf16 %v766_v29, %v766_v29  ;;  %v4888_v8 = vld [vmem:[%s5823_s2 + $0x3] ss:$0 sm:$0xff] }
 0x4f8   :  { %902 = vmatpush.bf16.msrb.mxu0 %v3703_v17  ;;  %1118 = vmatpush.bf16.msra.mxu2 %v3783_v11  ;;  %v3772_v17 = vld [vmem:[#allocation2 + $0x118] sm:$0xf0] }
 0x4f9   :  { %v776_v39 = vunpack.c.l.b16 %v770_v23 }
 0x4fc   :  { %v4937_v30 = vpop.eup %4936 }
 0x4fd   :  { %v761_v31 = vpop.xlane.xlu2 %760  ;;  %v4939_v34 = vpop.eup %4938  ;;  %v767_v37 = vmul.f32 %v4937_v30, %v4931_v18 }
 0x4fe   :  { %4940 = vrcp.f32 %v761_v31  ;;  %v768_v38 = vmul.f32 %v4939_v34, %v4929_v24 }
 0x4ff   :  { %v771_v15 = vpack.c.bf16 %v767_v37, %v767_v37 }
 0x500   :  { %v772_v42 = vpack.c.bf16 %v768_v38, %v768_v38 }
 0x501   :  { %v777_v40 = vunpack.c.l.b16 %v771_v15 }
 0x502   :  { %v801_v51 = vunpack.c.l.b16 %v772_v42 }
 0x503   :  { %v778_v35 = vpack.c.b16 %v777_v40, %v776_v39 }
 0x504   :  { %v4941_v41 = vpop.eup %4940 }
 0x505   :  { %v769_v44 = vmul.f32 %v4941_v41, %v4933_v25  ;;  %3694 = vmatmul.msk.bf16.vlgmr.msrb.gmra.mxu2 %vm565_vm14, %v778_v35  ;;  %v3699_v25 = vor.u32 %v4627_v16, %v3698_v19  ;;  %v4644_v19 = vld [vmem:[#allocation2 + $0xe4] sm:$0xf0]  ;;  %v4643_v16 = vld [vmem:[#allocation2 + $0xd4] sm:$0xf] }
 0x507   :  { %v773_v48 = vpack.c.bf16 %v769_v44, %v769_v44  ;;  %903 = vmatpush.bf16.msrb.mxu0 %v3699_v25 }
 0x508   :  { %v805_v49 = vpop.permute.xlu0 %804 }
 0x509   :  { %v802_v52 = vunpack.c.l.b16 %v773_v48  ;;  %817 = vmatpush.bf16.msrb.mxu3 %v805_v49 }
 0x50b   :  { %v803_v53 = vpack.c.b16 %v802_v52, %v801_v51 }
 0x50d   :  { %3695 = vmatmul.msk.bf16.vlgmr.msrb.gmra.mxu3 %vm565_vm14, %v803_v53 }
 0x588   :  { %v794_v6 = vpop.f32.mrf.mxu2 }
 0x590   :  { %v819_v12 = vpop.f32.mrf.mxu3  ;;  %v796_v13 = vpop.f32.mrf.mxu2 }
 0x591   :  { %v4863_v14 = vpack.i.bf16 %v796_v13, %v794_v6  ;;  %v3778_v6 = vld [vmem:[#allocation2 + $0x130] sm:$0xf]  ;;  %v4645_v13 = vld [vmem:[#allocation2 + $0x104] sm:$0xf] }
 0x592   :  { %v3779_v9 = vor.u32 %v4648_v7, %v3778_v6 }
 0x593   :  { %4864 = vrot.lane.b32.xlu2 %v4863_v14, %s5148_s27 }
 0x594   :  { %1099 = vmatpush.bf16.msra.mxu1 %v3779_v9 }
 0x598   :  { %v821_v24 = vpop.f32.mrf.mxu3 }
 0x599   :  { %v4868_v18 = vpack.i.bf16 %v821_v24, %v819_v12  ;;  %v4646_v12 = vld [vmem:[#allocation2 + $0x114] sm:$0xf0]  ;;  %v3775_v24 = vor.u32 %v4645_v13, %v3772_v17  ;;  %v4889_v13 = vld [vmem:[%s5823_s2 + $0x4] ss:$0 sm:$0xff] }
 0x59a   :  { %v3771_v14 = vor.u32 %v4646_v12, %v3770_v36 }
 0x59b   :  { %4869 = vrot.lane.b32.xlu1 %v4868_v18, %s5148_s27  ;;  %1119 = vmatpush.bf16.msra.mxu2 %v3775_v24  ;;  %v3762_v18 = vld [vmem:[#allocation2 + $0xd0] sm:$0xf] }
 0x59c   :  { %1100 = vmatpush.bf16.msra.mxu1 %v3771_v14  ;;  %v3763_v25 = vor.u32 %v4644_v19, %v3762_v18 }
 0x5a0   :  { %1101 = vmatpush.bf16.msra.mxu1 %v3763_v25 }
 0x5ed   :  { %v4865_v54 = vpop.permute.xlu2 %4864 }
 0x5ee   :  { %v4867_v26 = vunpack.i.h.bf16 %v4865_v54  ;;  %v4866_v5 = vunpack.i.l.bf16 %v4865_v54  ;;  %v3764_v54 = vld [vmem:[#allocation2 + $0xe8] sm:$0xf0] }
 0x5f0   :  { %v840_v20 = vsel %vm504_vm13, %v5331_v45, %v4866_v5  ;;  %v841_v27 = vsel %vm504_vm13, %v5333_v46, %v4867_v26  ;;  %v4887_v45 = vld [vmem:[%s5823_s2 + $0x2] ss:$0 sm:$0xff]  ;;  %v3767_v26 = vor.u32 %v4643_v16, %v3764_v54 }
 0x5f1   :  { %v844_v28 = vpack.c.bf16 %v841_v27, %v840_v20  ;;  %v3754_v5 = vld [vmem:[#allocation2 + $0xa0] sm:$0xf]  ;;  %v4642_v20 = vld [vmem:[#allocation2 + $0xb4] sm:$0xf0]  ;;  %v4641_v27 = vld [vmem:[#allocation2 + $0xa4] sm:$0xf] }
 0x5f2   :  { %1120 = vmatpush.bf16.msra.mxu2 %v3767_v26 }
 0x5f3   :  { %904 = vmatmul.bf16.vlgmr.msrb.gmra.mxu0 %v844_v28  ;;  %v3755_v28 = vor.u32 %v4642_v20, %v3754_v5 }
 0x5f5   :  { %1102 = vmatpush.bf16.msra.mxu1 %v3755_v28 }
 0x60d   :  { %v4870_v29 = vpop.permute.xlu1 %4869 }
 0x60e   :  { %v4872_v30 = vunpack.i.h.bf16 %v4870_v29  ;;  %v4871_v31 = vunpack.i.l.bf16 %v4870_v29  ;;  %v3756_v29 = vld [vmem:[#allocation2 + $0xb8] sm:$0xf0] }
 0x610   :  { %v842_v34 = vsel %vm504_vm13, %v5335_v47, %v4871_v31  ;;  %v843_v23 = vsel %vm504_vm13, %v5337_v50, %v4872_v30  ;;  %v3759_v30 = vor.u32 %v4641_v27, %v3756_v29  ;;  %v3746_v31 = vld [vmem:[#allocation2 + $0x70] sm:$0xf] }
 0x611   :  { %v845_v37 = vpack.c.bf16 %v843_v23, %v842_v34  ;;  %v4640_v34 = vld [vmem:[#allocation2 + $0x84] sm:$0xf0]  ;;  %v4639_v23 = vld [vmem:[#allocation2 + $0x74] sm:$0xf] }
 0x612   :  { %1121 = vmatpush.bf16.msra.mxu2 %v3759_v30 }
 0x613   :  { %909 = vmatmul.bf16.gmra.mxu0 %v845_v37  ;;  %v3747_v37 = vor.u32 %v4640_v34, %v3746_v31 }
 0x615   :  { %1103 = vmatpush.bf16.msra.mxu1 %v3747_v37 }
 0x670   :  { %v905_v15 = vpop.f32.mrf.mxu0 }
 0x671   :  { %v906_v38 = vadd.f32 %v4887_v45, %v905_v15 }
 0x673   :  { %v915_v46 = vadd.f32 %v906_v38, %v5260_v21  ;;  %v3738_v38 = vld [vmem:[#allocation2 + $0x40] sm:$0xf] }
 0x675   :  { %921 = vadd.xlane.f32.xlu0 %v915_v46 }
 0x678   :  { %v907_v39 = vpop.f32.mrf.mxu0 }
 0x679   :  { %v908_v40 = vadd.f32 %v4887_v45, %v907_v39  ;;  %v4637_v39 = vld [vmem:[#allocation2 + $0x44] sm:$0xf] }
 0x67b   :  { %v916_v41 = vadd.f32 %v908_v40, %v5262_v22 }
 0x67d   :  { %923 = vadd.xlane.f32.xlu1 %v916_v41 }
 0x690   :  { %v910_v47 = vpop.f32.mrf.mxu0 }
 0x691   :  { %v911_v35 = vadd.f32 %v4887_v45, %v910_v47 }
 0x693   :  { %v917_v50 = vadd.f32 %v911_v35, %v5270_v33 }
 0x695   :  { %925 = vadd.xlane.f32.xlu2 %v917_v50 }
 0x698   :  { %v912_v42 = vpop.f32.mrf.mxu0 }
 0x699   :  { %v913_v44 = vadd.f32 %v4887_v45, %v912_v42  ;;  %v3748_v45 = vld [vmem:[#allocation2 + $0x88] sm:$0xf0]  ;;  %v3730_v42 = vld [vmem:[#allocation2 + $0x10] sm:$0xf] }
 0x69a   :  { %v3751_v15 = vor.u32 %v4639_v23, %v3748_v45 }
 0x69b   :  { %v918_v48 = vadd.f32 %v913_v44, %v5268_v32  ;;  %v4636_v44 = vld [vmem:[#allocation2 + $0x24] sm:$0xf0] }
 0x69c   :  { %1122 = vmatpush.bf16.msra.mxu2 %v3751_v15 }
 0x69d   :  { %927 = vadd.xlane.f32.xlu0 %v918_v48 }
 0x6e8   :  { %v922_v49 = vpop.xlane.xlu0 %921 }
 0x6e9   :  { %v929_v51 = vmul.f32 %v922_v49, %v5226_v10  ;;  %v3731_v49 = vor.u32 %v4636_v44, %v3730_v42  ;;  %v4656_v42 = vld [vmem:[%s5826_s5 + $0x28] sm:$0xff]  ;;  %v4665_v44 = vld [vmem:[%s5826_s5 + $0x70] sm:$0xff] }
 0x6eb   :  { %v5375_v21 = vsub.f32 %v915_v46, %v929_v51  ;;  %v4638_v46 = vld [vmem:[#allocation2 + $0x54] sm:$0xf0]  ;;  %v3732_v51 = vld [vmem:[#allocation2 + $0x28] sm:$0xf0] }
 0x6ec   :  { %v3739_v40 = vor.u32 %v4638_v46, %v3738_v38 }
 0x6ed   :  { %v937_v52 = vmul.f32 %v5375_v21, %v5375_v21 }
 0x6ee   :  { %1104 = vmatpush.bf16.msra.mxu1 %v3739_v40 }
 0x6ef   :  { %941 = vadd.xlane.f32.xlu1 %v937_v52 }
 0x6f0   :  { %v924_v22 = vpop.xlane.xlu1 %923 }
 0x6f1   :  { %v930_v53 = vmul.f32 %v924_v22, %v5226_v10 }
 0x6f2   :  { %1105 = vmatpush.bf16.msra.mxu1 %v3731_v49  ;;  %v4664_v49 = vld [vmem:[%s5826_s5 + $0x68] sm:$0xff] }
 0x6f3   :  { %v5380_v55 = vsub.f32 %v916_v41, %v930_v53  ;;  %v3740_v41 = vld [vmem:[#allocation2 + $0x58] sm:$0xf0] }
 0x6f4   :  { %v3743_v47 = vor.u32 %v4637_v39, %v3740_v41 }
 0x6f5   :  { %v938_v33 = vmul.f32 %v5380_v55, %v5380_v55 }
 0x6f6   :  { %1123 = vmatpush.bf16.msra.mxu2 %v3743_v47 }
 0x6f7   :  { %943 = vadd.xlane.f32.xlu2 %v938_v33 }
 0x708   :  { %v926_v32 = vpop.xlane.xlu2 %925 }
 0x709   :  { %v931_v56 = vmul.f32 %v926_v32, %v5226_v10 }
 0x70b   :  { %v5385_v57 = vsub.f32 %v917_v50, %v931_v56 }
 0x70d   :  { %v939_v58 = vmul.f32 %v5385_v57, %v5385_v57 }
 0x70f   :  { %945 = vadd.xlane.f32.xlu0 %v939_v58 }
 0x710   :  { %v928_v59 = vpop.xlane.xlu0 %927 }
 0x711   :  { %v932_v60 = vmul.f32 %v928_v59, %v5226_v10 }
 0x713   :  { %v5390_v61 = vsub.f32 %v918_v48, %v932_v60  ;;  %v4635_v48 = vld [vmem:[#allocation2 + $0x14] sm:$0xf] }
 0x714   :  { %v3735_v22 = vor.u32 %v4635_v48, %v3732_v51  ;;  %v4655_v48 = vld [vmem:[%s5826_s5 + $0x20] sm:$0xff]  ;;  %v4654_v51 = vld [vmem:[%s5826_s5 + $0x18] sm:$0xff] }
 0x715   :  { %v940_v62 = vmul.f32 %v5390_v61, %v5390_v61 }
 0x716   :  { %1124 = vmatpush.bf16.msra.mxu2 %v3735_v22  ;;  %v4653_v22 = vld [vmem:[%s5826_s5 + $0x10] sm:$0xff] }
 0x717   :  { %947 = vadd.xlane.f32.xlu1 %v940_v62 }
 0x762   :  { %v942_v35 = vpop.xlane.xlu1 %941 }
 0x763   :  { %v949_v50 = vmul.f32 %v942_v35, %v5226_v10 }
 0x765   :  { %v953_v52 = vadd.f32 1e-12, %v949_v50  ;;  %v4666_v50 = vld [vmem:[%s5826_s5 + $0x78] sm:$0xff] }
 0x766   :  { %1329 = vmatpush.bf16.msra.mxu0 %v4666_v50 }
 0x767   :  { %4942 = vrsqrt.f32 %v953_v52  ;;  %vm963_vm0 = vweird.f32 %v953_v52 }
 0x76a   :  { %v944_v53 = vpop.xlane.xlu2 %943  ;;  %1330 = vmatpush.bf16.msra.mxu0 %v4665_v44 }
 0x76b   :  { %v950_v33 = vmul.f32 %v944_v53, %v5226_v10  ;;  %v4662_v53 = vld [vmem:[%s5826_s5 + $0x58] sm:$0xff] }
 0x76d   :  { %v4943_v32 = vpop.eup %4942  ;;  %v954_v56 = vadd.f32 1e-12, %v950_v33  ;;  %v3591_v33 = vld [vmem:[%s5824_s3 + $0x6] ss:$2 sm:$0x3] }
 0x76e   :  { %v958_v58 = vmul.f32 %v4943_v32, %v953_v52  ;;  %vm964_vm15 = vweird.f32 %v4943_v32  ;;  %1331 = vmatpush.bf16.msra.mxu0 %v4664_v49  ;;  %v4663_v52 = vld [vmem:[%s5826_s5 + $0x60] sm:$0xff] }
 0x76f   :  { %4944 = vrsqrt.f32 %v954_v56  ;;  %vm965_vm1 = vmor %vm963_vm0, %vm964_vm15  ;;  %vm973_vm3 = vweird.f32 %v954_v56 }
 0x770   :  { %v959_v59 = vmul.f32 %v4943_v32, %v958_v58  ;;  %v4661_v58 = vld [vmem:[%s5826_s5 + $0x50] sm:$0xff] }
 0x772   :  { %v960_v60 = vmul.f32 0.5, %v959_v59  ;;  %1332 = vmatpush.bf16.msra.mxu0 %v4663_v52  ;;  %v4651_v59 = vld [vmem:[%s5826_s5] sm:$0xff] }
 0x774   :  { %v961_v62 = vsub.f32 1.5, %v960_v60 }
 0x775   :  { %v4945_v63 = vpop.eup %4944 }
 0x776   :  { %v962_v0 = vmul.f32 %v4943_v32, %v961_v62  ;;  %v968_v1 = vmul.f32 %v4945_v63, %v954_v56  ;;  %vm974_vm2 = vweird.f32 %v4945_v63  ;;  %1333 = vmatpush.bf16.msra.mxu0 %v4662_v53  ;;  %v5459_v56 = vperm.slane %v3591_v33, 0 }
 0x777   :  { %vm975_vm4 = vmor %vm973_vm3, %vm974_vm2 }
 0x778   :  { %v969_v2 = vmul.f32 %v4945_v63, %v968_v1  ;;  %v966_v3 = vsel %vm965_vm1, %v4943_v32, %v962_v0  ;;  %v4652_v32 = vld [vmem:[%s5826_s5 + $0x8] sm:$0xff]  ;;  %v5471_v1 = vperm.slane %v3591_v33, 1 }
 0x779   :  { %v997_v7 = vmul.f32 %v966_v3, %v5375_v21  ;;  %v4659_v3 = vld [vmem:[%s5826_s5 + $0x40] sm:$0xff] }
 0x77a   :  { %v970_v4 = vmul.f32 0.5, %v969_v2  ;;  %1334 = vmatpush.bf16.msra.mxu0 %v4661_v58 }
 0x77b   :  { %v1002_v12 = vmul.f32 %v4888_v8, %v997_v7 }
 0x77c   :  { %v971_v6 = vsub.f32 1.5, %v970_v4 }
 0x77d   :  { %v5405_v24 = vadd.f32 %v4889_v13, %v1002_v12 }
 0x77e   :  { %v972_v9 = vmul.f32 %v4945_v63, %v971_v6 }
 0x780   :  { %v976_v43 = vsel %vm975_vm4, %v4945_v63, %v972_v9  ;;  %v4660_v63 = vld [vmem:[%s5826_s5 + $0x48] sm:$0xff] }
 0x781   :  { %v998_v11 = vmul.f32 %v976_v43, %v5380_v55  ;;  %1335 = vmatpush.bf16.msra.mxu0 %v4660_v63 }
 0x782   :  { %v946_v36 = vpop.xlane.xlu0 %945 }
 0x783   :  { %v951_v14 = vmul.f32 %v946_v36, %v5226_v10  ;;  %v1003_v17 = vmul.f32 %v4888_v8, %v998_v11 }
 0x785   :  { %v955_v21 = vadd.f32 1e-12, %v951_v14  ;;  %v5407_v18 = vadd.f32 %v4889_v13, %v1003_v17  ;;  %1336 = vmatpush.bf16.msra.mxu0 %v4659_v3 }
 0x787   :  { %4946 = vrsqrt.f32 %v955_v21  ;;  %v1011_v19 = vpack.c.bf16 %v5407_v18, %v5405_v24  ;;  %vm983_vm6 = vweird.f32 %v955_v21 }
 0x789   :  { %1106 = vmatmul.bf16.vlgmr.msra.gmra.mxu1 %v1011_v19  ;;  %1125 = vmatmul.bf16.vlgmr.msra.gmra.mxu2 %v1011_v19 }
 0x78a   :  { %v948_v55 = vpop.xlane.xlu1 %947 }
 0x78b   :  { %v952_v16 = vmul.f32 %v948_v55, %v5226_v10 }
 0x78d   :  { %v4947_v25 = vpop.eup %4946  ;;  %v956_v54 = vadd.f32 1e-12, %v952_v16 }
 0x78e   :  { %v978_v26 = vmul.f32 %v4947_v25, %v955_v21  ;;  %vm984_vm5 = vweird.f32 %v4947_v25 }
 0x78f   :  { %4948 = vrsqrt.f32 %v956_v54  ;;  %vm985_vm7 = vmor %vm983_vm6, %vm984_vm5  ;;  %vm993_vm9 = vweird.f32 %v956_v54 }
 0x790   :  { %v979_v5 = vmul.f32 %v4947_v25, %v978_v26 }
 0x792   :  { %v980_v20 = vmul.f32 0.5, %v979_v5 }
 0x794   :  { %v981_v27 = vsub.f32 1.5, %v980_v20 }
 0x795   :  { %v4949_v28 = vpop.eup %4948 }
 0x796   :  { %v982_v29 = vmul.f32 %v4947_v25, %v981_v27  ;;  %v988_v30 = vmul.f32 %v4949_v28, %v956_v54  ;;  %vm994_vm8 = vweird.f32 %v4949_v28 }
 0x797   :  { %vm995_vm10 = vmor %vm993_vm9, %vm994_vm8 }
 0x798   :  { %v989_v31 = vmul.f32 %v4949_v28, %v988_v30  ;;  %v986_v23 = vsel %vm985_vm7, %v4947_v25, %v982_v29 }
 0x799   :  { %v999_v45 = vmul.f32 %v986_v23, %v5385_v57  ;;  %v4658_v57 = vld [vmem:[%s5826_s5 + $0x38] sm:$0xff] }
 0x79a   :  { %v990_v34 = vmul.f32 0.5, %v989_v31  ;;  %1310 = vmatpush.bf16.msra.mxu3 %v4658_v57 }
 0x79b   :  { %v1004_v39 = vmul.f32 %v4888_v8, %v999_v45 }
 0x79c   :  { %v991_v37 = vsub.f32 1.5, %v990_v34 }
 0x79d   :  { %v5414_v41 = vadd.f32 %v4889_v13, %v1004_v39 }
 0x79e   :  { %v992_v15 = vmul.f32 %v4949_v28, %v991_v37 }
 0x7a0   :  { %v996_v38 = vsel %vm995_vm10, %v4949_v28, %v992_v15 }
 0x7a1   :  { %v1000_v46 = vmul.f32 %v996_v38, %v5390_v61  ;;  %v4657_v61 = vld [vmem:[%s5826_s5 + $0x30] sm:$0xff] }
 0x7a2   :  { %1311 = vmatpush.bf16.msra.mxu3 %v4657_v61 }
 0x7a3   :  { %v1005_v40 = vmul.f32 %v4888_v8, %v1000_v46 }
 0x7a5   :  { %v5416_v47 = vadd.f32 %v4889_v13, %v1005_v40 }
 0x7a6   :  { %1312 = vmatpush.bf16.msra.mxu3 %v4656_v42 }
 0x7a7   :  { %v1012_v35 = vpack.c.bf16 %v5416_v47, %v5414_v41 }
 0x7a9   :  { %1111 = vmatmul.bf16.gmra.mxu1 %v1012_v35  ;;  %1130 = vmatmul.bf16.gmra.mxu2 %v1012_v35 }
 0x7aa   :  { %1313 = vmatpush.bf16.msra.mxu3 %v4655_v48 }
 0x7ae   :  { %1314 = vmatpush.bf16.msra.mxu3 %v4654_v51 }
 0x7b2   :  { %1315 = vmatpush.bf16.msra.mxu3 %v4653_v22 }
 0x7b6   :  { %1316 = vmatpush.bf16.msra.mxu3 %v4652_v32 }
 0x7ba   :  { %1317 = vmatpush.bf16.msra.mxu3 %v4651_v59 }
 0x806   :  { %v1107_v60 = vpop.f32.mrf.mxu1 }
 0x807   :  { %v1108_v62 = vadd.f32 %v1107_v60, %v5459_v56 }
 0x809   :  { %v1136_v0 = vmul.f32 %v1108_v62, %v1108_v62 }
 0x80b   :  { %v1144_v2 = vmul.f32 %v1136_v0, %v1108_v62 }
 0x80c   :  { %v1126_v4 = vpop.f32.mrf.mxu2 }
 0x80d   :  { %v1152_v6 = vmul.f32 0.044715, %v1144_v2  ;;  %v1127_v7 = vadd.f32 %v1126_v4, %v5471_v1 }
 0x80e   :  { %v1109_v8 = vpop.f32.mrf.mxu1 }
 0x80f   :  { %v1160_v9 = vadd.f32 %v1152_v6, %v1108_v62  ;;  %v1137_v43 = vmul.f32 %v1127_v7, %v1127_v7  ;;  %v1110_v11 = vadd.f32 %v1109_v8, %v5459_v56 }
 0x811   :  { %v1168_v36 = vmul.f32 0.7978846, %v1160_v9  ;;  %v1145_v12 = vmul.f32 %v1137_v43, %v1127_v7  ;;  %v1138_v13 = vmul.f32 %v1110_v11, %v1110_v11 }
 0x813   :  { %v1153_v14 = vmul.f32 0.044715, %v1145_v12  ;;  %v1146_v17 = vmul.f32 %v1138_v13, %v1110_v11  ;;  %4950 = vtanh.f32 %v1168_v36 }
 0x814   :  { %v1128_v21 = vpop.f32.mrf.mxu2 }
 0x815   :  { %v1161_v19 = vadd.f32 %v1153_v14, %v1127_v7  ;;  %v1154_v55 = vmul.f32 0.044715, %v1146_v17  ;;  %v1129_v16 = vadd.f32 %v1128_v21, %v5471_v1 }
 0x817   :  { %v1169_v25 = vmul.f32 0.7978846, %v1161_v19  ;;  %v1162_v54 = vadd.f32 %v1154_v55, %v1110_v11  ;;  %v1139_v26 = vmul.f32 %v1129_v16, %v1129_v16 }
 0x819   :  { %v1170_v5 = vmul.f32 0.7978846, %v1162_v54  ;;  %v1147_v20 = vmul.f32 %v1139_v26, %v1129_v16  ;;  %4952 = vtanh.f32 %v1169_v25  ;;  %v4951_v27 = vpop.eup %4950 }
 0x81a   :  { %v1184_v30 = vadd.f32 1.0, %v4951_v27 }
 0x81b   :  { %4954 = vtanh.f32 %v1170_v5  ;;  %v1155_v28 = vmul.f32 0.044715, %v1147_v20 }
 0x81c   :  { %v1192_v37 = vmul.f32 0.5, %v1184_v30 }
 0x81d   :  { %v1163_v29 = vadd.f32 %v1155_v28, %v1129_v16 }
 0x81e   :  { %v1200_v39 = vmul.f32 %v1192_v37, %v1108_v62 }
 0x81f   :  { %v1171_v31 = vmul.f32 0.7978846, %v1163_v29  ;;  %v4953_v34 = vpop.eup %4952 }
 0x820   :  { %v1185_v15 = vadd.f32 1.0, %v4953_v34 }
 0x821   :  { %v4955_v23 = vpop.eup %4954  ;;  %4956 = vtanh.f32 %v1171_v31 }
 0x822   :  { %v1186_v45 = vadd.f32 1.0, %v4955_v23  ;;  %v1193_v61 = vmul.f32 0.5, %v1185_v15 }
 0x824   :  { %v1194_v38 = vmul.f32 0.5, %v1186_v45  ;;  %v1201_v52 = vmul.f32 %v1193_v61, %v1127_v7  ;;  %v4890_v45 = vld [vmem:[%s5823_s2 + $0x5] ss:$0 sm:$0xff] }
 0x826   :  { %v1112_v46 = vpop.f32.mrf.mxu1  ;;  %v1202_v40 = vmul.f32 %v1194_v38, %v1110_v11 }
 0x827   :  { %v1113_v35 = vadd.f32 %v1112_v46, %v5459_v56  ;;  %v4957_v57 = vpop.eup %4956 }
 0x828   :  { %v1187_v50 = vadd.f32 1.0, %v4957_v57  ;;  %v1208_v44 = vpack.c.bf16 %v1202_v40, %v1200_v39 }
 0x829   :  { %v1140_v42 = vmul.f32 %v1113_v35, %v1113_v35 }
 0x82a   :  { %v1195_v48 = vmul.f32 0.5, %v1187_v50  ;;  %1318 = vmatmul.bf16.vlgmr.msra.gmra.mxu3 %v1208_v44 }
 0x82b   :  { %v1148_v49 = vmul.f32 %v1140_v42, %v1113_v35 }
 0x82c   :  { %v1131_v51 = vpop.f32.mrf.mxu2  ;;  %v1203_v22 = vmul.f32 %v1195_v48, %v1129_v16 }
 0x82d   :  { %v1156_v53 = vmul.f32 0.044715, %v1148_v49  ;;  %v1132_v33 = vadd.f32 %v1131_v51, %v5471_v1 }
 0x82e   :  { %v1114_v32 = vpop.f32.mrf.mxu1  ;;  %v1209_v62 = vpack.c.bf16 %v1203_v22, %v1201_v52 }
 0x82f   :  { %v1164_v58 = vadd.f32 %v1156_v53, %v1113_v35  ;;  %v1141_v59 = vmul.f32 %v1132_v33, %v1132_v33  ;;  %v1115_v60 = vadd.f32 %v1114_v32, %v5459_v56 }
 0x830   :  { %1337 = vmatmul.bf16.vlgmr.msra.gmra.mxu0 %v1209_v62 }
 0x831   :  { %v1149_v63 = vmul.f32 %v1141_v59, %v1132_v33  ;;  %v1142_v0 = vmul.f32 %v1115_v60, %v1115_v60  ;;  %v1172_v2 = vmul.f32 0.7978846, %v1164_v58 }
 0x833   :  { %v1157_v3 = vmul.f32 0.044715, %v1149_v63  ;;  %v1150_v4 = vmul.f32 %v1142_v0, %v1115_v60  ;;  %4958 = vtanh.f32 %v1172_v2 }
 0x834   :  { %v1133_v6 = vpop.f32.mrf.mxu2 }
 0x835   :  { %v1165_v8 = vadd.f32 %v1157_v3, %v1132_v33  ;;  %v1158_v9 = vmul.f32 0.044715, %v1150_v4  ;;  %v1134_v7 = vadd.f32 %v1133_v6, %v5471_v1 }
 0x837   :  { %v1166_v43 = vadd.f32 %v1158_v9, %v1115_v60  ;;  %v1143_v11 = vmul.f32 %v1134_v7, %v1134_v7  ;;  %v1173_v36 = vmul.f32 0.7978846, %v1165_v8 }
 0x839   :  { %v1151_v12 = vmul.f32 %v1143_v11, %v1134_v7  ;;  %v1174_v13 = vmul.f32 0.7978846, %v1166_v43  ;;  %4960 = vtanh.f32 %v1173_v36  ;;  %v4959_v56 = vpop.eup %4958  ;;  %v3976_v43 = vld [vmem:[#allocation2 + $0x2d0] sm:$0xf]  ;;  %v4689_v11 = vld [vmem:[#allocation2 + $0x2e4] sm:$0xf0] }
 0x83a   :  { %v1188_v21 = vadd.f32 1.0, %v4959_v56  ;;  %v4688_v36 = vld [vmem:[#allocation2 + $0x2d4] sm:$0xf]  ;;  %v3984_v56 = vld [vmem:[#allocation2 + $0x2d8] sm:$0xf] }
 0x83b   :  { %v1159_v14 = vmul.f32 0.044715, %v1151_v12  ;;  %4962 = vtanh.f32 %v1174_v13  ;;  %v3977_v12 = vor.u32 %v4689_v11, %v3976_v43  ;;  %v3978_v13 = vld [vmem:[#allocation2 + $0x2e8] sm:$0xf0]  ;;  %v3912_v43 = vld [vmem:[#allocation2 + $0x1b8] sm:$0xf] }
 0x83c   :  { %v1196_v54 = vmul.f32 0.5, %v1188_v21  ;;  %v4672_v11 = vld [vmem:[#allocation2 + $0x1cc] sm:$0xf0] }
 0x83d   :  { %v1167_v17 = vadd.f32 %v1159_v14, %v1134_v7  ;;  %v4690_v14 = vld [vmem:[#allocation2 + $0x2ec] sm:$0xf0]  ;;  %1683 = vmatpush.bf16.msrb.mxu0 %v3977_v12  ;;  %4843 = vmatpush.bf16.msrb.mxu1 %v3977_v12  ;;  %v3913_v12 = vor.u32 %v4672_v11, %v3912_v43 }
 0x83e   :  { %v1204_v5 = vmul.f32 %v1196_v54, %v1113_v35  ;;  %v3985_v21 = vor.u32 %v4690_v14, %v3984_v56  ;;  %v3966_v54 = vld [vmem:[#allocation2 + $0x2b8] sm:$0xf0]  ;;  %v3892_v14 = vld [vmem:[#allocation2 + $0x180] sm:$0xf] }
 0x83f   :  { %v1175_v19 = vmul.f32 0.7978846, %v1167_v17  ;;  %v4961_v55 = vpop.eup %4960  ;;  %v3981_v17 = vor.u32 %v4688_v36, %v3978_v13 }
 0x840   :  { %v1189_v1 = vadd.f32 1.0, %v4961_v55  ;;  %1721 = vmatpush.bf16.msrb.mxu3 %v3985_v21  ;;  %v4686_v55 = vld [vmem:[#allocation2 + $0x2b4] sm:$0xf0]  ;;  %v4667_v21 = vld [vmem:[#allocation2 + $0x184] sm:$0xf] }
 0x841   :  { %v4963_v16 = vpop.eup %4962  ;;  %4964 = vtanh.f32 %v1175_v19  ;;  %1702 = vmatpush.bf16.msrb.mxu2 %v3981_v17  ;;  %v3964_v19 = vld [vmem:[#allocation2 + $0x2a0] sm:$0xf]  ;;  %v4668_v17 = vld [vmem:[#allocation2 + $0x194] sm:$0xf0] }
 0x842   :  { %v1190_v25 = vadd.f32 1.0, %v4963_v16  ;;  %v1197_v30 = vmul.f32 0.5, %v1189_v1  ;;  %v4685_v16 = vld [vmem:[#allocation2 + $0x2a4] sm:$0xf]  ;;  %v4687_v1 = vld [vmem:[#allocation2 + $0x2bc] sm:$0xf0] }
 0x844   :  { %v1198_v26 = vmul.f32 0.5, %v1190_v25  ;;  %v1205_v34 = vmul.f32 %v1197_v30, %v1132_v33  ;;  %v3965_v25 = vor.u32 %v4686_v55, %v3964_v19  ;;  %v3893_v19 = vor.u32 %v4668_v17, %v3892_v14  ;;  %v3894_v55 = vld [vmem:[#allocation2 + $0x198] sm:$0xf0] }
 0x846   :  { %v1206_v20 = vmul.f32 %v1198_v26, %v1115_v60  ;;  %v3972_v26 = vld [vmem:[#allocation2 + $0x2a8] sm:$0xf]  ;;  %1684 = vmatpush.bf16.msrb.mxu0 %v3965_v25  ;;  %4844 = vmatpush.bf16.msrb.mxu1 %v3965_v25  ;;  %v4669_v25 = vld [vmem:[#allocation2 + $0x19c] sm:$0xf0] }
 0x847   :  { %v4965_v27 = vpop.eup %4964 }
 0x848   :  { %v1210_v28 = vpack.c.bf16 %v1206_v20, %v1204_v5  ;;  %v1191_v29 = vadd.f32 1.0, %v4965_v27  ;;  %v3969_v5 = vor.u32 %v4685_v16, %v3966_v54  ;;  %v3973_v20 = vor.u32 %v4687_v1, %v3972_v26  ;;  %v3952_v27 = vld [vmem:[#allocation2 + $0x270] sm:$0xf]  ;;  %v3900_v16 = vld [vmem:[#allocation2 + $0x188] sm:$0xf] }
 0x849   :  { %v3897_v26 = vor.u32 %v4667_v21, %v3894_v55  ;;  %v3901_v1 = vor.u32 %v4669_v25, %v3900_v16 }
 0x84a   :  { %1323 = vmatmul.bf16.gmra.mxu3 %v1210_v28  ;;  %v1199_v31 = vmul.f32 0.5, %v1191_v29  ;;  %1703 = vmatpush.bf16.msrb.mxu2 %v3969_v5  ;;  %v4683_v28 = vld [vmem:[#allocation2 + $0x284] sm:$0xf0]  ;;  %v4682_v29 = vld [vmem:[#allocation2 + $0x274] sm:$0xf] }
 0x84b   :  { %1722 = vmatpush.bf16.msrb.mxu3 %v3973_v20  ;;  %v3953_v30 = vor.u32 %v4683_v28, %v3952_v27 }
 0x84c   :  { %v1207_v23 = vmul.f32 %v1199_v31, %v1134_v7  ;;  %v3954_v31 = vld [vmem:[#allocation2 + $0x288] sm:$0xf0] }
 0x84d   :  { %1685 = vmatpush.bf16.msrb.mxu0 %v3953_v30  ;;  %4845 = vmatpush.bf16.msrb.mxu1 %v3953_v30 }
 0x84e   :  { %v1211_v37 = vpack.c.bf16 %v1207_v23, %v1205_v34  ;;  %v3960_v34 = vld [vmem:[#allocation2 + $0x278] sm:$0xf]  ;;  %v4684_v23 = vld [vmem:[#allocation2 + $0x28c] sm:$0xf0] }
 0x850   :  { %1342 = vmatmul.bf16.gmra.mxu0 %v1211_v37  ;;  %v3957_v37 = vor.u32 %v4682_v29, %v3954_v31 }
 0x852   :  { %1704 = vmatpush.bf16.msrb.mxu2 %v3957_v37 }
 0x8ad   :  { %v1319_v15 = vpop.f32.mrf.mxu3  ;;  %v1338_v38 = vpop.f32.mrf.mxu0 }
 0x8ae   :  { %v1320_v46 = vadd.f32 %v4890_v45, %v1319_v15  ;;  %v3940_v15 = vld [vmem:[#allocation2 + $0x240] sm:$0xf] }
 0x8b0   :  { %v1339_v39 = vadd.f32 %v1338_v38, %v1320_v46  ;;  %v4680_v38 = vld [vmem:[#allocation2 + $0x254] sm:$0xf0]  ;;  %v4679_v46 = vld [vmem:[#allocation2 + $0x244] sm:$0xf] }
 0x8b2   :  { %v1348_v40 = vadd.f32 %v1339_v39, %v5405_v24  ;;  %v3941_v39 = vor.u32 %v4680_v38, %v3940_v15 }
 0x8b4   :  { %1354 = vadd.xlane.f32.xlu2 %v1348_v40  ;;  %1686 = vmatpush.bf16.msrb.mxu0 %v3941_v39 }
 0x8b5   :  { %v1321_v35 = vpop.f32.mrf.mxu3  ;;  %v1340_v61 = vpop.f32.mrf.mxu0  ;;  %4846 = vmatpush.bf16.msrb.mxu1 %v3941_v39 }
 0x8b6   :  { %v1322_v57 = vadd.f32 %v4890_v45, %v1321_v35  ;;  %v3948_v35 = vld [vmem:[#allocation2 + $0x248] sm:$0xf] }
 0x8b8   :  { %v1341_v50 = vadd.f32 %v1340_v61, %v1322_v57  ;;  %v4681_v57 = vld [vmem:[#allocation2 + $0x25c] sm:$0xf0] }
 0x8ba   :  { %v1349_v42 = vadd.f32 %v1341_v50, %v5407_v18  ;;  %v3949_v50 = vor.u32 %v4681_v57, %v3948_v35  ;;  %v4891_v35 = vld [vmem:[%s5823_s2 + $0x6] ss:$0 sm:$0xff] }
 0x8bc   :  { %1356 = vadd.xlane.f32.xlu0 %v1349_v42 }
 0x8cd   :  { %v1324_v44 = vpop.f32.mrf.mxu3  ;;  %v1343_v48 = vpop.f32.mrf.mxu0 }
 0x8ce   :  { %v1325_v49 = vadd.f32 %v4890_v45, %v1324_v44  ;;  %v4677_v44 = vld [vmem:[#allocation2 + $0x224] sm:$0xf0] }
 0x8d0   :  { %v1344_v51 = vadd.f32 %v1343_v48, %v1325_v49  ;;  %v4676_v48 = vld [vmem:[#allocation2 + $0x214] sm:$0xf] }
 0x8d2   :  { %v1350_v52 = vadd.f32 %v1344_v51, %v5414_v41  ;;  %v3930_v51 = vld [vmem:[#allocation2 + $0x228] sm:$0xf0] }
 0x8d4   :  { %1358 = vadd.xlane.f32.xlu1 %v1350_v52 }
 0x8d5   :  { %v1326_v22 = vpop.f32.mrf.mxu3  ;;  %v1345_v33 = vpop.f32.mrf.mxu0 }
 0x8d6   :  { %v1327_v53 = vadd.f32 %v4890_v45, %v1326_v22  ;;  %v3961_v45 = vor.u32 %v4684_v23, %v3960_v34  ;;  %v4678_v22 = vld [vmem:[#allocation2 + $0x22c] sm:$0xf0] }
 0x8d8   :  { %v1346_v32 = vadd.f32 %v1345_v33, %v1327_v53  ;;  %1723 = vmatpush.bf16.msrb.mxu3 %v3961_v45  ;;  %v3933_v53 = vor.u32 %v4676_v48, %v3930_v51  ;;  %v4892_v48 = vld [vmem:[%s5823_s2 + $0x7] ss:$0 sm:$0xff] }
 0x8da   :  { %v1351_v24 = vadd.f32 %v1346_v32, %v5416_v47  ;;  %v3916_v32 = vld [vmem:[#allocation2 + $0x1e0] sm:$0xf] }
 0x8dc   :  { %1360 = vadd.xlane.f32.xlu2 %v1351_v24  ;;  %1724 = vmatpush.bf16.msrb.mxu3 %v3949_v50 }
 0x927   :  { %v1355_v58 = vpop.xlane.xlu2 %1354 }
 0x928   :  { %v1362_v59 = vmul.f32 %v1355_v58, %v5226_v10  ;;  %v4673_v58 = vld [vmem:[#allocation2 + $0x1e4] sm:$0xf] }
 0x92a   :  { %v5491_v60 = vsub.f32 %v1348_v40, %v1362_v59  ;;  %v3942_v40 = vld [vmem:[#allocation2 + $0x258] sm:$0xf0] }
 0x92b   :  { %v3945_v61 = vor.u32 %v4679_v46, %v3942_v40 }
 0x92c   :  { %v1370_v18 = vmul.f32 %v5491_v60, %v5491_v60 }
 0x92d   :  { %1705 = vmatpush.bf16.msrb.mxu2 %v3945_v61 }
 0x92e   :  { %1374 = vadd.xlane.f32.xlu0 %v1370_v18  ;;  %v3918_v18 = vld [vmem:[#allocation2 + $0x1f8] sm:$0xf0] }
 0x92f   :  { %v1357_v62 = vpop.xlane.xlu0 %1356 }
 0x930   :  { %v1363_v41 = vmul.f32 %v1357_v62, %v5226_v10  ;;  %v3924_v62 = vld [vmem:[#allocation2 + $0x1e8] sm:$0xf] }
 0x931   :  { %1706 = vmatpush.bf16.msrb.mxu2 %v3933_v53 }
 0x932   :  { %v5496_v63 = vsub.f32 %v1349_v42, %v1363_v41  ;;  %v3928_v42 = vld [vmem:[#allocation2 + $0x210] sm:$0xf]  ;;  %v4675_v41 = vld [vmem:[#allocation2 + $0x1fc] sm:$0xf0] }
 0x933   :  { %v3929_v49 = vor.u32 %v4677_v44, %v3928_v42 }
 0x934   :  { %v1371_v0 = vmul.f32 %v5496_v63, %v5496_v63 }
 0x935   :  { %1687 = vmatpush.bf16.msrb.mxu0 %v3929_v49  ;;  %4847 = vmatpush.bf16.msrb.mxu1 %v3929_v49 }
 0x936   :  { %1376 = vadd.xlane.f32.xlu1 %v1371_v0  ;;  %v3921_v0 = vor.u32 %v4673_v58, %v3918_v18 }
 0x938   :  { %1707 = vmatpush.bf16.msrb.mxu2 %v3921_v0 }
 0x947   :  { %v1359_v47 = vpop.xlane.xlu1 %1358 }
 0x948   :  { %v1364_v2 = vmul.f32 %v1359_v47, %v5226_v10  ;;  %v3925_v47 = vor.u32 %v4675_v41, %v3924_v62 }
 0x94a   :  { %v5501_v3 = vsub.f32 %v1350_v52, %v1364_v2  ;;  %v3936_v52 = vld [vmem:[#allocation2 + $0x218] sm:$0xf]  ;;  %v3904_v2 = vld [vmem:[#allocation2 + $0x1b0] sm:$0xf] }
 0x94b   :  { %v3937_v33 = vor.u32 %v4678_v22, %v3936_v52 }
 0x94c   :  { %v1372_v4 = vmul.f32 %v5501_v3, %v5501_v3 }
 0x94d   :  { %1725 = vmatpush.bf16.msrb.mxu3 %v3937_v33 }
 0x94e   :  { %1378 = vadd.xlane.f32.xlu2 %v1372_v4  ;;  %v4671_v4 = vld [vmem:[#allocation2 + $0x1c4] sm:$0xf0] }
 0x94f   :  { %v1361_v6 = vpop.xlane.xlu2 %1360 }
 0x950   :  { %v1365_v8 = vmul.f32 %v1361_v6, %v5226_v10  ;;  %v4670_v6 = vld [vmem:[#allocation2 + $0x1b4] sm:$0xf] }
 0x951   :  { %1726 = vmatpush.bf16.msrb.mxu3 %v3925_v47 }
 0x952   :  { %v5506_v9 = vsub.f32 %v1351_v24, %v1365_v8  ;;  %v4674_v24 = vld [vmem:[#allocation2 + $0x1f4] sm:$0xf0]  ;;  %v3905_v8 = vor.u32 %v4671_v4, %v3904_v2 }
 0x953   :  { %v3917_v59 = vor.u32 %v4674_v24, %v3916_v32 }
 0x954   :  { %v1373_v7 = vmul.f32 %v5506_v9, %v5506_v9 }
 0x955   :  { %1688 = vmatpush.bf16.msrb.mxu0 %v3917_v59  ;;  %4848 = vmatpush.bf16.msrb.mxu1 %v3917_v59 }
 0x956   :  { %1380 = vadd.xlane.f32.xlu0 %v1373_v7  ;;  %v3906_v7 = vld [vmem:[#allocation2 + $0x1c8] sm:$0xf0]  ;;  %1727 = vmatpush.bf16.msrb.mxu3 %v3913_v12 }
 0x957   :  { %v3909_v36 = vor.u32 %v4670_v6, %v3906_v7 }
 0x959   :  { %1689 = vmatpush.bf16.msrb.mxu0 %v3905_v8  ;;  %4849 = vmatpush.bf16.msrb.mxu1 %v3905_v8 }
 0x95a   :  { %1708 = vmatpush.bf16.msrb.mxu2 %v3909_v36  ;;  %1728 = vmatpush.bf16.msrb.mxu3 %v3901_v1 }
 0x95d   :  { %1690 = vmatpush.bf16.msrb.mxu0 %v3893_v19  ;;  %4850 = vmatpush.bf16.msrb.mxu1 %v3893_v19 }
 0x95e   :  { %1709 = vmatpush.bf16.msrb.mxu2 %v3897_v26 }
 0x9a1   :  { %v1375_v13 = vpop.xlane.xlu0 %1374 }
 0x9a2   :  { %v1382_v56 = vmul.f32 %v1375_v13, %v5226_v10 }
 0x9a4   :  { %v1386_v54 = vadd.f32 1e-12, %v1382_v56 }
 0x9a6   :  { %4966 = vrsqrt.f32 %v1386_v54  ;;  %vm1396_vm12 = vweird.f32 %v1386_v54 }
 0x9a9   :  { %v1377_v5 = vpop.xlane.xlu1 %1376 }
 0x9aa   :  { %v1383_v20 = vmul.f32 %v1377_v5, %v5226_v10 }
 0x9ac   :  { %v4967_v27 = vpop.eup %4966  ;;  %v1387_v28 = vadd.f32 1e-12, %v1383_v20 }
 0x9ad   :  { %v1391_v29 = vmul.f32 %v4967_v27, %v1386_v54  ;;  %vm1397_vm11 = vweird.f32 %v4967_v27 }
 0x9ae   :  { %4968 = vrsqrt.f32 %v1387_v28  ;;  %vm1398_vm15 = vmor %vm1396_vm12, %vm1397_vm11  ;;  %vm1406_vm1 = vweird.f32 %v1387_v28 }
 0x9af   :  { %v1392_v30 = vmul.f32 %v4967_v27, %v1391_v29 }
 0x9b1   :  { %v1393_v31 = vmul.f32 0.5, %v1392_v30 }
 0x9b3   :  { %v1394_v34 = vsub.f32 1.5, %v1393_v31 }
 0x9b4   :  { %v4969_v23 = vpop.eup %4968 }
 0x9b5   :  { %v1395_v37 = vmul.f32 %v4967_v27, %v1394_v34  ;;  %v1401_v45 = vmul.f32 %v4969_v23, %v1387_v28  ;;  %vm1407_vm0 = vweird.f32 %v4969_v23 }
 0x9b6   :  { %vm1408_vm2 = vmor %vm1406_vm1, %vm1407_vm0 }
 0x9b7   :  { %v1402_v15 = vmul.f32 %v4969_v23, %v1401_v45  ;;  %v1399_v38 = vsel %vm1398_vm15, %v4967_v27, %v1395_v37 }
 0x9b8   :  { %v1430_v40 = vmul.f32 %v1399_v38, %v5491_v60 }
 0x9b9   :  { %v1403_v46 = vmul.f32 0.5, %v1402_v15 }
 0x9ba   :  { %v1435_v44 = vmul.f32 %v4891_v35, %v1430_v40 }
 0x9bb   :  { %v1404_v39 = vsub.f32 1.5, %v1403_v46 }
 0x9bc   :  { %v5521_v52 = vadd.f32 %v4892_v48, %v1435_v44 }
 0x9bd   :  { %v1405_v57 = vmul.f32 %v4969_v23, %v1404_v39 }
 0x9bf   :  { %v1409_v61 = vsel %vm1408_vm2, %v4969_v23, %v1405_v57 }
 0x9c0   :  { %v1431_v50 = vmul.f32 %v1409_v61, %v5496_v63 }
 0x9c1   :  { %v1379_v42 = vpop.xlane.xlu2 %1378 }
 0x9c2   :  { %v1384_v49 = vmul.f32 %v1379_v42, %v5226_v10  ;;  %v1436_v51 = vmul.f32 %v4891_v35, %v1431_v50 }
 0x9c4   :  { %v1388_v60 = vadd.f32 1e-12, %v1384_v49  ;;  %v5523_v22 = vadd.f32 %v4892_v48, %v1436_v51 }
 0x9c6   :  { %4970 = vrsqrt.f32 %v1388_v60  ;;  %v1546_v53 = vpack.c.bf16 %v5523_v22, %v5521_v52  ;;  %vm1416_vm4 = vweird.f32 %v1388_v60 }
 0x9c8   :  { %1691 = vmatmul.bf16.vlgmr.msrb.gmra.mxu0 %v1546_v53  ;;  %1710 = vmatmul.bf16.vlgmr.msrb.gmra.mxu2 %v1546_v53 }
 0x9c9   :  { %v1381_v63 = vpop.xlane.xlu0 %1380  ;;  %1729 = vmatmul.bf16.vlgmr.msrb.gmra.mxu3 %v1546_v53 }
 0x9ca   :  { %v1385_v33 = vmul.f32 %v1381_v63, %v5226_v10 }
 0x9cc   :  { %v4971_v32 = vpop.eup %4970  ;;  %v1389_v24 = vadd.f32 1e-12, %v1385_v33 }
 0x9cd   :  { %v1411_v58 = vmul.f32 %v4971_v32, %v1388_v60  ;;  %vm1417_vm3 = vweird.f32 %v4971_v32 }
 0x9ce   :  { %4972 = vrsqrt.f32 %v1389_v24  ;;  %vm1418_vm5 = vmor %vm1416_vm4, %vm1417_vm3  ;;  %vm1426_vm7 = vweird.f32 %v1389_v24 }
 0x9cf   :  { %v1412_v59 = vmul.f32 %v4971_v32, %v1411_v58 }
 0x9d1   :  { %v1413_v18 = vmul.f32 0.5, %v1412_v59 }
 0x9d3   :  { %v1414_v62 = vsub.f32 1.5, %v1413_v18 }
 0x9d4   :  { %v4973_v41 = vpop.eup %4972 }
 0x9d5   :  { %v1415_v0 = vmul.f32 %v4971_v32, %v1414_v62  ;;  %v1421_v47 = vmul.f32 %v4973_v41, %v1389_v24  ;;  %vm1427_vm6 = vweird.f32 %v4973_v41 }
 0x9d6   :  { %vm1428_vm8 = vmor %vm1426_vm7, %vm1427_vm6 }
 0x9d7   :  { %v1422_v2 = vmul.f32 %v4973_v41, %v1421_v47  ;;  %v1419_v4 = vsel %vm1418_vm5, %v4971_v32, %v1415_v0 }
 0x9d8   :  { %v1432_v7 = vmul.f32 %v1419_v4, %v5501_v3  ;;  %v3888_v3 = vld [vmem:[%s5824_s3 + $0x1] ss:$2 sm:$0x7] }
 0x9d9   :  { %v1423_v6 = vmul.f32 0.5, %v1422_v2  ;;  %v1550_v19 = vperm.slane %v3888_v3, 1  ;;  %v1551_v25 = vperm.slane %v3888_v3, 2 }
 0x9da   :  { %v1437_v12 = vmul.f32 %v4891_v35, %v1432_v7 }
 0x9db   :  { %v1424_v8 = vsub.f32 1.5, %v1423_v6 }
 0x9dc   :  { %v5530_v56 = vadd.f32 %v4892_v48, %v1437_v12 }
 0x9dd   :  { %v1425_v43 = vmul.f32 %v4973_v41, %v1424_v8 }
 0x9df   :  { %v1429_v11 = vsel %vm1428_vm8, %v4973_v41, %v1425_v43 }
 0x9e0   :  { %v1433_v36 = vmul.f32 %v1429_v11, %v5506_v9  ;;  %v1549_v9 = vperm.slane %v3888_v3, 0 }
 0x9e2   :  { %v1438_v13 = vmul.f32 %v4891_v35, %v1433_v36 }
 0x9e4   :  { %v5532_v14 = vadd.f32 %v4892_v48, %v1438_v13 }
 0x9e6   :  { %v1547_v17 = vpack.c.bf16 %v5532_v14, %v5530_v56 }
 0x9e8   :  { %1696 = vmatmul.bf16.vlgmr.msrb.gmra.mxu1 %v1547_v17  ;;  %1715 = vmatmul.bf16.gmra.mxu2 %v1547_v17 }
 0x9e9   :  { %1734 = vmatmul.bf16.gmra.mxu3 %v1547_v17 }
 0xa45   :  { %v1692_v21 = vpop.f32.mrf.mxu0 }
 0xa46   :  { %v1693_v26 = vadd.f32 %v1692_v21, %v1549_v9 }
 0xa4b   :  { %v1711_v55 = vpop.f32.mrf.mxu2 }
 0xa4c   :  { %v1730_v16 = vpop.f32.mrf.mxu3  ;;  %v1712_v54 = vadd.f32 %v1711_v55, %v1550_v19 }
 0xa4d   :  { %v1731_v1 = vadd.f32 %v1730_v16, %v1551_v25  ;;  %v1694_v5 = vpop.f32.mrf.mxu0 }
 0xa4e   :  { %v1740_v20 = vpack.c.bf16 %v1712_v54, %v1693_v26  ;;  %v1695_v28 = vadd.f32 %v1694_v5, %v1549_v9 }
 0xa4f   :  { %v1741_v31 = vpack.c.bf16 %v1731_v1, %v1731_v1 }
 0xa50   :  { %v1752_v23 = vrot.slane %v1740_v20, 4  ;;  %v1756_v15 = vunpack.c.l.b16 %v1740_v20 }
 0xa51   :  { %v1871_v39 = vunpack.c.l.b16 %v1741_v31 }
 0xa52   :  { %v1759_v35 = vunpack.c.l.b16 %v1752_v23  ;;  %v5035_v23 = vld [vmem:[%s5822_s1 + $0x1] ss:$0 sm:$0xff] }
 0xa53   :  { %v1713_v27 = vpop.f32.mrf.mxu2 }
 0xa54   :  { %v1714_v29 = vadd.f32 %v1713_v27, %v1550_v19  ;;  %v1732_v30 = vpop.f32.mrf.mxu3 }
 0xa55   :  { %v1733_v34 = vadd.f32 %v1732_v30, %v1551_v25 }
 0xa56   :  { %v1742_v37 = vpack.c.bf16 %v1714_v29, %v1695_v28 }
 0xa57   :  { %v1743_v45 = vpack.c.bf16 %v1733_v34, %v1733_v34 }
 0xa58   :  { %v1753_v38 = vrot.slane %v1742_v37, 4  ;;  %v1757_v46 = vunpack.c.l.b16 %v1742_v37 }
 0xa59   :  { %v1872_v40 = vunpack.c.l.b16 %v1743_v45 }
 0xa5a   :  { %v1760_v57 = vunpack.c.l.b16 %v1753_v38  ;;  %v1758_v61 = vpack.c.b16 %v1757_v46, %v1756_v15 }
 0xa5b   :  { %v5539_v50 = vpack.c.b16 %v1872_v40, %v1871_v39 }
 0xa5c   :  { %1920 = vrot.lane.b32.xlu2 %v1758_v61, %s5148_s27  ;;  %v1761_v42 = vpack.c.b16 %v1760_v57, %v1759_v35 }
 0xa5d   :  { %1885 = vmatpush.bf16.msra.mxu2 %v5539_v50 }
 0xa5e   :  { %1922 = vrot.lane.b32.xlu1 %v1761_v42, %s5148_s27  ;;  %v1766_v44 = vsel %vm504_vm13, %v1761_v42, 0 }
 0xa5f   :  { %1775 = vmatpush.bf16.xpose.msra.mxu0 %v1766_v44 }
 0xa65   :  { %v1697_v48 = vpop.f32.mrf.mxu1 }
 0xa66   :  { %3986 = vmatmul.msk.bf16.vlgmr.msra.gmra.mxu0 %vm504_vm13, %v1758_v61  ;;  %v1698_v53 = vadd.f32 %v1697_v48, %v1549_v9 }
 0xa6b   :  { %v1716_v49 = vpop.f32.mrf.mxu2 }
 0xa6c   :  { %v1735_v51 = vpop.f32.mrf.mxu3  ;;  %v1717_v60 = vadd.f32 %v1716_v49, %v1550_v19 }
 0xa6d   :  { %v1736_v63 = vadd.f32 %v1735_v51, %v1551_v25  ;;  %v1699_v33 = vpop.f32.mrf.mxu1 }
 0xa6e   :  { %v1744_v32 = vpack.c.bf16 %v1717_v60, %v1698_v53  ;;  %v1700_v58 = vadd.f32 %v1699_v33, %v1549_v9 }
 0xa6f   :  { %v1745_v62 = vpack.c.bf16 %v1736_v63, %v1736_v63 }
 0xa70   :  { %v1754_v0 = vrot.slane %v1744_v32, 4  ;;  %v1782_v4 = vunpack.c.l.b16 %v1744_v32 }
 0xa71   :  { %v1899_v7 = vunpack.c.l.b16 %v1745_v62 }
 0xa72   :  { %v1785_v11 = vunpack.c.l.b16 %v1754_v0 }
 0xa73   :  { %v1718_v24 = vpop.f32.mrf.mxu2 }
 0xa74   :  { %v1719_v59 = vadd.f32 %v1718_v24, %v1550_v19  ;;  %v1737_v18 = vpop.f32.mrf.mxu3 }
 0xa75   :  { %v1738_v41 = vadd.f32 %v1737_v18, %v1551_v25  ;;  %v5034_v25 = vld [vmem:[%s5822_s1] ss:$0 sm:$0xff] }
 0xa76   :  { %v1746_v47 = vpack.c.bf16 %v1719_v59, %v1700_v58 }
 0xa77   :  { %v1747_v2 = vpack.c.bf16 %v1738_v41, %v1738_v41 }
 0xa78   :  { %v1755_v6 = vrot.slane %v1746_v47, 4  ;;  %v1783_v8 = vunpack.c.l.b16 %v1746_v47 }
 0xa79   :  { %v1900_v43 = vunpack.c.l.b16 %v1747_v2 }
 0xa7a   :  { %v1786_v36 = vunpack.c.l.b16 %v1755_v6  ;;  %v1784_v12 = vpack.c.b16 %v1783_v8, %v1782_v4 }
 0xa7b   :  { %v5546_v13 = vpack.c.b16 %v1900_v43, %v1899_v7 }
 0xa7c   :  { %1944 = vrot.lane.b32.xlu1 %v1784_v12, %s5148_s27  ;;  %v1787_v17 = vpack.c.b16 %v1786_v36, %v1785_v11 }
 0xa7d   :  { %1913 = vmatpush.bf16.msra.mxu3 %v5546_v13 }
 0xa7e   :  { %1946 = vrot.lane.b32.xlu0 %v1787_v17, %s5148_s27  ;;  %v1792_v21 = vsel %vm504_vm13, %v1787_v17, 0 }
 0xa7f   :  { %1801 = vmatpush.bf16.xpose.msra.mxu1 %v1792_v21 }
 0xa86   :  { %3987 = vmatmul.msk.bf16.vlgmr.msra.gmra.mxu1 %vm504_vm13, %v1784_v12 }
 0xab6   :  { %v1921_v55 = vpop.permute.xlu2 %1920 }
 0xad0   :  { %v1923_v3 = vpop.permute.xlu1 %1922 }
 0xad1   :  { %v1928_v19 = vsel %vm504_vm13, %v1923_v3, 0 }
 0xad2   :  { %1937 = vmatpush.bf16.xpose.msrb.mxu0 %v1928_v19 }
 0xad9   :  { %3990 = vmatmul.msk.bf16.vlgmr.msrb.gmra.mxu0 %vm504_vm13, %v1921_v55 }
 0xae3   :  { %v1777_v9 = vpop.f32.mrf.mxu0 }
 0xae4   :  { %v1808_v16 = vmul.f32 0.125, %v1777_v9 }
 0xae6   :  { %v1812_v54 = vadd.f32 %v5034_v25, %v1808_v16 }
 0xae8   :  { %v1816_v26 = vsel %vm565_vm14, %v1812_v54, -inf }
 0xae9   :  { %1817 = vmax.xlane.f32.xlu0 %v1816_v26 }
 0xaeb   :  { %v1779_v1 = vpop.f32.mrf.mxu0 }
 0xaec   :  { %v1809_v5 = vmul.f32 0.125, %v1779_v1 }
 0xaee   :  { %v1813_v20 = vadd.f32 %v5034_v25, %v1809_v5  ;;  %v1945_v30 = vpop.permute.xlu1 %1944 }
 0xaf0   :  { %v1947_v27 = vpop.permute.xlu0 %1946  ;;  %v1819_v29 = vsel %vm565_vm14, %v1813_v20, -inf }
 0xaf1   :  { %v1952_v28 = vsel %vm504_vm13, %v1947_v27, 0  ;;  %1820 = vmax.xlane.f32.xlu2 %v1819_v29 }
 0xaf2   :  { %1961 = vmatpush.bf16.xpose.msrb.mxu1 %v1952_v28 }
 0xaf9   :  { %3991 = vmatmul.msk.bf16.vlgmr.msrb.gmra.mxu1 %vm504_vm13, %v1945_v30 }
 0xb03   :  { %v1803_v31 = vpop.f32.mrf.mxu1 }
 0xb04   :  { %v1810_v34 = vmul.f32 0.125, %v1803_v31 }
 0xb06   :  { %v1814_v37 = vadd.f32 %v5035_v23, %v1810_v34 }
 0xb08   :  { %v1822_v45 = vsel %vm565_vm14, %v1814_v37, -inf }
 0xb09   :  { %1823 = vmax.xlane.f32.xlu1 %v1822_v45 }
 0xb0b   :  { %v1805_v15 = vpop.f32.mrf.mxu1 }
 0xb0c   :  { %v1811_v38 = vmul.f32 0.125, %v1805_v15 }
 0xb0e   :  { %v1815_v46 = vadd.f32 %v5035_v23, %v1811_v38 }
 0xb10   :  { %v1825_v39 = vsel %vm565_vm14, %v1815_v46, -inf }
 0xb11   :  { %1826 = vmax.xlane.f32.xlu0 %v1825_v39 }
 0xb56   :  { %v1939_v40 = vpop.f32.mrf.mxu0 }
 0xb57   :  { %v1968_v35 = vmul.f32 0.125, %v1939_v40 }
 0xb59   :  { %v1972_v57 = vadd.f32 %v5034_v25, %v1968_v35 }
 0xb5b   :  { %v1976_v61 = vsel %vm565_vm14, %v1972_v57, -inf }
 0xb5c   :  { %v1818_v42 = vpop.xlane.xlu0 %1817  ;;  %1977 = vmax.xlane.f32.xlu2 %v1976_v61 }
 0xb5d   :  { %v1828_v44 = vsub.f32 %v1812_v54, %v1818_v42 }
 0xb5e   :  { %v1941_v48 = vpop.f32.mrf.mxu0 }
 0xb5f   :  { %v1832_v49 = vmul.f32 1.442695, %v1828_v44  ;;  %v1969_v51 = vmul.f32 0.125, %v1941_v48 }
 0xb61   :  { %v1973_v60 = vadd.f32 %v5034_v25, %v1969_v51  ;;  %4974 = vpow2.f32 %v1832_v49 }
 0xb63   :  { %v1979_v53 = vsel %vm565_vm14, %v1973_v60, -inf }
 0xb64   :  { %1980 = vmax.xlane.f32.xlu1 %v1979_v53  ;;  %v1821_v32 = vpop.xlane.xlu2 %1820 }
 0xb65   :  { %v1829_v24 = vsub.f32 %v1813_v20, %v1821_v32 }
 0xb67   :  { %v4975_v63 = vpop.eup %4974  ;;  %v1834_v58 = vmul.f32 1.442695, %v1829_v24 }
 0xb68   :  { %v1840_v33 = vsel %vm565_vm14, %v4975_v63, 0.0 }
 0xb69   :  { %4976 = vpow2.f32 %v1834_v58 }
 0xb6c   :  { %1841 = vadd.xlane.f32.xlu1 %v1840_v33 }
 0xb6f   :  { %v4977_v8 = vpop.eup %4976 }
 0xb70   :  { %v1843_v11 = vsel %vm565_vm14, %v4977_v8, 0.0 }
 0xb76   :  { %v1963_v59 = vpop.f32.mrf.mxu1 }
 0xb77   :  { %v1970_v18 = vmul.f32 0.125, %v1963_v59 }
 0xb79   :  { %v1974_v62 = vadd.f32 %v5035_v23, %v1970_v18 }
 0xb7b   :  { %v1982_v41 = vsel %vm565_vm14, %v1974_v62, -inf }
 0xb7c   :  { %v1824_v0 = vpop.xlane.xlu1 %1823  ;;  %1983 = vmax.xlane.f32.xlu0 %v1982_v41 }
 0xb7d   :  { %v1830_v47 = vsub.f32 %v1814_v37, %v1824_v0 }
 0xb7e   :  { %v1965_v2 = vpop.f32.mrf.mxu1 }
 0xb7f   :  { %v1836_v4 = vmul.f32 1.442695, %v1830_v47  ;;  %v1971_v6 = vmul.f32 0.125, %v1965_v2 }
 0xb81   :  { %v1975_v7 = vadd.f32 %v5035_v23, %v1971_v6  ;;  %4978 = vpow2.f32 %v1836_v4 }
 0xb83   :  { %v1985_v43 = vsel %vm565_vm14, %v1975_v7, -inf }
 0xb84   :  { %v1827_v36 = vpop.xlane.xlu0 %1826  ;;  %1986 = vmax.xlane.f32.xlu2 %v1985_v43  ;;  %1844 = vadd.xlane.f32.xlu0 %v1843_v11 }
 0xb85   :  { %v1831_v12 = vsub.f32 %v1815_v46, %v1827_v36 }
 0xb87   :  { %v1838_v17 = vmul.f32 1.442695, %v1831_v12  ;;  %v4979_v21 = vpop.eup %4978 }
 0xb88   :  { %v1846_v3 = vsel %vm565_vm14, %v4979_v21, 0.0 }
 0xb89   :  { %4980 = vpow2.f32 %v1838_v17 }
 0xb8c   :  { %1847 = vadd.xlane.f32.xlu2 %v1846_v3 }
 0xb8f   :  { %v4981_v19 = vpop.eup %4980 }
 0xb90   :  { %v1849_v55 = vsel %vm565_vm14, %v4981_v19, 0.0 }
 0xb91   :  { %1850 = vadd.xlane.f32.xlu1 %v1849_v55 }
 0xbaa   :  { %2029 = vrot.lane.b32.xlu1 %v5539_v50, %s5148_s27 }
 0xbcf   :  { %v1978_v9 = vpop.xlane.xlu2 %1977 }
 0xbd0   :  { %v1988_v16 = vsub.f32 %v1972_v57, %v1978_v9 }
 0xbd2   :  { %v1992_v25 = vmul.f32 1.442695, %v1988_v16 }
 0xbd4   :  { %4982 = vpow2.f32 %v1992_v25 }
 0xbd7   :  { %v1981_v54 = vpop.xlane.xlu1 %1980 }
 0xbd8   :  { %v1989_v26 = vsub.f32 %v1973_v60, %v1981_v54 }
 0xbda   :  { %v4983_v1 = vpop.eup %4982  ;;  %v1994_v5 = vmul.f32 1.442695, %v1989_v26 }
 0xbdb   :  { %v2000_v20 = vsel %vm565_vm14, %v4983_v1, 0.0 }
 0xbdc   :  { %4984 = vpow2.f32 %v1994_v5  ;;  %2001 = vadd.xlane.f32.xlu0 %v2000_v20 }
 0xbdf   :  { %v1842_v29 = vpop.xlane.xlu1 %1841 }
 0xbe0   :  { %4986 = vrcp.f32 %v1842_v29 }
 0xbe2   :  { %v4985_v27 = vpop.eup %4984 }
 0xbe3   :  { %v2003_v28 = vsel %vm565_vm14, %v4985_v27, 0.0 }
 0xbe4   :  { %2004 = vadd.xlane.f32.xlu2 %v2003_v28 }
 0xbe6   :  { %v4987_v37 = vpop.eup %4986 }
 0xbe7   :  { %v1856_v46 = vmul.f32 %v4987_v37, %v4975_v63  ;;  %v4697_v37 = vld [vmem:[#allocation2 + $0x2c0] sm:$0xf0] }
 0xbe9   :  { %v1860_v35 = vpack.c.bf16 %v1856_v46, %v1856_v46  ;;  %v4696_v46 = vld [vmem:[#allocation2 + $0x290] sm:$0xf0] }
 0xbeb   :  { %v1866_v48 = vunpack.c.l.b16 %v1860_v35  ;;  %v4695_v35 = vld [vmem:[#allocation2 + $0x260] sm:$0xf0] }
 0xbef   :  { %v1984_v30 = vpop.xlane.xlu0 %1983 }
 0xbf0   :  { %v1990_v31 = vsub.f32 %v1974_v62, %v1984_v30 }
 0xbf2   :  { %v1996_v50 = vmul.f32 1.442695, %v1990_v31  ;;  %v4024_v31 = vld [vmem:[#allocation2 + $0x2dc] sm:$0xf] }
 0xbf4   :  { %4988 = vpow2.f32 %v1996_v50  ;;  %v4698_v50 = vld [vmem:[#allocation2 + $0x2f0] sm:$0xf0] }
 0xbf7   :  { %v1845_v34 = vpop.xlane.xlu0 %1844  ;;  %v1987_v23 = vpop.xlane.xlu2 %1986 }
 0xbf8   :  { %4990 = vrcp.f32 %v1845_v34  ;;  %v1991_v45 = vsub.f32 %v1975_v7, %v1987_v23  ;;  %v4020_v34 = vld [vmem:[#allocation2 + $0x2ac] sm:$0xf]  ;;  %v4025_v23 = vor.u32 %v4698_v50, %v4024_v31 }
 0xbfa   :  { %v4989_v15 = vpop.eup %4988  ;;  %v1998_v38 = vmul.f32 1.442695, %v1991_v45  ;;  %2146 = vmatpush.bf16.msra.mxu0 %v4025_v23 }
 0xbfb   :  { %v2006_v39 = vsel %vm565_vm14, %v4989_v15, 0.0 }
 0xbfc   :  { %4992 = vpow2.f32 %v1998_v38  ;;  %2007 = vadd.xlane.f32.xlu0 %v2006_v39  ;;  %v4016_v38 = vld [vmem:[#allocation2 + $0x27c] sm:$0xf] }
 0xbfd   :  { %v4017_v39 = vor.u32 %v4696_v46, %v4016_v38  ;;  %v4084_v38 = vld [vmem:[#allocation2 + $0x2e0] sm:$0xf]  ;;  %v4714_v46 = vld [vmem:[#allocation2 + $0x2f4] sm:$0xf0] }
 0xbfe   :  { %v4991_v40 = vpop.eup %4990 }
 0xbff   :  { %v1857_v57 = vmul.f32 %v4991_v40, %v4977_v8  ;;  %v1848_v61 = vpop.xlane.xlu2 %1847  ;;  %v4012_v40 = vld [vmem:[#allocation2 + $0x24c] sm:$0xf] }
 0xc00   :  { %4994 = vrcp.f32 %v1848_v61  ;;  %v4008_v61 = vld [vmem:[#allocation2 + $0x21c] sm:$0xf] }
 0xc01   :  { %v1861_v42 = vpack.c.bf16 %v1857_v57, %v1857_v57  ;;  %v4013_v57 = vor.u32 %v4695_v35, %v4012_v40  ;;  %v4085_v40 = vor.u32 %v4714_v46, %v4084_v38  ;;  %v4086_v35 = vld [vmem:[#allocation2 + $0x2f8] sm:$0xf0] }
 0xc02   :  { %v4993_v44 = vpop.eup %4992 }
 0xc03   :  { %v1867_v49 = vunpack.c.l.b16 %v1861_v42  ;;  %v2009_v51 = vsel %vm565_vm14, %v4993_v44, 0.0  ;;  %v4694_v42 = vld [vmem:[#allocation2 + $0x230] sm:$0xf0]  ;;  %2348 = vmatpush.bf16.msra.mxu1 %v4085_v40 }
 0xc04   :  { %v1851_v60 = vpop.xlane.xlu1 %1850  ;;  %2010 = vadd.xlane.f32.xlu2 %v2009_v51  ;;  %v4693_v51 = vld [vmem:[#allocation2 + $0x200] sm:$0xf0] }
 0xc05   :  { %v1868_v53 = vpack.c.b16 %v1867_v49, %v1866_v48  ;;  %4996 = vrcp.f32 %v1851_v60  ;;  %v4009_v48 = vor.u32 %v4694_v42, %v4008_v61  ;;  %v4004_v49 = vld [vmem:[#allocation2 + $0x1ec] sm:$0xf]  ;;  %v4076_v61 = vld [vmem:[#allocation2 + $0x2b0] sm:$0xf]  ;;  %v4712_v42 = vld [vmem:[#allocation2 + $0x2c4] sm:$0xf0] }
 0xc06   :  { %v4995_v63 = vpop.eup %4994  ;;  %v4005_v60 = vor.u32 %v4693_v51, %v4004_v49  ;;  %v4078_v49 = vld [vmem:[#allocation2 + $0x2c8] sm:$0xf0] }
 0xc07   :  { %3988 = vmatmul.msk.bf16.vlgmr.msra.gmra.mxu2 %vm565_vm14, %v1868_v53  ;;  %v1858_v33 = vmul.f32 %v4995_v63, %v4979_v21  ;;  %v4000_v53 = vld [vmem:[#allocation2 + $0x1bc] sm:$0xf]  ;;  %v4692_v63 = vld [vmem:[#allocation2 + $0x1d0] sm:$0xf0] }
 0xc09   :  { %v1862_v24 = vpack.c.bf16 %v1858_v33, %v1858_v33 }
 0xc0b   :  { %v4997_v32 = vpop.eup %4996  ;;  %v1894_v18 = vunpack.c.l.b16 %v1862_v24 }
 0xc0c   :  { %v1859_v58 = vmul.f32 %v4997_v32, %v4981_v19  ;;  %v4001_v32 = vor.u32 %v4692_v63, %v4000_v53  ;;  %v4710_v53 = vld [vmem:[#allocation2 + $0x294] sm:$0xf0]  ;;  %v4709_v63 = vld [vmem:[#allocation2 + $0x284] sm:$0xf] }
 0xc0e   :  { %v1863_v59 = vpack.c.bf16 %v1859_v58, %v1859_v58 }
 0xc10   :  { %v1895_v62 = vunpack.c.l.b16 %v1863_v59  ;;  %2054 = vrot.lane.b32.xlu0 %v5546_v13, %s5148_s27  ;;  %v3996_v59 = vld [vmem:[#allocation2 + $0x18c] sm:$0xf] }
 0xc12   :  { %v1896_v41 = vpack.c.b16 %v1895_v62, %v1894_v18  ;;  %v4691_v18 = vld [vmem:[#allocation2 + $0x1a0] sm:$0xf0] }
 0xc13   :  { %v3997_v62 = vor.u32 %v4691_v18, %v3996_v59  ;;  %v4708_v59 = vld [vmem:[#allocation2 + $0x264] sm:$0xf0]  ;;  %v4707_v18 = vld [vmem:[#allocation2 + $0x254] sm:$0xf] }
 0xc14   :  { %3989 = vmatmul.msk.bf16.vlgmr.msra.gmra.mxu3 %vm565_vm14, %v1896_v41 }
 0xc1c   :  { %v2030_v0 = vpop.permute.xlu1 %2029 }
 0xc1d   :  { %2042 = vmatpush.bf16.msrb.mxu2 %v2030_v0 }
 0xc4f   :  { %v2002_v47 = vpop.xlane.xlu0 %2001 }
 0xc50   :  { %4998 = vrcp.f32 %v2002_v47 }
 0xc56   :  { %v4999_v4 = vpop.eup %4998 }
 0xc57   :  { %v2005_v2 = vpop.xlane.xlu2 %2004  ;;  %v2016_v6 = vmul.f32 %v4999_v4, %v4983_v1 }
 0xc58   :  { %5000 = vrcp.f32 %v2005_v2 }
 0xc59   :  { %v2020_v7 = vpack.c.bf16 %v2016_v6, %v2016_v6 }
 0xc5b   :  { %v2026_v36 = vunpack.c.l.b16 %v2020_v7 }
 0xc5e   :  { %v5001_v8 = vpop.eup %5000 }
 0xc5f   :  { %v2017_v43 = vmul.f32 %v5001_v8, %v4985_v27 }
 0xc61   :  { %v2021_v11 = vpack.c.bf16 %v2017_v43, %v2017_v43 }
 0xc63   :  { %v2027_v12 = vunpack.c.l.b16 %v2021_v11 }
 0xc65   :  { %v2028_v17 = vpack.c.b16 %v2027_v12, %v2026_v36 }
 0xc67   :  { %3992 = vmatmul.msk.bf16.vlgmr.msrb.gmra.mxu2 %vm565_vm14, %v2028_v17  ;;  %v4893_v17 = vld [vmem:[%s5823_s2 + $0x8] ss:$0 sm:$0xff] }
 0xc6f   :  { %v2008_v13 = vpop.xlane.xlu0 %2007 }
 0xc70   :  { %5002 = vrcp.f32 %v2008_v13 }
 0xc76   :  { %v5003_v3 = vpop.eup %5002 }
 0xc77   :  { %v2011_v21 = vpop.xlane.xlu2 %2010  ;;  %v2018_v19 = vmul.f32 %v5003_v3, %v4989_v15  ;;  %v4021_v15 = vor.u32 %v4697_v37, %v4020_v34 }
 0xc78   :  { %5004 = vrcp.f32 %v2011_v21 }
 0xc79   :  { %v2022_v9 = vpack.c.bf16 %v2018_v19, %v2018_v19  ;;  %2147 = vmatpush.bf16.msra.mxu0 %v4021_v15 }
 0xc7b   :  { %v2051_v26 = vunpack.c.l.b16 %v2022_v9 }
 0xc7d   :  { %2148 = vmatpush.bf16.msra.mxu0 %v4017_v39  ;;  %v4713_v39 = vld [vmem:[#allocation2 + $0x2e4] sm:$0xf] }
 0xc7e   :  { %v5005_v55 = vpop.eup %5004 }
 0xc7f   :  { %v2019_v16 = vmul.f32 %v5005_v55, %v4993_v44 }
 0xc81   :  { %v2023_v25 = vpack.c.bf16 %v2019_v16, %v2019_v16  ;;  %2149 = vmatpush.bf16.msra.mxu0 %v4013_v57  ;;  %v4089_v57 = vor.u32 %v4713_v39, %v4086_v35 }
 0xc82   :  { %v2055_v54 = vpop.permute.xlu0 %2054 }
 0xc83   :  { %v2052_v1 = vunpack.c.l.b16 %v2023_v25  ;;  %2067 = vmatpush.bf16.msrb.mxu3 %v2055_v54  ;;  %2367 = vmatpush.bf16.msra.mxu2 %v4089_v57 }
 0xc85   :  { %v2053_v5 = vpack.c.b16 %v2052_v1, %v2051_v26  ;;  %2150 = vmatpush.bf16.msra.mxu0 %v4009_v48  ;;  %v4077_v48 = vor.u32 %v4712_v42, %v4076_v61 }
 0xc87   :  { %3993 = vmatmul.msk.bf16.vlgmr.msrb.gmra.mxu3 %vm565_vm14, %v2053_v5  ;;  %2349 = vmatpush.bf16.msra.mxu1 %v4077_v48 }
 0xc89   :  { %2151 = vmatpush.bf16.msra.mxu0 %v4005_v60  ;;  %v4068_v60 = vld [vmem:[#allocation2 + $0x280] sm:$0xf] }
 0xc8a   :  { %v1887_v20 = vpop.f32.mrf.mxu2 }
 0xc8d   :  { %2152 = vmatpush.bf16.msra.mxu0 %v4001_v32  ;;  %v4070_v32 = vld [vmem:[#allocation2 + $0x298] sm:$0xf0] }
 0xc91   :  { %2153 = vmatpush.bf16.msra.mxu0 %v3997_v62 }
 0xc92   :  { %v1889_v27 = vpop.f32.mrf.mxu2 }
 0xc97   :  { %v1915_v45 = vpop.f32.mrf.mxu3 }
 0xc9f   :  { %v1917_v44 = vpop.f32.mrf.mxu3 }
 0xcea   :  { %v2044_v28 = vpop.f32.mrf.mxu2 }
 0xcf2   :  { %v2046_v29 = vpop.f32.mrf.mxu2 }
 0xcf3   :  { %v4873_v30 = vpack.i.bf16 %v2046_v29, %v2044_v28 }
 0xcf5   :  { %4874 = vrot.lane.b32.xlu2 %v4873_v30, %s5148_s27 }
 0xd0a   :  { %v2069_v33 = vpop.f32.mrf.mxu3 }
 0xd12   :  { %v2071_v24 = vpop.f32.mrf.mxu3 }
 0xd13   :  { %v4878_v58 = vpack.i.bf16 %v2071_v24, %v2069_v33  ;;  %v4069_v33 = vor.u32 %v4710_v53, %v4068_v60  ;;  %v4073_v24 = vor.u32 %v4709_v63, %v4070_v32  ;;  %v4895_v53 = vld [vmem:[%s5823_s2 + $0xa] ss:$0 sm:$0xff] }
 0xd15   :  { %4879 = vrot.lane.b32.xlu1 %v4878_v58, %s5148_s27  ;;  %2350 = vmatpush.bf16.msra.mxu1 %v4069_v33  ;;  %v4060_v58 = vld [vmem:[#allocation2 + $0x250] sm:$0xf] }
 0xd16   :  { %v4061_v62 = vor.u32 %v4708_v59, %v4060_v58 }
 0xd19   :  { %2351 = vmatpush.bf16.msra.mxu1 %v4061_v62 }
 0xd4f   :  { %v4875_v41 = vpop.permute.xlu2 %4874 }
 0xd50   :  { %v4877_v0 = vunpack.i.h.bf16 %v4875_v41  ;;  %v4876_v47 = vunpack.i.l.bf16 %v4875_v41  ;;  %v4062_v41 = vld [vmem:[#allocation2 + $0x268] sm:$0xf0] }
 0xd52   :  { %v2091_v2 = vsel %vm504_vm13, %v1889_v27, %v4877_v0  ;;  %v2090_v4 = vsel %vm504_vm13, %v1887_v20, %v4876_v47  ;;  %v4065_v0 = vor.u32 %v4707_v18, %v4062_v41  ;;  %v4052_v47 = vld [vmem:[#allocation2 + $0x220] sm:$0xf] }
 0xd53   :  { %v2094_v6 = vpack.c.bf16 %v2091_v2, %v2090_v4  ;;  %v4706_v2 = vld [vmem:[#allocation2 + $0x234] sm:$0xf0]  ;;  %v4705_v4 = vld [vmem:[#allocation2 + $0x224] sm:$0xf] }
 0xd55   :  { %2154 = vmatmul.bf16.vlgmr.msra.gmra.mxu0 %v2094_v6  ;;  %v4053_v6 = vor.u32 %v4706_v2, %v4052_v47 }
 0xd57   :  { %2352 = vmatpush.bf16.msra.mxu1 %v4053_v6 }
 0xd87   :  { %v4880_v8 = vpop.permute.xlu1 %4879 }
 0xd88   :  { %v4882_v7 = vunpack.i.h.bf16 %v4880_v8  ;;  %v4881_v43 = vunpack.i.l.bf16 %v4880_v8  ;;  %v4054_v8 = vld [vmem:[#allocation2 + $0x238] sm:$0xf0] }
 0xd8a   :  { %v2092_v11 = vsel %vm504_vm13, %v1915_v45, %v4881_v43  ;;  %v2093_v36 = vsel %vm504_vm13, %v1917_v44, %v4882_v7  ;;  %v4711_v44 = vld [vmem:[#allocation2 + $0x2b4] sm:$0xf]  ;;  %v4057_v7 = vor.u32 %v4705_v4, %v4054_v8  ;;  %v4044_v43 = vld [vmem:[#allocation2 + $0x1f0] sm:$0xf] }
 0xd8b   :  { %v2095_v12 = vpack.c.bf16 %v2093_v36, %v2092_v11  ;;  %v4081_v51 = vor.u32 %v4711_v44, %v4078_v49  ;;  %v4704_v11 = vld [vmem:[#allocation2 + $0x204] sm:$0xf0]  ;;  %v4703_v36 = vld [vmem:[#allocation2 + $0x1f4] sm:$0xf] }
 0xd8c   :  { %v4894_v44 = vld [vmem:[%s5823_s2 + $0x9] ss:$0 sm:$0xff] }
 0xd8d   :  { %2159 = vmatmul.bf16.gmra.mxu0 %v2095_v12  ;;  %2368 = vmatpush.bf16.msra.mxu2 %v4081_v51  ;;  %v4045_v12 = vor.u32 %v4704_v11, %v4044_v43 }
 0xd8f   :  { %2353 = vmatpush.bf16.msra.mxu1 %v4045_v12 }
 0xd91   :  { %2369 = vmatpush.bf16.msra.mxu2 %v4073_v24 }
 0xd95   :  { %2370 = vmatpush.bf16.msra.mxu2 %v4065_v0 }
 0xd99   :  { %2371 = vmatpush.bf16.msra.mxu2 %v4057_v7 }
 0xdd2   :  { %v2155_v13 = vpop.f32.mrf.mxu0 }
 0xdd3   :  { %v2156_v21 = vadd.f32 %v4893_v17, %v2155_v13 }
 0xdd5   :  { %v2165_v3 = vadd.f32 %v2156_v21, %v5521_v52  ;;  %v4036_v21 = vld [vmem:[#allocation2 + $0x1c0] sm:$0xf] }
 0xdd7   :  { %2171 = vadd.xlane.f32.xlu0 %v2165_v3 }
 0xdda   :  { %v2157_v19 = vpop.f32.mrf.mxu0 }
 0xddb   :  { %v2158_v55 = vadd.f32 %v4893_v17, %v2157_v19  ;;  %v4701_v19 = vld [vmem:[#allocation2 + $0x1c4] sm:$0xf] }
 0xddd   :  { %v2166_v9 = vadd.f32 %v2158_v55, %v5523_v22 }
 0xddf   :  { %2173 = vadd.xlane.f32.xlu1 %v2166_v9 }
 0xe0a   :  { %v2160_v16 = vpop.f32.mrf.mxu0 }
 0xe0b   :  { %v2161_v25 = vadd.f32 %v4893_v17, %v2160_v16  ;;  %v4028_v16 = vld [vmem:[#allocation2 + $0x190] sm:$0xf] }
 0xe0d   :  { %v2167_v54 = vadd.f32 %v2161_v25, %v5530_v56  ;;  %v4700_v25 = vld [vmem:[#allocation2 + $0x1a4] sm:$0xf0] }
 0xe0f   :  { %2175 = vadd.xlane.f32.xlu2 %v2167_v54 }
 0xe12   :  { %v2162_v26 = vpop.f32.mrf.mxu0 }
 0xe13   :  { %v2163_v1 = vadd.f32 %v4893_v17, %v2162_v26  ;;  %v4046_v17 = vld [vmem:[#allocation2 + $0x208] sm:$0xf0] }
 0xe14   :  { %v4049_v13 = vor.u32 %v4703_v36, %v4046_v17 }
 0xe15   :  { %v2168_v5 = vadd.f32 %v2163_v1, %v5532_v14  ;;  %v4699_v1 = vld [vmem:[#allocation2 + $0x194] sm:$0xf] }
 0xe16   :  { %2372 = vmatpush.bf16.msra.mxu2 %v4049_v13 }
 0xe17   :  { %2177 = vadd.xlane.f32.xlu0 %v2168_v5 }
 0xe4a   :  { %v2172_v20 = vpop.xlane.xlu0 %2171 }
 0xe4b   :  { %v2179_v27 = vmul.f32 %v2172_v20, %v5226_v10 }
 0xe4d   :  { %v5601_v52 = vsub.f32 %v2165_v3, %v2179_v27  ;;  %v4702_v3 = vld [vmem:[#allocation2 + $0x1d4] sm:$0xf0]  ;;  %v4029_v27 = vor.u32 %v4700_v25, %v4028_v16 }
 0xe4e   :  { %v4037_v55 = vor.u32 %v4702_v3, %v4036_v21 }
 0xe4f   :  { %v2187_v28 = vmul.f32 %v5601_v52, %v5601_v52 }
 0xe50   :  { %2354 = vmatpush.bf16.msra.mxu1 %v4037_v55 }
 0xe51   :  { %2191 = vadd.xlane.f32.xlu1 %v2187_v28 }
 0xe52   :  { %v2174_v22 = vpop.xlane.xlu1 %2173 }
 0xe53   :  { %v2180_v29 = vmul.f32 %v2174_v22, %v5226_v10 }
 0xe54   :  { %2355 = vmatpush.bf16.msra.mxu1 %v4029_v27  ;;  %v4718_v27 = vld [vmem:[%s5826_s5 + $0x98] sm:$0xff] }
 0xe55   :  { %v5606_v30 = vsub.f32 %v2166_v9, %v2180_v29  ;;  %v4038_v9 = vld [vmem:[#allocation2 + $0x1d8] sm:$0xf0] }
 0xe56   :  { %v4041_v26 = vor.u32 %v4701_v19, %v4038_v9 }
 0xe57   :  { %v2188_v56 = vmul.f32 %v5606_v30, %v5606_v30 }
 0xe58   :  { %2373 = vmatpush.bf16.msra.mxu2 %v4041_v26  ;;  %v4720_v26 = vld [vmem:[%s5826_s5 + $0xa8] sm:$0xff] }
 0xe59   :  { %2193 = vadd.xlane.f32.xlu2 %v2188_v56 }
 0xe82   :  { %v2176_v14 = vpop.xlane.xlu2 %2175 }
 0xe83   :  { %v2181_v31 = vmul.f32 %v2176_v14, %v5226_v10 }
 0xe85   :  { %v5611_v50 = vsub.f32 %v2167_v54, %v2181_v31 }
 0xe87   :  { %v2189_v34 = vmul.f32 %v5611_v50, %v5611_v50 }
 0xe89   :  { %2195 = vadd.xlane.f32.xlu0 %v2189_v34 }
 0xe8a   :  { %v2178_v23 = vpop.xlane.xlu0 %2177 }
 0xe8b   :  { %v2182_v37 = vmul.f32 %v2178_v23, %v5226_v10 }
 0xe8d   :  { %v5616_v45 = vsub.f32 %v2168_v5, %v2182_v37  ;;  %v4030_v5 = vld [vmem:[#allocation2 + $0x1a8] sm:$0xf0] }
 0xe8e   :  { %v4033_v28 = vor.u32 %v4699_v1, %v4030_v5  ;;  %v4729_v1 = vld [vmem:[%s5826_s5 + $0xf0] sm:$0xff]  ;;  %v4719_v5 = vld [vmem:[%s5826_s5 + $0xa0] sm:$0xff] }
 0xe8f   :  { %v2190_v15 = vmul.f32 %v5616_v45, %v5616_v45 }
 0xe90   :  { %2374 = vmatpush.bf16.msra.mxu2 %v4033_v28  ;;  %v4727_v28 = vld [vmem:[%s5826_s5 + $0xe0] sm:$0xff] }
 0xe91   :  { %2197 = vadd.xlane.f32.xlu1 %v2190_v15 }
 0xec4   :  { %v2192_v54 = vpop.xlane.xlu1 %2191 }
 0xec5   :  { %v2199_v20 = vmul.f32 %v2192_v54, %v5226_v10  ;;  %v4722_v54 = vld [vmem:[%s5826_s5 + $0xb8] sm:$0xff] }
 0xec6   :  { %2560 = vmatpush.bf16.msra.mxu3 %v4722_v54 }
 0xec7   :  { %v2203_v22 = vadd.f32 1e-12, %v2199_v20  ;;  %v4728_v20 = vld [vmem:[%s5826_s5 + $0xe8] sm:$0xff] }
 0xec9   :  { %5006 = vrsqrt.f32 %v2203_v22  ;;  %vm2213_vm14 = vweird.f32 %v2203_v22 }
 0xecc   :  { %v2194_v29 = vpop.xlane.xlu2 %2193 }
 0xecd   :  { %v2200_v56 = vmul.f32 %v2194_v29, %v5226_v10  ;;  %v3889_v29 = vld [vmem:[%s5824_s3 + $0x7] ss:$2 sm:$0x3] }
 0xecf   :  { %v5007_v14 = vpop.eup %5006  ;;  %v2204_v31 = vadd.f32 1e-12, %v2200_v56  ;;  %v4726_v56 = vld [vmem:[%s5826_s5 + $0xd8] sm:$0xff] }
 0xed0   :  { %v2208_v34 = vmul.f32 %v5007_v14, %v2203_v22  ;;  %vm2214_vm13 = vweird.f32 %v5007_v14  ;;  %v4717_v22 = vld [vmem:[%s5826_s5 + $0x90] sm:$0xff] }
 0xed1   :  { %5008 = vrsqrt.f32 %v2204_v31  ;;  %vm2215_vm9 = vmor %vm2213_vm14, %vm2214_vm13  ;;  %vm2223_vm11 = vweird.f32 %v2204_v31 }
 0xed2   :  { %v2209_v23 = vmul.f32 %v5007_v14, %v2208_v34  ;;  %v4725_v34 = vld [vmem:[%s5826_s5 + $0xd0] sm:$0xff] }
 0xed4   :  { %v2210_v37 = vmul.f32 0.5, %v2209_v23 }
 0xed6   :  { %v2211_v15 = vsub.f32 1.5, %v2210_v37  ;;  %v4715_v37 = vld [vmem:[%s5826_s5 + $0x80] sm:$0xff] }
 0xed7   :  { %v5009_v38 = vpop.eup %5008 }
 0xed8   :  { %v2212_v46 = vmul.f32 %v5007_v14, %v2211_v15  ;;  %v2218_v39 = vmul.f32 %v5009_v38, %v2204_v31  ;;  %vm2224_vm10 = vweird.f32 %v5009_v38  ;;  %v5679_v31 = vperm.slane %v3889_v29, 0 }
 0xed9   :  { %vm2225_vm12 = vmor %vm2223_vm11, %vm2224_vm10 }
 0xeda   :  { %v2219_v40 = vmul.f32 %v5009_v38, %v2218_v39  ;;  %v2216_v35 = vsel %vm2215_vm9, %v5007_v14, %v2212_v46  ;;  %v4716_v14 = vld [vmem:[%s5826_s5 + $0x88] sm:$0xff]  ;;  %v5691_v39 = vperm.slane %v3889_v29, 1  ;;  %vm2693_vm9 = vcmask 1041409  }
 0xedb   :  { %v2247_v42 = vmul.f32 %v2216_v35, %v5601_v52 }
 0xedc   :  { %v2220_v57 = vmul.f32 0.5, %v2219_v40 }
 0xedd   :  { %v2252_v60 = vmul.f32 %v4894_v44, %v2247_v42 }
 0xede   :  { %v2221_v61 = vsub.f32 1.5, %v2220_v57  ;;  %v4723_v57 = vld [vmem:[%s5826_s5 + $0xc0] sm:$0xff] }
 0xedf   :  { %v5630_v33 = vadd.f32 %v4895_v53, %v2252_v60 }
 0xee0   :  { %v2222_v48 = vmul.f32 %v5009_v38, %v2221_v61 }
 0xee2   :  { %v2226_v49 = vsel %vm2225_vm12, %v5009_v38, %v2222_v48  ;;  %v4724_v38 = vld [vmem:[%s5826_s5 + $0xc8] sm:$0xff] }
 0xee3   :  { %v2248_v51 = vmul.f32 %v2226_v49, %v5606_v30 }
 0xee5   :  { %v2253_v63 = vmul.f32 %v4894_v44, %v2248_v51 }
 0xee7   :  { %v2258_v32 = vadd.f32 %v4895_v53, %v2253_v63 }
 0xee9   :  { %v2261_v52 = vpack.c.bf16 %v2258_v32, %v5630_v33 }
 0xeeb   :  { %2356 = vmatmul.bf16.vlgmr.msra.gmra.mxu1 %v2261_v52  ;;  %2375 = vmatmul.bf16.vlgmr.msra.gmra.mxu2 %v2261_v52 }
 0xefc   :  { %v2196_v24 = vpop.xlane.xlu0 %2195 }
 0xefd   :  { %v2201_v58 = vmul.f32 %v2196_v24, %v5226_v10 }
 0xeff   :  { %v2205_v59 = vadd.f32 1e-12, %v2201_v58 }
 0xf01   :  { %5010 = vrsqrt.f32 %v2205_v59  ;;  %vm2233_vm0 = vweird.f32 %v2205_v59 }
 0xf04   :  { %v2198_v18 = vpop.xlane.xlu1 %2197 }
 0xf05   :  { %v2202_v30 = vmul.f32 %v2198_v18, %v5226_v10 }
 0xf07   :  { %v5011_v62 = vpop.eup %5010  ;;  %v2206_v41 = vadd.f32 1e-12, %v2202_v30 }
 0xf08   :  { %v2228_v0 = vmul.f32 %v5011_v62, %v2205_v59  ;;  %vm2234_vm15 = vweird.f32 %v5011_v62 }
 0xf09   :  { %5012 = vrsqrt.f32 %v2206_v41  ;;  %vm2235_vm1 = vmor %vm2233_vm0, %vm2234_vm15  ;;  %vm2243_vm3 = vweird.f32 %v2206_v41 }
 0xf0a   :  { %v2229_v47 = vmul.f32 %v5011_v62, %v2228_v0 }
 0xf0c   :  { %v2230_v2 = vmul.f32 0.5, %v2229_v47 }
 0xf0e   :  { %v2231_v4 = vsub.f32 1.5, %v2230_v2 }
 0xf0f   :  { %v5013_v6 = vpop.eup %5012 }
 0xf10   :  { %v2232_v8 = vmul.f32 %v5011_v62, %v2231_v4  ;;  %v2238_v7 = vmul.f32 %v5013_v6, %v2206_v41  ;;  %vm2244_vm2 = vweird.f32 %v5013_v6 }
 0xf11   :  { %vm2245_vm4 = vmor %vm2243_vm3, %vm2244_vm2 }
 0xf12   :  { %v2239_v43 = vmul.f32 %v5013_v6, %v2238_v7  ;;  %v2236_v36 = vsel %vm2235_vm1, %v5011_v62, %v2232_v8 }
 0xf13   :  { %v2249_v17 = vmul.f32 %v2236_v36, %v5611_v50  ;;  %v4721_v50 = vld [vmem:[%s5826_s5 + $0xb0] sm:$0xff] }
 0xf14   :  { %v2240_v11 = vmul.f32 0.5, %v2239_v43  ;;  %2561 = vmatpush.bf16.msra.mxu3 %v4721_v50 }
 0xf15   :  { %v2254_v19 = vmul.f32 %v4894_v44, %v2249_v17 }
 0xf16   :  { %v2241_v12 = vsub.f32 1.5, %v2240_v11 }
 0xf17   :  { %v5637_v9 = vadd.f32 %v4895_v53, %v2254_v19 }
 0xf18   :  { %v2242_v13 = vmul.f32 %v5013_v6, %v2241_v12  ;;  %2562 = vmatpush.bf16.msra.mxu3 %v4720_v26 }
 0xf1a   :  { %v2246_v21 = vsel %vm2245_vm4, %v5013_v6, %v2242_v13 }
 0xf1b   :  { %v2250_v3 = vmul.f32 %v2246_v21, %v5616_v45  ;;  %v4730_v45 = vld [vmem:[%s5826_s5 + $0xf8] sm:$0xff] }
 0xf1c   :  { %2577 = vmatpush.bf16.msrb.mxu0 %v4730_v45  ;;  %2563 = vmatpush.bf16.msra.mxu3 %v4719_v5 }
 0xf1d   :  { %v2255_v55 = vmul.f32 %v4894_v44, %v2250_v3 }
 0xf1f   :  { %v2260_v16 = vadd.f32 %v4895_v53, %v2255_v55 }
 0xf20   :  { %2578 = vmatpush.bf16.msrb.mxu0 %v4729_v1  ;;  %2564 = vmatpush.bf16.msra.mxu3 %v4718_v27 }
 0xf21   :  { %v2262_v25 = vpack.c.bf16 %v2260_v16, %v5637_v9 }
 0xf23   :  { %2361 = vmatmul.bf16.gmra.mxu1 %v2262_v25  ;;  %2380 = vmatmul.bf16.gmra.mxu2 %v2262_v25 }
 0xf24   :  { %2579 = vmatpush.bf16.msrb.mxu0 %v4728_v20  ;;  %2565 = vmatpush.bf16.msra.mxu3 %v4717_v22 }
 0xf28   :  { %2580 = vmatpush.bf16.msrb.mxu0 %v4727_v28  ;;  %2566 = vmatpush.bf16.msra.mxu3 %v4716_v14 }
 0xf2c   :  { %2581 = vmatpush.bf16.msrb.mxu0 %v4726_v56  ;;  %2567 = vmatpush.bf16.msra.mxu3 %v4715_v37 }
 0xf30   :  { %2582 = vmatpush.bf16.msrb.mxu0 %v4725_v34 }
 0xf34   :  { %2583 = vmatpush.bf16.msrb.mxu0 %v4724_v38 }
 0xf38   :  { %2584 = vmatpush.bf16.msrb.mxu0 %v4723_v57 }
 0xf68   :  { %v2357_v23 = vpop.f32.mrf.mxu1 }
 0xf69   :  { %v2358_v15 = vadd.f32 %v2357_v23, %v5679_v31 }
 0xf6b   :  { %v2386_v46 = vmul.f32 %v2358_v15, %v2358_v15 }
 0xf6d   :  { %v2394_v40 = vmul.f32 %v2386_v46, %v2358_v15 }
 0xf6e   :  { %v2376_v35 = vpop.f32.mrf.mxu2 }
 0xf6f   :  { %v2402_v61 = vmul.f32 0.044715, %v2394_v40  ;;  %v2377_v42 = vadd.f32 %v2376_v35, %v5691_v39 }
 0xf70   :  { %v2359_v44 = vpop.f32.mrf.mxu1 }
 0xf71   :  { %v2410_v48 = vadd.f32 %v2402_v61, %v2358_v15  ;;  %v2387_v49 = vmul.f32 %v2377_v42, %v2377_v42  ;;  %v2360_v51 = vadd.f32 %v2359_v44, %v5679_v31 }
 0xf73   :  { %v2418_v60 = vmul.f32 0.7978846, %v2410_v48  ;;  %v2395_v53 = vmul.f32 %v2387_v49, %v2377_v42  ;;  %v2388_v63 = vmul.f32 %v2360_v51, %v2360_v51 }
 0xf75   :  { %v2403_v32 = vmul.f32 0.044715, %v2395_v53  ;;  %v2396_v52 = vmul.f32 %v2388_v63, %v2360_v51  ;;  %5014 = vtanh.f32 %v2418_v60 }
 0xf76   :  { %v2378_v24 = vpop.f32.mrf.mxu2 }
 0xf77   :  { %v2411_v58 = vadd.f32 %v2403_v32, %v2377_v42  ;;  %v2404_v59 = vmul.f32 0.044715, %v2396_v52  ;;  %v2379_v18 = vadd.f32 %v2378_v24, %v5691_v39 }
 0xf79   :  { %v2419_v30 = vmul.f32 0.7978846, %v2411_v58  ;;  %v2412_v62 = vadd.f32 %v2404_v59, %v2360_v51  ;;  %v2389_v41 = vmul.f32 %v2379_v18, %v2379_v18 }
 0xf7b   :  { %v2420_v0 = vmul.f32 0.7978846, %v2412_v62  ;;  %v2397_v47 = vmul.f32 %v2389_v41, %v2379_v18  ;;  %5016 = vtanh.f32 %v2419_v30  ;;  %v5015_v2 = vpop.eup %5014 }
 0xf7c   :  { %v2434_v8 = vadd.f32 1.0, %v5015_v2 }
 0xf7d   :  { %5018 = vtanh.f32 %v2420_v0  ;;  %v2405_v4 = vmul.f32 0.044715, %v2397_v47 }
 0xf7e   :  { %v2442_v36 = vmul.f32 0.5, %v2434_v8 }
 0xf7f   :  { %v2413_v6 = vadd.f32 %v2405_v4, %v2379_v18 }
 0xf80   :  { %v2450_v21 = vmul.f32 %v2442_v36, %v2358_v15 }
 0xf81   :  { %v2421_v7 = vmul.f32 0.7978846, %v2413_v6  ;;  %v5017_v43 = vpop.eup %5016 }
 0xf82   :  { %v2435_v17 = vadd.f32 1.0, %v5017_v43 }
 0xf83   :  { %v5019_v11 = vpop.eup %5018  ;;  %5020 = vtanh.f32 %v2421_v7 }
 0xf84   :  { %v2436_v12 = vadd.f32 1.0, %v5019_v11  ;;  %v2443_v55 = vmul.f32 0.5, %v2435_v17  ;;  %v4896_v11 = vld [vmem:[%s5823_s2 + $0xb] ss:$0 sm:$0xff] }
 0xf86   :  { %v2444_v13 = vmul.f32 0.5, %v2436_v12  ;;  %v2451_v50 = vmul.f32 %v2443_v55, %v2377_v42 }
 0xf88   :  { %v2452_v3 = vmul.f32 %v2444_v13, %v2360_v51 }
 0xf89   :  { %v5021_v19 = vpop.eup %5020 }
 0xf8a   :  { %v2458_v16 = vpack.c.bf16 %v2452_v3, %v2450_v21  ;;  %v2437_v25 = vadd.f32 1.0, %v5021_v19 }
 0xf8c   :  { %v2445_v54 = vmul.f32 0.5, %v2437_v25  ;;  %2568 = vmatmul.bf16.vlgmr.msra.gmra.mxu3 %v2458_v16 }
 0xf8e   :  { %v2453_v45 = vmul.f32 %v2445_v54, %v2379_v18 }
 0xf90   :  { %v2459_v26 = vpack.c.bf16 %v2453_v45, %v2451_v50 }
 0xf92   :  { %2585 = vmatmul.bf16.vlgmr.msrb.gmra.mxu0 %v2459_v26 }
 0xfa0   :  { %v2362_v1 = vpop.f32.mrf.mxu1 }
 0xfa1   :  { %v2363_v5 = vadd.f32 %v2362_v1, %v5679_v31 }
 0xfa3   :  { %v2390_v20 = vmul.f32 %v2363_v5, %v2363_v5 }
 0xfa5   :  { %v2398_v27 = vmul.f32 %v2390_v20, %v2363_v5 }
 0xfa6   :  { %v2381_v28 = vpop.f32.mrf.mxu2 }
 0xfa7   :  { %v2406_v22 = vmul.f32 0.044715, %v2398_v27  ;;  %v2382_v29 = vadd.f32 %v2381_v28, %v5691_v39 }
 0xfa8   :  { %v2364_v56 = vpop.f32.mrf.mxu1 }
 0xfa9   :  { %v2414_v14 = vadd.f32 %v2406_v22, %v2363_v5  ;;  %v2391_v34 = vmul.f32 %v2382_v29, %v2382_v29  ;;  %v2365_v23 = vadd.f32 %v2364_v56, %v5679_v31  ;;  %v4268_v56 = vld [vmem:[#allocation5 + $0xe0] sm:$0xf] }
 0xfab   :  { %v2422_v37 = vmul.f32 0.7978846, %v2414_v14  ;;  %v2399_v15 = vmul.f32 %v2391_v34, %v2382_v29  ;;  %v2392_v38 = vmul.f32 %v2365_v23, %v2365_v23  ;;  %v4761_v14 = vld [vmem:[#allocation5 + $0xec] sm:$0xf0]  ;;  %v4759_v34 = vld [vmem:[#allocation5 + $0xe4] sm:$0xf] }
 0xfad   :  { %v2407_v46 = vmul.f32 0.044715, %v2399_v15  ;;  %v2400_v40 = vmul.f32 %v2392_v38, %v2365_v23  ;;  %5022 = vtanh.f32 %v2422_v37  ;;  %v4270_v37 = vld [vmem:[#allocation5 + $0xf0] sm:$0xf0]  ;;  %v4276_v15 = vld [vmem:[#allocation5 + $0xe8] sm:$0xf] }
 0xfae   :  { %v2383_v35 = vpop.f32.mrf.mxu2  ;;  %v4762_v38 = vld [vmem:[#allocation5 + $0xf4] sm:$0xf0] }
 0xfaf   :  { %v2415_v57 = vadd.f32 %v2407_v46, %v2382_v29  ;;  %v2408_v61 = vmul.f32 0.044715, %v2400_v40  ;;  %v2384_v42 = vadd.f32 %v2383_v35, %v5691_v39  ;;  %v4273_v40 = vor.u32 %v4759_v34, %v4270_v37  ;;  %v4741_v37 = vld [vmem:[#allocation5 + $0x4c] sm:$0xf0] }
 0xfb0   :  { %v4277_v35 = vor.u32 %v4762_v38, %v4276_v15  ;;  %v4739_v15 = vld [vmem:[#allocation5 + $0x44] sm:$0xf] }
 0xfb1   :  { %v2423_v44 = vmul.f32 0.7978846, %v2415_v57  ;;  %v2416_v48 = vadd.f32 %v2408_v61, %v2365_v23  ;;  %v2393_v49 = vmul.f32 %v2384_v42, %v2384_v42  ;;  %v4760_v57 = vld [vmem:[#allocation5 + $0xec] sm:$0xf]  ;;  %v4278_v61 = vld [vmem:[#allocation5 + $0xf8] sm:$0xf0]  ;;  %2870 = vmatpush.bf16.msrb.mxu2 %v4273_v40 }
 0xfb2   :  { %2883 = vmatpush.bf16.msrb.mxu3 %v4277_v35  ;;  %v4196_v40 = vld [vmem:[#allocation5 + $0x48] sm:$0xf]  ;;  %v4742_v35 = vld [vmem:[#allocation5 + $0x54] sm:$0xf0] }
 0xfb3   :  { %v2424_v51 = vmul.f32 0.7978846, %v2416_v48  ;;  %v2401_v60 = vmul.f32 %v2393_v49, %v2384_v42  ;;  %5024 = vtanh.f32 %v2423_v44  ;;  %v5023_v53 = vpop.eup %5022  ;;  %v4252_v44 = vld [vmem:[#allocation5 + $0xc0] sm:$0xf]  ;;  %v4757_v48 = vld [vmem:[#allocation5 + $0xcc] sm:$0xf0] }
 0xfb4   :  { %v2438_v32 = vadd.f32 1.0, %v5023_v53  ;;  %v4755_v49 = vld [vmem:[#allocation5 + $0xc4] sm:$0xf]  ;;  %v4260_v53 = vld [vmem:[#allocation5 + $0xc8] sm:$0xf] }
 0xfb5   :  { %5026 = vtanh.f32 %v2424_v51  ;;  %v2409_v31 = vmul.f32 0.044715, %v2401_v60  ;;  %v4253_v51 = vor.u32 %v4757_v48, %v4252_v44  ;;  %v4254_v60 = vld [vmem:[#allocation5 + $0xd0] sm:$0xf0]  ;;  %v4198_v44 = vld [vmem:[#allocation5 + $0x58] sm:$0xf0] }
 0xfb6   :  { %v2446_v18 = vmul.f32 0.5, %v2438_v32  ;;  %v4257_v32 = vor.u32 %v4755_v49, %v4254_v60  ;;  %v4172_v48 = vld [vmem:[#allocation5 + $0x20] sm:$0xf]  ;;  %v4735_v60 = vld [vmem:[#allocation5 + $0x24] sm:$0xf] }
 0xfb7   :  { %v2417_v63 = vadd.f32 %v2409_v31, %v2384_v42  ;;  %v4758_v31 = vld [vmem:[#allocation5 + $0xd4] sm:$0xf0] }
 0xfb8   :  { %v2454_v39 = vmul.f32 %v2446_v18, %v2363_v5  ;;  %2871 = vmatpush.bf16.msrb.mxu2 %v4257_v32  ;;  %v4236_v18 = vld [vmem:[#allocation5 + $0xa0] sm:$0xf] }
 0xfb9   :  { %v2425_v52 = vmul.f32 0.7978846, %v2417_v63  ;;  %v5025_v24 = vpop.eup %5024 }
 0xfba   :  { %v2439_v62 = vadd.f32 1.0, %v5025_v24  ;;  %v4756_v24 = vld [vmem:[#allocation5 + $0xcc] sm:$0xf] }
 0xfbb   :  { %v5027_v58 = vpop.eup %5026  ;;  %5028 = vtanh.f32 %v2425_v52  ;;  %v4261_v52 = vor.u32 %v4758_v31, %v4260_v53  ;;  %v4174_v53 = vld [vmem:[#allocation5 + $0x30] sm:$0xf0] }
 0xfbc   :  { %v2440_v59 = vadd.f32 1.0, %v5027_v58  ;;  %v2447_v4 = vmul.f32 0.5, %v2439_v62  ;;  %v4262_v58 = vld [vmem:[#allocation5 + $0xd8] sm:$0xf0]  ;;  %v4751_v62 = vld [vmem:[#allocation5 + $0xa4] sm:$0xf] }
 0xfbd   :  { %2884 = vmatpush.bf16.msrb.mxu3 %v4261_v52  ;;  %v4180_v52 = vld [vmem:[#allocation5 + $0x28] sm:$0xf] }
 0xfbe   :  { %v2448_v30 = vmul.f32 0.5, %v2440_v59  ;;  %v2455_v8 = vmul.f32 %v2447_v4, %v2382_v29  ;;  %v4265_v59 = vor.u32 %v4756_v24, %v4262_v58  ;;  %v4738_v24 = vld [vmem:[#allocation5 + $0x34] sm:$0xf0]  ;;  %v4736_v58 = vld [vmem:[#allocation5 + $0x2c] sm:$0xf] }
 0xfc0   :  { %v2456_v41 = vmul.f32 %v2448_v30, %v2365_v23  ;;  %v4269_v23 = vor.u32 %v4761_v14, %v4268_v56  ;;  %v4753_v30 = vld [vmem:[#allocation5 + $0xac] sm:$0xf0]  ;;  %v4214_v56 = vld [vmem:[#allocation5 + $0x78] sm:$0xf0] }
 0xfc1   :  { %v5029_v0 = vpop.eup %5028 }
 0xfc2   :  { %v2460_v47 = vpack.c.bf16 %v2456_v41, %v2454_v39  ;;  %v2441_v2 = vadd.f32 1.0, %v5029_v0  ;;  %2857 = vmatpush.bf16.msrb.mxu1 %v4269_v23  ;;  %v4237_v39 = vor.u32 %v4753_v30, %v4236_v18  ;;  %v4238_v41 = vld [vmem:[#allocation5 + $0xb0] sm:$0xf0]  ;;  %v4244_v0 = vld [vmem:[#allocation5 + $0xa8] sm:$0xf]  ;;  %v4181_v18 = vor.u32 %v4738_v24, %v4180_v52 }
 0xfc3   :  { %v4188_v23 = vld [vmem:[#allocation5 + $0x40] sm:$0xf]  ;;  %v4182_v30 = vld [vmem:[#allocation5 + $0x38] sm:$0xf0]  ;;  %v4772_v52 = vld [vmem:[#allocation7 + $0x44] sm:$0xf0] }
 0xfc4   :  { %2572 = vmatmul.bf16.gmra.mxu3 %v2460_v47  ;;  %v2449_v6 = vmul.f32 0.5, %v2441_v2  ;;  %v4754_v47 = vld [vmem:[#allocation5 + $0xb4] sm:$0xf0]  ;;  %v4241_v2 = vor.u32 %v4751_v62, %v4238_v41  ;;  %v4189_v38 = vor.u32 %v4741_v37, %v4188_v23  ;;  %v4156_v62 = vld [vmem:[#allocation5] sm:$0xf]  ;;  %v4185_v41 = vor.u32 %v4736_v58, %v4182_v30 }
 0xfc5   :  { %v4245_v4 = vor.u32 %v4754_v47, %v4244_v0  ;;  %v4731_v0 = vld [vmem:[#allocation5 + $0x4] sm:$0xf]  ;;  %v4158_v47 = vld [vmem:[#allocation5 + $0x10] sm:$0xf0]  ;;  %v4509_v24 = vld [vmem:[#allocation7 + $0x1c0] sm:$0xf] }
 0xfc6   :  { %v2457_v7 = vmul.f32 %v2449_v6, %v2384_v42  ;;  %v4281_v42 = vor.u32 %v4760_v57, %v4278_v61  ;;  %2858 = vmatpush.bf16.msrb.mxu1 %v4253_v51  ;;  %v4752_v6 = vld [vmem:[#allocation5 + $0xac] sm:$0xf]  ;;  %2872 = vmatpush.bf16.msrb.mxu2 %v4241_v2  ;;  %v4197_v61 = vor.u32 %v4742_v35, %v4196_v40  ;;  %v4737_v51 = vld [vmem:[#allocation5 + $0x2c] sm:$0xf0]  ;;  %v4164_v2 = vld [vmem:[#allocation5 + $0x8] sm:$0xf] }
 0xfc7   :  { %2885 = vmatpush.bf16.msrb.mxu3 %v4245_v4  ;;  %v4173_v32 = vor.u32 %v4737_v51, %v4172_v48  ;;  %v4822_v35 = vld [vmem:[#allocation7 + $0x1d4] sm:$0xf0]  ;;  %v4461_v48 = vld [vmem:[#allocation7 + $0x160] sm:$0xf]  ;;  %v4897_v51 = vld [vmem:[%s5823_s2 + $0xc] ss:$0 sm:$0xff] }
 0xfc8   :  { %v2461_v43 = vpack.c.bf16 %v2457_v7, %v2455_v8  ;;  %2896 = vmatpush.bf16.msra.mxu0 %v4281_v42  ;;  %v4246_v8 = vld [vmem:[#allocation5 + $0xb8] sm:$0xf0]  ;;  %v4740_v42 = vld [vmem:[#allocation5 + $0x4c] sm:$0xf] }
 0xfc9   :  { %v4249_v7 = vor.u32 %v4752_v6, %v4246_v8  ;;  %v4201_v49 = vor.u32 %v4740_v42, %v4198_v44  ;;  %v4734_v6 = vld [vmem:[#allocation5 + $0x14] sm:$0xf0]  ;;  %v4732_v8 = vld [vmem:[#allocation5 + $0xc] sm:$0xf] }
 0xfca   :  { %2589 = vmatmul.bf16.gmra.mxu0 %v2461_v43  ;;  %2859 = vmatpush.bf16.msrb.mxu1 %v4237_v39  ;;  %v4220_v43 = vld [vmem:[#allocation5 + $0x80] sm:$0xf]  ;;  %v4733_v39 = vld [vmem:[#allocation5 + $0xc] sm:$0xf0] }
 0xfcc   :  { %2897 = vmatpush.bf16.msra.mxu0 %v4265_v59  ;;  %v4177_v59 = vor.u32 %v4735_v60, %v4174_v53 }
 0xfd0   :  { %2898 = vmatpush.bf16.msra.mxu0 %v4249_v7  ;;  %v4166_v7 = vld [vmem:[#allocation5 + $0x18] sm:$0xf0] }
0x100f   :  { %v2569_v36 = vpop.f32.mrf.mxu3  ;;  %v2586_v12 = vpop.f32.mrf.mxu0 }
0x1010   :  { %v2570_v17 = vadd.f32 %v4896_v11, %v2569_v36  ;;  %v4747_v36 = vld [vmem:[#allocation5 + $0x84] sm:$0xf] }
0x1012   :  { %v2587_v13 = vadd.f32 %v2586_v12, %v2570_v17  ;;  %v4222_v17 = vld [vmem:[#allocation5 + $0x90] sm:$0xf0] }
0x1014   :  { %v2594_v21 = vadd.f32 %v2587_v13, %v5630_v33  ;;  %v4228_v13 = vld [vmem:[#allocation5 + $0x88] sm:$0xf] }
0x1016   :  { %2598 = vadd.xlane.f32.xlu0 %v2594_v21 }
0x1017   :  { %v2571_v3 = vpop.f32.mrf.mxu3  ;;  %v2588_v19 = vpop.f32.mrf.mxu0 }
0x1018   :  { %v4225_v3 = vor.u32 %v4747_v36, %v4222_v17  ;;  %v4157_v36 = vor.u32 %v4733_v39, %v4156_v62  ;;  %v4165_v17 = vor.u32 %v4734_v6, %v4164_v2  ;;  %v4453_v39 = vld [vmem:[#allocation7 + $0x150] sm:$0xf] }
0x1019   :  { %v4309_v2 = vld [vmem:[#allocation7 + $0x30] sm:$0xf] }
0x101a   :  { %2873 = vmatpush.bf16.msrb.mxu2 %v4225_v3 }
0x1047   :  { %v2573_v55 = vpop.f32.mrf.mxu3  ;;  %v2590_v16 = vpop.f32.mrf.mxu0 }
0x1048   :  { %v2574_v25 = vadd.f32 %v4896_v11, %v2573_v55  ;;  %v4749_v11 = vld [vmem:[#allocation5 + $0x8c] sm:$0xf0]  ;;  %v4748_v55 = vld [vmem:[#allocation5 + $0x8c] sm:$0xf] }
0x1049   :  { %v4221_v12 = vor.u32 %v4749_v11, %v4220_v43 }
0x104a   :  { %v2591_v54 = vadd.f32 %v2590_v16, %v2574_v25  ;;  %v4230_v16 = vld [vmem:[#allocation5 + $0x98] sm:$0xf0] }
0x104b   :  { %2860 = vmatpush.bf16.msrb.mxu1 %v4221_v12  ;;  %v4233_v25 = vor.u32 %v4748_v55, %v4230_v16  ;;  %v4161_v12 = vor.u32 %v4731_v0, %v4158_v47  ;;  %v4778_v55 = vld [vmem:[#allocation7 + $0x74] sm:$0xf0]  ;;  %v4533_v16 = vld [vmem:[#allocation7 + $0x1f0] sm:$0xf] }
0x104c   :  { %v2595_v50 = vadd.f32 %v2591_v54, %v5637_v9 }
0x104d   :  { %2899 = vmatpush.bf16.msra.mxu0 %v4233_v25 }
0x104e   :  { %2600 = vadd.xlane.f32.xlu2 %v2595_v50 }
0x104f   :  { %v2575_v45 = vpop.f32.mrf.mxu3  ;;  %v2592_v26 = vpop.f32.mrf.mxu0 }
0x1050   :  { %v4745_v45 = vld [vmem:[#allocation5 + $0x6c] sm:$0xf0]  ;;  %v4743_v26 = vld [vmem:[#allocation5 + $0x64] sm:$0xf] }
0x1089   :  { %v2599_v1 = vpop.xlane.xlu0 %2598 }
0x108a   :  { %v2602_v5 = vmul.f32 %v2599_v1, %v5226_v10 }
0x108c   :  { %v5709_v20 = vsub.f32 %v2594_v21, %v2602_v5  ;;  %v4750_v21 = vld [vmem:[#allocation5 + $0x94] sm:$0xf0]  ;;  %v4206_v5 = vld [vmem:[#allocation5 + $0x70] sm:$0xf0] }
0x108d   :  { %v4229_v19 = vor.u32 %v4750_v21, %v4228_v13  ;;  %v4169_v21 = vor.u32 %v4732_v8, %v4166_v7  ;;  %v4770_v8 = vld [vmem:[#allocation7 + $0x34] sm:$0xf0]  ;;  %v4381_v7 = vld [vmem:[#allocation7 + $0xc0] sm:$0xf] }
0x108e   :  { %v2606_v33 = vmul.f32 %v5709_v20, %v5709_v20 }
0x108f   :  { %2886 = vmatpush.bf16.msrb.mxu3 %v4229_v19  ;;  %v4341_v19 = vld [vmem:[#allocation7 + $0x70] sm:$0xf] }
0x1090   :  { %2608 = vadd.xlane.f32.xlu2 %v2606_v33  ;;  %v4212_v33 = vld [vmem:[#allocation5 + $0x68] sm:$0xf]  ;;  %v4342_v25 = vor.u32 %v4778_v55, %v4341_v19 }
0x10c1   :  { %v2601_v27 = vpop.xlane.xlu2 %2600 }
0x10c2   :  { %v2603_v28 = vmul.f32 %v2601_v27, %v5226_v10  ;;  %v4746_v27 = vld [vmem:[#allocation5 + $0x74] sm:$0xf0] }
0x10c4   :  { %v5714_v22 = vsub.f32 %v2595_v50, %v2603_v28  ;;  %v4204_v50 = vld [vmem:[#allocation5 + $0x60] sm:$0xf]  ;;  %v4209_v28 = vor.u32 %v4743_v26, %v4206_v5  ;;  %v4776_v26 = vld [vmem:[#allocation7 + $0x64] sm:$0xf0] }
0x10c5   :  { %v4205_v1 = vor.u32 %v4745_v45, %v4204_v50  ;;  %v4826_v50 = vld [vmem:[#allocation7 + $0x1f4] sm:$0xf0]  ;;  %v4333_v45 = vld [vmem:[#allocation7 + $0x60] sm:$0xf] }
0x10c6   :  { %v2607_v9 = vmul.f32 %v5714_v22, %v5714_v22  ;;  %2874 = vmatpush.bf16.msrb.mxu2 %v4209_v28  ;;  %v4525_v5 = vld [vmem:[#allocation7 + $0x1e0] sm:$0xf]  ;;  %v4334_v28 = vor.u32 %v4776_v26, %v4333_v45  ;;  %v4786_v45 = vld [vmem:[#allocation7 + $0xb4] sm:$0xf0] }
0x10c7   :  { %2861 = vmatpush.bf16.msrb.mxu1 %v4205_v1  ;;  %v4802_v26 = vld [vmem:[#allocation7 + $0x134] sm:$0xf0] }
0x10c8   :  { %2610 = vadd.xlane.f32.xlu1 %v2607_v9  ;;  %v4213_v9 = vor.u32 %v4746_v27, %v4212_v33  ;;  %v4824_v33 = vld [vmem:[#allocation7 + $0x1e4] sm:$0xf0]  ;;  %v4405_v27 = vld [vmem:[#allocation7 + $0xf0] sm:$0xf] }
0x10ca   :  { %2887 = vmatpush.bf16.msrb.mxu3 %v4213_v9  ;;  %v4794_v9 = vld [vmem:[#allocation7 + $0xf4] sm:$0xf0] }
0x10cb   :  { %2862 = vmatpush.bf16.msrb.mxu1 %v4189_v38  ;;  %v4406_v23 = vor.u32 %v4794_v9, %v4405_v27  ;;  %v4774_v38 = vld [vmem:[#allocation7 + $0x54] sm:$0xf0]  ;;  %v4816_v9 = vld [vmem:[#allocation7 + $0x1a4] sm:$0xf0] }
0x10ce   :  { %2888 = vmatpush.bf16.msrb.mxu3 %v4197_v61  ;;  %v4792_v61 = vld [vmem:[#allocation7 + $0xe4] sm:$0xf0] }
0x10cf   :  { %2863 = vmatpush.bf16.msrb.mxu1 %v4173_v32  ;;  %v4317_v32 = vld [vmem:[#allocation7 + $0x40] sm:$0xf] }
0x10d0   :  { %v4318_v6 = vor.u32 %v4772_v52, %v4317_v32  ;;  %v4798_v32 = vld [vmem:[#allocation7 + $0x114] sm:$0xf0] }
0x10d2   :  { %2889 = vmatpush.bf16.msrb.mxu3 %v4181_v18  ;;  %v4790_v18 = vld [vmem:[#allocation7 + $0xd4] sm:$0xf0] }
0x10d3   :  { %2864 = vmatpush.bf16.msrb.mxu1 %v4157_v36  ;;  %v4445_v36 = vld [vmem:[#allocation7 + $0x140] sm:$0xf] }
0x10d6   :  { %2890 = vmatpush.bf16.msrb.mxu3 %v4165_v17 }
0x10d7   :  { %3308 = vmatpush.bf16.msra.mxu1 %v4342_v25 }
0x10db   :  { %3309 = vmatpush.bf16.msra.mxu1 %v4334_v28  ;;  %v4493_v28 = vld [vmem:[#allocation7 + $0x1a0] sm:$0xf] }
0x1103   :  { %v2609_v29 = vpop.xlane.xlu2 %2608 }
0x1104   :  { %v2612_v46 = vmul.f32 %v2609_v29, %v5226_v10  ;;  %v4744_v29 = vld [vmem:[#allocation5 + $0x6c] sm:$0xf] }
0x1105   :  { %v4217_v34 = vor.u32 %v4744_v29, %v4214_v56  ;;  %v4469_v29 = vld [vmem:[#allocation7 + $0x170] sm:$0xf]  ;;  %v4810_v56 = vld [vmem:[#allocation7 + $0x174] sm:$0xf0] }
0x1106   :  { %v5719_v63 = vadd.f32 1e-12, %v2612_v46  ;;  %v4190_v46 = vld [vmem:[#allocation5 + $0x50] sm:$0xf0]  ;;  %v4470_v37 = vor.u32 %v4810_v56, %v4469_v29 }
0x1107   :  { %2900 = vmatpush.bf16.msra.mxu0 %v4217_v34  ;;  %v4193_v57 = vor.u32 %v4739_v15, %v4190_v46  ;;  %v4526_v34 = vor.u32 %v4824_v33, %v4525_v5  ;;  %v4325_v15 = vld [vmem:[#allocation7 + $0x50] sm:$0xf]  ;;  %v4301_v5 = vld [vmem:[#allocation7 + $0x20] sm:$0xf]  ;;  %v4768_v33 = vld [vmem:[#allocation7 + $0x24] sm:$0xf0] }
0x1108   :  { %5030 = vrsqrt.f32 %v5719_v63  ;;  %vm2622_vm6 = vweird.f32 %v5719_v63  ;;  %v4517_v46 = vld [vmem:[#allocation7 + $0x1d0] sm:$0xf]  ;;  %3334 = vmatpush.bf16.msra.mxu3 %v4470_v37  ;;  %v4326_v53 = vor.u32 %v4774_v38, %v4325_v15  ;;  %v4784_v37 = vld [vmem:[#allocation7 + $0xa4] sm:$0xf0]  ;;  %v4429_v15 = vld [vmem:[#allocation7 + $0x120] sm:$0xf] }
0x1109   :  { %2875 = vmatpush.bf16.msrb.mxu2 %v4193_v57  ;;  %v4397_v57 = vld [vmem:[#allocation7 + $0xe0] sm:$0xf]  ;;  %v4518_v58 = vor.u32 %v4822_v35, %v4517_v46  ;;  %v4800_v38 = vld [vmem:[#allocation7 + $0x124] sm:$0xf0]  ;;  %v4766_v35 = vld [vmem:[#allocation7 + $0x14] sm:$0xf0] }
0x110a   :  { %v4398_v44 = vor.u32 %v4792_v61, %v4397_v57  ;;  %3310 = vmatpush.bf16.msra.mxu1 %v4326_v53  ;;  %v4485_v61 = vld [vmem:[#allocation7 + $0x190] sm:$0xf]  ;;  %v4782_v53 = vld [vmem:[#allocation7 + $0x94] sm:$0xf0] }
0x110b   :  { %2901 = vmatpush.bf16.msra.mxu0 %v4201_v49  ;;  %v4808_v49 = vld [vmem:[#allocation7 + $0x164] sm:$0xf0] }
0x110d   :  { %2876 = vmatpush.bf16.msrb.mxu2 %v4177_v59  ;;  %v4389_v59 = vld [vmem:[#allocation7 + $0xd0] sm:$0xf] }
0x110e   :  { %v5722_v54 = vpop.eup %5030  ;;  %v4390_v0 = vor.u32 %v4790_v18, %v4389_v59  ;;  %3311 = vmatpush.bf16.msra.mxu1 %v4318_v6  ;;  %v4477_v59 = vld [vmem:[#allocation7 + $0x180] sm:$0xf]  ;;  %v4812_v18 = vld [vmem:[#allocation7 + $0x184] sm:$0xf0] }
0x110f   :  { %v2617_v14 = vmul.f32 %v5722_v54, %v5719_v63  ;;  %vm2623_vm5 = vweird.f32 %v5722_v54  ;;  %2902 = vmatpush.bf16.msra.mxu0 %v4185_v41  ;;  %v4534_v63 = vor.u32 %v4826_v50, %v4533_v16  ;;  %v4806_v41 = vld [vmem:[#allocation7 + $0x154] sm:$0xf0]  ;;  %v4373_v16 = vld [vmem:[#allocation7 + $0xb0] sm:$0xf]  ;;  %v4310_v50 = vor.u32 %v4770_v8, %v4309_v2  ;;  %v4349_v6 = vld [vmem:[#allocation7 + $0x80] sm:$0xf] }
0x1110   :  { %vm5733_vm7 = vmor %vm2622_vm6, %vm2623_vm5  ;;  %v4454_v47 = vor.u32 %v4806_v41, %v4453_v39  ;;  %v4374_v56 = vor.u32 %v4786_v45, %v4373_v16  ;;  %v4343_v41 = vld [vmem:[#allocation7 + $0x78] sm:$0xf0]  ;;  %v4780_v8 = vld [vmem:[#allocation7 + $0x84] sm:$0xf0] }
0x1111   :  { %v2618_v31 = vmul.f32 %v5722_v54, %v2617_v14  ;;  %2877 = vmatpush.bf16.msrb.mxu2 %v4161_v12  ;;  %v4775_v16 = vld [vmem:[#allocation7 + $0x64] sm:$0xf]  ;;  %v4527_v45 = vld [vmem:[#allocation7 + $0x1e8] sm:$0xf0] }
0x1112   :  { %3312 = vmatpush.bf16.msra.mxu1 %v4310_v50  ;;  %v4823_v50 = vld [vmem:[#allocation7 + $0x1e4] sm:$0xf] }
0x1113   :  { %v2619_v43 = vmul.f32 0.5, %v2618_v31  ;;  %2903 = vmatpush.bf16.msra.mxu0 %v4169_v21  ;;  %v4462_v31 = vor.u32 %v4808_v49, %v4461_v48  ;;  %v4898_v21 = vld [vmem:[%s5823_s2 + $0xd] ss:$0 sm:$0xff]  ;;  %v4430_v49 = vor.u32 %v4800_v38, %v4429_v15  ;;  %v4807_v15 = vld [vmem:[#allocation7 + $0x164] sm:$0xf] }
0x1114   :  { %v4463_v38 = vld [vmem:[#allocation7 + $0x168] sm:$0xf0] }
0x1115   :  { %v2620_v3 = vsub.f32 1.5, %v2619_v43  ;;  %3321 = vmatpush.bf16.msra.mxu2 %v4406_v23  ;;  %3335 = vmatpush.bf16.msra.mxu3 %v4462_v31  ;;  %v4302_v23 = vor.u32 %v4768_v33, %v4301_v5  ;;  %v4421_v31 = vld [vmem:[#allocation7 + $0x110] sm:$0xf]  ;;  %v4530_v33 = vor.u32 %v4823_v50, %v4527_v45  ;;  %v4799_v45 = vld [vmem:[#allocation7 + $0x124] sm:$0xf] }
0x1116   :  { %v4422_v2 = vor.u32 %v4798_v32, %v4421_v31  ;;  %v4769_v31 = vld [vmem:[#allocation7 + $0x34] sm:$0xf]  ;;  %v4311_v32 = vld [vmem:[#allocation7 + $0x38] sm:$0xf0] }
0x1117   :  { %v2621_v1 = vmul.f32 %v5722_v54, %v2620_v3  ;;  %3347 = vmatpush.bf16.msrb.mxu0 %v4534_v63  ;;  %v4501_v3 = vld [vmem:[#allocation7 + $0x1b0] sm:$0xf]  ;;  %3313 = vmatpush.bf16.msra.mxu1 %v4302_v23  ;;  %v4399_v23 = vld [vmem:[#allocation7 + $0xe8] sm:$0xf0] }
0x1119   :  { %v2625_v42 = vsel %vm5733_vm7, %v5722_v54, %v2621_v1  ;;  %v4820_v54 = vld [vmem:[#allocation7 + $0x1c4] sm:$0xf0]  ;;  %3322 = vmatpush.bf16.msra.mxu2 %v4398_v44  ;;  %3336 = vmatpush.bf16.msra.mxu3 %v4454_v47 }
0x111a   :  { %v2636_v30 = vmul.f32 %v2625_v42, %v5709_v20  ;;  %v4510_v43 = vor.u32 %v4820_v54, %v4509_v24  ;;  %v4804_v20 = vld [vmem:[#allocation7 + $0x144] sm:$0xf0]  ;;  %v4814_v42 = vld [vmem:[#allocation7 + $0x194] sm:$0xf0] }
0x111b   :  { %3348 = vmatpush.bf16.msrb.mxu0 %v4526_v34  ;;  %v4446_v55 = vor.u32 %v4804_v20, %v4445_v36  ;;  %v4486_v24 = vor.u32 %v4814_v42, %v4485_v61  ;;  %v4764_v54 = vld [vmem:[#allocation7 + $0x4] sm:$0xf0]  ;;  %v4793_v36 = vld [vmem:[#allocation7 + $0xf4] sm:$0xf]  ;;  %v4511_v61 = vld [vmem:[#allocation7 + $0x1c8] sm:$0xf0] }
0x111c   :  { %v2639_v12 = vmul.f32 %v4897_v51, %v2636_v30  ;;  %v4777_v30 = vld [vmem:[#allocation7 + $0x74] sm:$0xf] }
0x111d   :  { %3323 = vmatpush.bf16.msra.mxu2 %v4390_v0  ;;  %3337 = vmatpush.bf16.msra.mxu3 %v4446_v55  ;;  %v4825_v0 = vld [vmem:[#allocation7 + $0x1f4] sm:$0xf] }
0x111e   :  { %v2642_v27 = vadd.f32 %v4898_v21, %v2639_v12 }
0x111f   :  { %3349 = vmatpush.bf16.msrb.mxu0 %v4518_v58  ;;  %v4285_v58 = vld [vmem:[#allocation7] sm:$0xf] }
0x1120   :  { %v2676_v57 = vpack.c.bf16 %v2642_v27, %v2642_v27  ;;  %v4286_v12 = vor.u32 %v4764_v54, %v4285_v58  ;;  %v4773_v27 = vld [vmem:[#allocation7 + $0x54] sm:$0xf]  ;;  %v4503_v58 = vld [vmem:[#allocation7 + $0x1b8] sm:$0xf0] }
0x1123   :  { %3350 = vmatpush.bf16.msrb.mxu0 %v4510_v43  ;;  %v4413_v43 = vld [vmem:[#allocation7 + $0x100] sm:$0xf] }
0x113b   :  { %v2611_v4 = vpop.xlane.xlu1 %2610 }
0x113c   :  { %v2613_v11 = vmul.f32 %v2611_v4, %v5226_v10  ;;  %v4818_v10 = vld [vmem:[#allocation7 + $0x1b4] sm:$0xf0] }
0x113d   :  { %v4502_v63 = vor.u32 %v4818_v10, %v4501_v3  ;;  %v4809_v3 = vld [vmem:[#allocation7 + $0x174] sm:$0xf]  ;;  %v4471_v10 = vld [vmem:[#allocation7 + $0x178] sm:$0xf0] }
0x113e   :  { %v5729_v13 = vadd.f32 1e-12, %v2613_v11  ;;  %v4788_v11 = vld [vmem:[#allocation7 + $0xc4] sm:$0xf0] }
0x113f   :  { %v4382_v19 = vor.u32 %v4788_v11, %v4381_v7  ;;  %3351 = vmatpush.bf16.msrb.mxu0 %v4502_v63  ;;  %v4796_v11 = vld [vmem:[#allocation7 + $0x104] sm:$0xf0]  ;;  %v4474_v63 = vor.u32 %v4809_v3, %v4471_v10  ;;  %v4813_v3 = vld [vmem:[#allocation7 + $0x194] sm:$0xf] }
0x1140   :  { %5032 = vrsqrt.f32 %v5729_v13  ;;  %vm2632_vm13 = vweird.f32 %v5729_v13 }
0x1141   :  { %3324 = vmatpush.bf16.msra.mxu2 %v4382_v19  ;;  %v4346_v19 = vor.u32 %v4777_v30, %v4343_v41  ;;  %v4803_v30 = vld [vmem:[#allocation7 + $0x144] sm:$0xf] }
0x1145   :  { %3325 = vmatpush.bf16.msra.mxu2 %v4374_v56  ;;  %v4519_v56 = vld [vmem:[#allocation7 + $0x1d8] sm:$0xf0] }
0x1146   :  { %v5738_v14 = vpop.eup %5032 }
0x1147   :  { %v2627_v40 = vmul.f32 %v5738_v14, %v5729_v13  ;;  %vm2633_vm8 = vweird.f32 %v5738_v14  ;;  %v4437_v13 = vld [vmem:[#allocation7 + $0x130] sm:$0xf] }
0x1148   :  { %vm2634_vm14 = vmor %vm2632_vm13, %vm2633_vm8  ;;  %v4438_v34 = vor.u32 %v4802_v26, %v4437_v13  ;;  %v4350_v13 = vor.u32 %v4780_v8, %v4349_v6  ;;  %v4414_v26 = vor.u32 %v4796_v11, %v4413_v43  ;;  %v4495_v6 = vld [vmem:[#allocation7 + $0x1a8] sm:$0xf0]  ;;  %v4375_v43 = vld [vmem:[#allocation7 + $0xb8] sm:$0xf0] }
0x1149   :  { %v2628_v60 = vmul.f32 %v5738_v14, %v2627_v40  ;;  %v4293_v40 = vld [vmem:[#allocation7 + $0x10] sm:$0xf]  ;;  %v4801_v11 = vld [vmem:[#allocation7 + $0x134] sm:$0xf] }
0x114a   :  { %3338 = vmatpush.bf16.msra.mxu3 %v4438_v34 }
0x114b   :  { %v2629_v62 = vmul.f32 0.5, %v2628_v60  ;;  %v4294_v60 = vor.u32 %v4766_v35, %v4293_v40  ;;  %v4319_v40 = vld [vmem:[#allocation7 + $0x48] sm:$0xf0]  ;;  %v4819_v35 = vld [vmem:[#allocation7 + $0x1c4] sm:$0xf] }
0x114c   :  { %v4514_v42 = vor.u32 %v4819_v35, %v4511_v61 }
0x114d   :  { %v2630_v4 = vsub.f32 1.5, %v2629_v62  ;;  %v2690_v62 = vunpack.c.l.b16 %v2676_v57  ;;  %3314 = vmatpush.bf16.msra.mxu1 %v4294_v60  ;;  %v4455_v60 = vld [vmem:[#allocation7 + $0x158] sm:$0xf0] }
0x114e   :  { %3339 = vmatpush.bf16.msra.mxu3 %v4430_v49  ;;  %v4805_v49 = vld [vmem:[#allocation7 + $0x154] sm:$0xf] }
0x114f   :  { %v2631_v17 = vmul.f32 %v5738_v14, %v2630_v4  ;;  %v4535_v4 = vld [vmem:[#allocation7 + $0x1f8] sm:$0xf0] }
0x1150   :  { %v4538_v55 = vor.u32 %v4825_v0, %v4535_v4  ;;  %v4767_v0 = vld [vmem:[#allocation7 + $0x24] sm:$0xf] }
0x1151   :  { %v2635_v25 = vsel %vm2634_vm14, %v5738_v14, %v2631_v17  ;;  %v4365_v14 = vld [vmem:[#allocation7 + $0xa0] sm:$0xf]  ;;  %v4478_v17 = vor.u32 %v4812_v18, %v4477_v59  ;;  %3315 = vmatpush.bf16.msra.mxu1 %v4286_v12  ;;  %v4787_v59 = vld [vmem:[#allocation7 + $0xc4] sm:$0xf]  ;;  %v4383_v18 = vld [vmem:[#allocation7 + $0xc8] sm:$0xf0] }
0x1152   :  { %v2637_v1 = vmul.f32 %v2635_v25, %v5714_v22  ;;  %v4494_v22 = vor.u32 %v4816_v9, %v4493_v28  ;;  %v4366_v48 = vor.u32 %v4784_v37, %v4365_v14  ;;  %3340 = vmatpush.bf16.msra.mxu3 %v4422_v2  ;;  %v4335_v25 = vld [vmem:[#allocation7 + $0x68] sm:$0xf0]  ;;  %v4327_v28 = vld [vmem:[#allocation7 + $0x58] sm:$0xf0]  ;;  %v4821_v9 = vld [vmem:[#allocation7 + $0x1d4] sm:$0xf] }
0x1153   :  { %v4338_v5 = vor.u32 %v4775_v16, %v4335_v25  ;;  %v4522_v34 = vor.u32 %v4821_v9, %v4519_v56  ;;  %v4791_v14 = vld [vmem:[#allocation7 + $0xe4] sm:$0xf]  ;;  %v4367_v16 = vld [vmem:[#allocation7 + $0xa8] sm:$0xf0]  ;;  %v4781_v9 = vld [vmem:[#allocation7 + $0x94] sm:$0xf] }
0x1154   :  { %v2640_v29 = vmul.f32 %v4897_v51, %v2637_v1  ;;  %v4357_v51 = vld [vmem:[#allocation7 + $0x90] sm:$0xf]  ;;  %3352 = vmatpush.bf16.msrb.mxu0 %v4494_v22  ;;  %3326 = vmatpush.bf16.msra.mxu2 %v4366_v48  ;;  %v4402_v37 = vor.u32 %v4791_v14, %v4399_v23  ;;  %v4771_v22 = vld [vmem:[#allocation7 + $0x44] sm:$0xf]  ;;  %v4391_v48 = vld [vmem:[#allocation7 + $0xd8] sm:$0xf0] }
0x1155   :  { %v4358_v47 = vor.u32 %v4782_v53, %v4357_v51  ;;  %v4322_v57 = vor.u32 %v4771_v22, %v4319_v40  ;;  %v4458_v53 = vor.u32 %v4805_v49, %v4455_v60  ;;  %v4815_v2 = vld [vmem:[#allocation7 + $0x1a4] sm:$0xf]  ;;  %v4797_v56 = vld [vmem:[#allocation7 + $0x114] sm:$0xf]  ;;  %v4423_v14 = vld [vmem:[#allocation7 + $0x118] sm:$0xf0] }
0x1156   :  { %v2643_v46 = vadd.f32 %v4898_v21, %v2640_v29  ;;  %v4407_v21 = vld [vmem:[#allocation7 + $0xf8] sm:$0xf0]  ;;  %3341 = vmatpush.bf16.msra.mxu3 %v4414_v26  ;;  %v4330_v29 = vor.u32 %v4773_v27, %v4327_v28  ;;  %v4498_v8 = vor.u32 %v4815_v2, %v4495_v6  ;;  %v4763_v26 = vld [vmem:[#allocation7 + $0x4] sm:$0xf]  ;;  %v4426_v23 = vor.u32 %v4797_v56, %v4423_v14  ;;  %v4415_v22 = vld [vmem:[#allocation7 + $0x108] sm:$0xf0] }
0x1157   :  { %v4410_v1 = vor.u32 %v4793_v36, %v4407_v21  ;;  %v4295_v21 = vld [vmem:[#allocation7 + $0x18] sm:$0xf0]  ;;  %v2678_v40 = vld [vmem:[%s5830_s9] ss:$2 sm:$0xf] }
0x1158   :  { %v2677_v44 = vpack.c.bf16 %v2643_v46, %v2643_v46  ;;  %3353 = vmatpush.bf16.msrb.mxu0 %v4486_v24  ;;  %3327 = vmatpush.bf16.msra.mxu2 %v4358_v47  ;;  %v4466_v46 = vor.u32 %v4807_v15, %v4463_v38  ;;  %v4817_v24 = vld [vmem:[#allocation7 + $0x1b4] sm:$0xf]  ;;  %v4303_v47 = vld [vmem:[#allocation7 + $0x28] sm:$0xf0]  ;;  %v4795_v38 = vld [vmem:[#allocation7 + $0x104] sm:$0xf] }
0x1159   :  { %v4506_v54 = vor.u32 %v4817_v24, %v4503_v58  ;;  %v4306_v4 = vor.u32 %v4767_v0, %v4303_v47  ;;  %v4351_v15 = vld [vmem:[#allocation7 + $0x88] sm:$0xf0]  ;;  %v4418_v35 = vor.u32 %v4795_v38, %v4415_v22  ;;  %v2683_v61 = vperm.slane %v2678_v40, 3 }
0x115a   :  { %v2691_v52 = vunpack.c.l.b16 %v2677_v44  ;;  %v4789_v44 = vld [vmem:[#allocation7 + $0xd4] sm:$0xf]  ;;  %v2681_v60 = vperm.slane %v2678_v40, 1 }
0x115b   :  { %v4394_v51 = vor.u32 %v4789_v44, %v4391_v48 }
0x115c   :  { %v2692_v39 = vrot.slane %v2691_v52, 7  ;;  %3354 = vmatpush.bf16.msrb.mxu0 %v4478_v17  ;;  %3328 = vmatpush.bf16.msra.mxu2 %v4350_v13  ;;  %v4314_v52 = vor.u32 %v4769_v31, %v4311_v32  ;;  %v4765_v17 = vld [vmem:[#allocation7 + $0x14] sm:$0xf]  ;;  %v4431_v13 = vld [vmem:[#allocation7 + $0x128] sm:$0xf0]  ;;  %v2682_v31 = vperm.slane %v2678_v40, 2 }
0x115d   :  { %v4298_v10 = vor.u32 %v4765_v17, %v4295_v21  ;;  %v4834_v32 = vld [vmem:[%s5829_s8 + $0x38] sm:$0xff]  ;;  %v4840_v17 = vld [vmem:[%s5829_s8 + $0x68] sm:$0xff]  ;;  %v4827_v21 = vld [vmem:[%s5829_s8] sm:$0xff] }
0x115e   :  { %v2694_v7 = vsel %vm2693_vm9, %v2692_v39, %v2690_v62  ;;  %v4386_v62 = vor.u32 %v4787_v59, %v4383_v18  ;;  %v4447_v39 = vld [vmem:[#allocation7 + $0x148] sm:$0xf0] }
0x115f   :  { %v2695_v20 = vpack.c.b16 %v2694_v7, %v2694_v7  ;;  %v4450_v41 = vor.u32 %v4803_v30, %v4447_v39  ;;  %v4785_v7 = vld [vmem:[#allocation7 + $0xb4] sm:$0xf] }
0x1160   :  { %v4378_v36 = vor.u32 %v4785_v7, %v4375_v43  ;;  %v4831_v7 = vld [vmem:[%s5829_s8 + $0x20] sm:$0xff]  ;;  %v4830_v43 = vld [vmem:[%s5829_s8 + $0x18] sm:$0xff] }
0x1161   :  { %2865 = vmatmul.bf16.vlgmr.msrb.gmra.mxu1 %v2695_v20  ;;  %2878 = vmatmul.bf16.vlgmr.msrb.gmra.mxu2 %v2695_v20 }
0x1162   :  { %2891 = vmatmul.bf16.vlgmr.msrb.gmra.mxu3 %v2695_v20  ;;  %2904 = vmatmul.bf16.vlgmr.msra.gmra.mxu0 %v2695_v20  ;;  %v4439_v20 = vld [vmem:[#allocation7 + $0x138] sm:$0xf0] }
0x1163   :  { %3360 = vmatpush.bf16.msrb.mxu1 %v4346_v19  ;;  %3399 = vmatpush.bf16.msra.mxu0 %v4538_v55  ;;  %v4442_v12 = vor.u32 %v4801_v11, %v4439_v20  ;;  %v4487_v19 = vld [vmem:[#allocation7 + $0x198] sm:$0xf0]  ;;  %v4783_v55 = vld [vmem:[#allocation7 + $0xa4] sm:$0xf]  ;;  %v4841_v20 = vld [vmem:[%s5829_s8 + $0x70] sm:$0xff] }
0x1164   :  { %3373 = vmatpush.bf16.msrb.mxu2 %v4410_v1  ;;  %3386 = vmatpush.bf16.msrb.mxu3 %v4474_v63  ;;  %v4490_v25 = vor.u32 %v4813_v3, %v4487_v19  ;;  %v4370_v50 = vor.u32 %v4783_v55, %v4367_v16  ;;  %v4434_v1 = vor.u32 %v4799_v45, %v4431_v13  ;;  %v4287_v63 = vld [vmem:[#allocation7 + $0x8] sm:$0xf0]  ;;  %v4842_v11 = vld [vmem:[%s5829_s8 + $0x78] sm:$0xff]  ;;  %v4839_v3 = vld [vmem:[%s5829_s8 + $0x60] sm:$0xff] }
0x1165   :  { %v4290_v27 = vor.u32 %v4763_v26, %v4287_v63  ;;  %v4837_v19 = vld [vmem:[%s5829_s8 + $0x50] sm:$0xff]  ;;  %v4836_v16 = vld [vmem:[%s5829_s8 + $0x48] sm:$0xff]  ;;  %v4835_v45 = vld [vmem:[%s5829_s8 + $0x40] sm:$0xff] }
0x1167   :  { %3361 = vmatpush.bf16.msrb.mxu1 %v4338_v5  ;;  %3400 = vmatpush.bf16.msra.mxu0 %v4530_v33  ;;  %v4811_v5 = vld [vmem:[#allocation7 + $0x184] sm:$0xf]  ;;  %v4479_v33 = vld [vmem:[#allocation7 + $0x188] sm:$0xf0] }
0x1168   :  { %3374 = vmatpush.bf16.msrb.mxu2 %v4402_v37  ;;  %3387 = vmatpush.bf16.msrb.mxu3 %v4466_v46  ;;  %v4482_v28 = vor.u32 %v4811_v5, %v4479_v33  ;;  %v4779_v37 = vld [vmem:[#allocation7 + $0x84] sm:$0xf] }
0x1169   :  { %v4354_v46 = vor.u32 %v4779_v37, %v4351_v15 }
0x116b   :  { %3362 = vmatpush.bf16.msrb.mxu1 %v4330_v29  ;;  %3401 = vmatpush.bf16.msra.mxu0 %v4522_v34  ;;  %v4359_v29 = vld [vmem:[#allocation7 + $0x98] sm:$0xf0] }
0x116c   :  { %3375 = vmatpush.bf16.msrb.mxu2 %v4394_v51  ;;  %3388 = vmatpush.bf16.msrb.mxu3 %v4458_v53  ;;  %v4362_v34 = vor.u32 %v4781_v9, %v4359_v29 }
0x116f   :  { %3363 = vmatpush.bf16.msrb.mxu1 %v4322_v57  ;;  %3402 = vmatpush.bf16.msra.mxu0 %v4514_v42  ;;  %v2680_v57 = vperm.slane %v2678_v40, 0 }
0x1170   :  { %3376 = vmatpush.bf16.msrb.mxu2 %v4386_v62  ;;  %3389 = vmatpush.bf16.msrb.mxu3 %v4450_v41  ;;  %v4833_v62 = vld [vmem:[%s5829_s8 + $0x30] sm:$0xff] }
0x1173   :  { %3364 = vmatpush.bf16.msrb.mxu1 %v4314_v52  ;;  %3403 = vmatpush.bf16.msra.mxu0 %v4506_v54 }
0x1174   :  { %3377 = vmatpush.bf16.msrb.mxu2 %v4378_v36  ;;  %3390 = vmatpush.bf16.msrb.mxu3 %v4442_v12  ;;  %v4829_v36 = vld [vmem:[%s5829_s8 + $0x10] sm:$0xff]  ;;  %v4828_v12 = vld [vmem:[%s5829_s8 + $0x8] sm:$0xff] }
0x1177   :  { %3365 = vmatpush.bf16.msrb.mxu1 %v4306_v4  ;;  %3404 = vmatpush.bf16.msra.mxu0 %v4498_v8  ;;  %v4832_v8 = vld [vmem:[%s5829_s8 + $0x28] sm:$0xff] }
0x1178   :  { %3378 = vmatpush.bf16.msrb.mxu2 %v4370_v50  ;;  %3391 = vmatpush.bf16.msrb.mxu3 %v4434_v1  ;;  %v4282_v50 = vld [vmem:[%s5830_s9 + $0x1] ss:$2 sm:$0x3] }
0x1179   :  { %v2984_v13 = vperm.slane %v4282_v50, 0  ;;  %v2985_v15 = vperm.slane %v4282_v50, 1 }
0x117b   :  { %3366 = vmatpush.bf16.msrb.mxu1 %v4298_v10  ;;  %3405 = vmatpush.bf16.msra.mxu0 %v4490_v25  ;;  %v4838_v10 = vld [vmem:[%s5829_s8 + $0x58] sm:$0xff] }
0x117c   :  { %3379 = vmatpush.bf16.msrb.mxu2 %v4362_v34  ;;  %3392 = vmatpush.bf16.msrb.mxu3 %v4426_v23 }
0x117f   :  { %3367 = vmatpush.bf16.msrb.mxu1 %v4290_v27  ;;  %3406 = vmatpush.bf16.msra.mxu0 %v4482_v28 }
0x1180   :  { %3380 = vmatpush.bf16.msrb.mxu2 %v4354_v46  ;;  %3393 = vmatpush.bf16.msrb.mxu3 %v4418_v35 }
0x11de   :  { %v2866_v42 = vpop.f32.mrf.mxu1 }
0x11df   :  { %v2867_v44 = vadd.f32 %v2866_v42, %v2680_v57  ;;  %v2905_v48 = vpop.f32.mrf.mxu0 }
0x11e0   :  { %v2906_v49 = vadd.f32 %v2905_v48, %v2683_v61 }
0x11e1   :  { %v2909_v51 = vmax.f32 %v2867_v44, 0.0 }
0x11e2   :  { %v2912_v53 = vmax.f32 %v2906_v49, 0.0 }
0x11e3   :  { %v2977_v52 = vpack.c.bf16 %v2909_v51, %v2909_v51 }
0x11e4   :  { %v2980_v24 = vpack.c.bf16 %v2912_v53, %v2912_v53  ;;  %v2879_v58 = vpop.f32.mrf.mxu2 }
0x11e5   :  { %v2880_v54 = vadd.f32 %v2879_v58, %v2681_v60  ;;  %v2892_v59 = vpop.f32.mrf.mxu3  ;;  %3316 = vmatmul.bf16.vlgmr.msra.gmra.mxu1 %v2977_v52 }
0x11e6   :  { %v2893_v18 = vadd.f32 %v2892_v59, %v2682_v31  ;;  %3355 = vmatmul.bf16.vlgmr.msrb.gmra.mxu0 %v2980_v24  ;;  %v2868_v30 = vpop.f32.mrf.mxu1  ;;  %3546 = vmatpush.bf16.msra.mxu1 %v4834_v32  ;;  %v4899_v31 = vld [vmem:[%s5823_s2 + $0xe] ss:$0 sm:$0xff] }
0x11e7   :  { %v2910_v39 = vmax.f32 %v2880_v54, 0.0  ;;  %v2907_v41 = vpop.f32.mrf.mxu0 }
0x11e8   :  { %v2911_v0 = vmax.f32 %v2893_v18, 0.0 }
0x11e9   :  { %v2978_v47 = vpack.c.bf16 %v2910_v39, %v2910_v39 }
0x11ea   :  { %v2979_v2 = vpack.c.bf16 %v2911_v0, %v2911_v0  ;;  %3547 = vmatpush.bf16.msra.mxu1 %v4833_v62 }
0x11eb   :  { %3329 = vmatmul.bf16.vlgmr.msra.gmra.mxu2 %v2978_v47 }
0x11ec   :  { %3342 = vmatmul.bf16.vlgmr.msra.gmra.mxu3 %v2979_v2  ;;  %v2881_v4 = vpop.f32.mrf.mxu2  ;;  %3559 = vmatpush.bf16.msra.mxu2 %v4842_v11 }
0x11ed   :  { %v2894_v6 = vpop.f32.mrf.mxu3 }
0x11ee   :  { %3548 = vmatpush.bf16.msra.mxu1 %v4832_v8 }
0x11f0   :  { %3560 = vmatpush.bf16.msra.mxu2 %v4841_v20 }
0x11f2   :  { %3549 = vmatpush.bf16.msra.mxu1 %v4831_v7 }
0x11f4   :  { %3561 = vmatpush.bf16.msra.mxu2 %v4840_v17 }
0x11f5   :  { %3368 = vmatmul.bf16.vlgmr.msrb.gmra.mxu1 %v2977_v52 }
0x11f6   :  { %3407 = vmatmul.bf16.vlgmr.msra.gmra.mxu0 %v2980_v24  ;;  %3550 = vmatpush.bf16.msra.mxu1 %v4830_v43 }
0x11f8   :  { %3562 = vmatpush.bf16.msra.mxu2 %v4839_v3 }
0x11fa   :  { %3551 = vmatpush.bf16.msra.mxu1 %v4829_v36 }
0x11fb   :  { %3381 = vmatmul.bf16.vlgmr.msrb.gmra.mxu2 %v2978_v47 }
0x11fc   :  { %3394 = vmatmul.bf16.vlgmr.msrb.gmra.mxu3 %v2979_v2  ;;  %3563 = vmatpush.bf16.msra.mxu2 %v4838_v10 }
0x11fe   :  { %3552 = vmatpush.bf16.msra.mxu1 %v4828_v12 }
0x1200   :  { %3564 = vmatpush.bf16.msra.mxu2 %v4837_v19 }
0x1202   :  { %3553 = vmatpush.bf16.msra.mxu1 %v4827_v21 }
0x1204   :  { %3565 = vmatpush.bf16.msra.mxu2 %v4836_v16 }
0x1208   :  { %3566 = vmatpush.bf16.msra.mxu2 %v4835_v45 }
0x1262   :  { %v3317_v55 = vpop.f32.mrf.mxu1 }
0x1263   :  { %v3356_v25 = vpop.f32.mrf.mxu0  ;;  %v3318_v63 = vadd.f32 %v3317_v55, %v2984_v13 }
0x126a   :  { %v3319_v26 = vpop.f32.mrf.mxu1 }
0x126b   :  { %v3358_v1 = vpop.f32.mrf.mxu0 }
0x126e   :  { %v3330_v5 = vpop.f32.mrf.mxu2 }
0x126f   :  { %v3331_v33 = vadd.f32 %v3330_v5, %v3318_v63  ;;  %v3343_v27 = vpop.f32.mrf.mxu3 }
0x1271   :  { %v3344_v28 = vadd.f32 %v3343_v27, %v3331_v33 }
0x1272   :  { %v3369_v9 = vpop.f32.mrf.mxu1 }
0x1273   :  { %v3357_v29 = vadd.f32 %v3356_v25, %v3344_v28  ;;  %v3408_v56 = vpop.f32.mrf.mxu0  ;;  %v3370_v22 = vadd.f32 %v3369_v9, %v2985_v15 }
0x1275   :  { %v3412_v34 = vmax.f32 %v3357_v29, 0.0 }
0x1276   :  { %v3332_v14 = vpop.f32.mrf.mxu2 }
0x1277   :  { %v3446_v23 = vpack.c.bf16 %v3412_v34, %v3412_v34  ;;  %v3345_v37 = vpop.f32.mrf.mxu3 }
0x1279   :  { %3554 = vmatmul.bf16.vlgmr.msra.gmra.mxu1 %v3446_v23 }
0x127a   :  { %v3371_v38 = vpop.f32.mrf.mxu1 }
0x127b   :  { %v3410_v46 = vpop.f32.mrf.mxu0 }
0x127e   :  { %v3382_v40 = vpop.f32.mrf.mxu2 }
0x127f   :  { %v3383_v35 = vadd.f32 %v3382_v40, %v3370_v22  ;;  %v3395_v57 = vpop.f32.mrf.mxu3 }
0x1281   :  { %v3396_v61 = vadd.f32 %v3395_v57, %v3383_v35 }
0x1283   :  { %v3409_v42 = vadd.f32 %v3408_v56, %v3396_v61 }
0x1285   :  { %v3413_v44 = vmax.f32 %v3409_v42, 0.0 }
0x1286   :  { %v3384_v48 = vpop.f32.mrf.mxu2 }
0x1287   :  { %v3447_v49 = vpack.c.bf16 %v3413_v44, %v3413_v44  ;;  %v3397_v51 = vpop.f32.mrf.mxu3 }
0x1289   :  { %3567 = vmatmul.bf16.vlgmr.msra.gmra.mxu2 %v3447_v49 }
0x12f6   :  { %v3555_v60 = vpop.f32.mrf.mxu1 }
0x12f7   :  { %v3556_v32 = vadd.f32 %v4899_v31, %v3555_v60 }
0x12fe   :  { %v3557_v53 = vpop.f32.mrf.mxu1 }
0x130c   :  { %v3568_v52 = vpop.f32.mrf.mxu2 }
0x130d   :  { %v3569_v24 = vadd.f32 %v3568_v52, %v3556_v32 }
0x130f   :  { %3572 = vst [vmem:[#allocation8] sm:$0x3] %v3569_v24 }
0x1310   :  { %3583 = dma.vmem_to_hbm [thread:$0]  %s3579_s15, 32, %s3581_s17, [#allocation4]  }
0x1314   :  { %v3570_v58 = vpop.f32.mrf.mxu2 }
0x1315   :  { %5136 = dma.done.wait [#allocation4], 32  }
0x1316   :  { %5137 = vsyncadd [#allocation4], 4294967264 }
0x1317   :  { %3588 = vsyncpa [#allocation3], 1 }
0x1318   :  { %3589 = vsyncpa [#allocation6], 1 }
0x1319   :  { %3590 = vsyncpa [#allocation4], 1 }

</bundles_post_ra>
